<compile_context>
chip_gen: v7x
topology: tpu7x:2x2x1
jax: 0.10.0
libtpu: 0.0.40
codegen_flags: <defaults>
</compile_context>

<pallas_src>
import jax
import jax.numpy as jnp
from jax.experimental import pallas as pl
from jax.experimental.pallas import tpu as pltpu

HIDDEN = 1260        # fixed intermediate width from the module
HIDDEN_PAD = 1280    # padded to a multiple of 128 lanes
LANE = 128


def _round_up(n, m):
    return ((n + m - 1) // m) * m


# ----------------------------------------------------------------------------- kernel
def _mlp_kernel(x_ref,
                w1_ref, b1_ref,
                w2_ref, b2_ref,
                w3_ref, b3_ref,
                w4_ref, b4_ref,
                o_ref):
    """Fused 4-layer MLP (eval-mode BN pre-folded into weights) + ReLU; one batch tile/step."""
    x = x_ref[...].astype(jnp.bfloat16)              # f32 tile in HBM -> bf16 in-kernel (no extra HBM pass)

    # L1 -> ReLU (BN1 folded into W2/b2).  Bias-add + ReLU + downcast fused per layer
    # so the f32 [tile, 1280] intermediate has a minimal live range (v5e vst/spill).
    h = jnp.maximum(
        jnp.dot(x, w1_ref[...], preferred_element_type=jnp.float32) + b1_ref[...],
        0.0).astype(jnp.bfloat16)

    # L2 -> ReLU (BN2 folded into W3/b3)
    h = jnp.maximum(
        jnp.dot(h, w2_ref[...], preferred_element_type=jnp.float32) + b2_ref[...],
        0.0).astype(jnp.bfloat16)

    # L3 -> ReLU (BN3 folded into W4/b4)
    h = jnp.maximum(
        jnp.dot(h, w3_ref[...], preferred_element_type=jnp.float32) + b3_ref[...],
        0.0).astype(jnp.bfloat16)

    # L4 -> ReLU (== trailing non_linearity child; idempotent, applied once)
    h = jnp.maximum(
        jnp.dot(h, w4_ref[...], preferred_element_type=jnp.float32) + b4_ref[...],
        0.0)

    o_ref[...] = h.astype(o_ref.dtype)


# ----------------------------------------------------------------------------- wrapper
def large_drug_projector(x, kp, latent_dim, *, batch_tile=256, out_dtype=jnp.float32):
    """x: [B, drug_dim] float32.  kp: folded/padded params from fold_and_pad_params."""
    B, drug_dim = x.shape
    latent_pad = kp["w4"].shape[1]
    out_itemsize = jnp.dtype(out_dtype).itemsize

    # Grid: one batch tile per step.  Round the step count up to an even number when
    # more than one step is needed so the "parallel" axis splits evenly over v7x's
    # two TensorCores (one extra padded tile is cheap at these problem sizes).
    steps = int(pl.cdiv(max(B, 1), batch_tile))
    if steps > 1 and steps % 2 == 1:
        steps += 1
    B_pad = steps * batch_tile
    if B_pad != B:
        x = jnp.pad(x, ((0, B_pad - B), (0, 0)))     # only pad op; cast happens in-kernel

    operands = (
        x,
        kp["w1"], kp["b1"],
        kp["w2"], kp["b2"],
        kp["w3"], kp["b3"],
        kp["w4"], kp["b4"],
    )
    param_bytes = sum(int(a.size) * a.dtype.itemsize for a in operands[1:])

    # Generation-aware VMEM cap (v7x: 64 MiB/TC; v5e/v6e: 128 MiB).
    try:
        vmem_cap = int(0.85 * pltpu.get_tpu_info().vmem_capacity_bytes)
    except Exception:
        vmem_cap = int(0.85 * (64 << 20))            # conservative (v7x) fallback

    # Advisory cost estimate so XLA schedules the surrounding pad/slice around the call.
    flops = 2 * B_pad * (drug_dim * HIDDEN_PAD + HIDDEN_PAD * latent_pad
                         + 2 * latent_pad * latent_pad)
    bytes_accessed = (B_pad * drug_dim * 4 + param_bytes + B_pad * latent_pad * out_itemsize)

    def build(single_buffer_weights):
        # VMEM budget: params resident (once if single-buffered, twice otherwise),
        # x/out tiles double-buffered, intermediate activations, plus headroom.
        p_factor = 1 if single_buffer_weights else 2
        io_bytes = 2 * (batch_tile * drug_dim * 4 + batch_tile * latent_pad * out_itemsize)
        act_bytes = 3 * batch_tile * HIDDEN_PAD * 4
        vmem_limit = int(min(max(p_factor * param_bytes + io_bytes + act_bytes + (8 << 20),
                                 32 << 20), vmem_cap))

        if single_buffer_weights:
            # Weights/biases never change across grid steps -> single-buffer them.
            w_spec = lambda arr: pl.BlockSpec(arr.shape, lambda i: (0, 0),
                                              pipeline_mode=pl.Buffered(1))
        else:
            w_spec = lambda arr: pl.BlockSpec(arr.shape, lambda i: (0, 0))

        in_specs = [pl.BlockSpec((batch_tile, drug_dim), lambda i: (i, 0))]
        in_specs += [w_spec(a) for a in operands[1:]]

        return pl.pallas_call(
            _mlp_kernel,
            out_shape=jax.ShapeDtypeStruct((B_pad, latent_pad), out_dtype),
            grid=(steps,),
            in_specs=in_specs,
            out_specs=pl.BlockSpec((batch_tile, latent_pad), lambda i: (i, 0)),
            compiler_params=pltpu.CompilerParams(
                dimension_semantics=("parallel",),
                vmem_limit_bytes=vmem_limit),
            cost_estimate=pl.CostEstimate(flops=flops, transcendentals=0,
                                          bytes_accessed=bytes_accessed),
        )

    try:
        out = build(True)(*operands)
    except Exception:
        # Fallback for jax versions that reject Buffered(1): default double-buffering.
        out = build(False)(*operands)

    return out[:B, :latent_dim]


# ----------------------------------------------------------------------------- params
def init_raw_params(key, drug_dim, latent_dim):
    """Synthetic torch-layout params (weights (out,in)), with non-trivial BN stats."""
    raw = {}
    dims = [(HIDDEN, drug_dim), (latent_dim, HIDDEN),
            (latent_dim, latent_dim), (latent_dim, latent_dim)]
    for li, (out_f, in_f) in enumerate(dims, start=1):
        key, kw, kb, kg, kbe, km, kv = jax.random.split(key, 7)
        std = (2.0 / (in_f + out_f)) ** 0.5                       # xavier_normal_
        raw[f"w{li}"] = std * jax.random.normal(kw, (out_f, in_f), jnp.float32)
        bound = 1.0 / (in_f ** 0.5)
        raw[f"b{li}"] = jax.random.uniform(kb, (out_f,), jnp.float32, -bound, bound)
        if li <= 3:  # bn1/bn2/bn3 buffers (eval mode)
            raw[f"gamma{li}"] = jax.random.uniform(kg, (out_f,), jnp.float32, 0.5, 1.5)
            raw[f"beta{li}"] = 0.1 * jax.random.normal(kbe, (out_f,), jnp.float32)
            raw[f"mean{li}"] = 0.1 * jax.random.normal(km, (out_f,), jnp.float32)
            raw[f"var{li}"] = jax.random.uniform(kv, (out_f,), jnp.float32, 0.5, 1.5)
    return raw


def fold_and_pad_params(raw, latent_dim, eps=1e-5):
    """Fold eval-mode BN into the NEXT linear, pad to lane-dense shapes, cast bf16.

    Padding is exact: padded W rows/cols and padded biases are zero, ReLU(0)=0,
    and padded output columns are sliced off by the wrapper.
    """
    latent_pad = _round_up(max(latent_dim, LANE), LANE)

    w1, b1 = raw["w1"].T, raw["b1"]          # (drug_dim, 1260)
    w2, b2 = raw["w2"].T, raw["b2"]          # (1260, latent)
    w3, b3 = raw["w3"].T, raw["b3"]          # (latent, latent)
    w4, b4 = raw["w4"].T, raw["b4"]          # (latent, latent)

    def bn(i):
        s = raw[f"gamma{i}"] / jnp.sqrt(raw[f"var{i}"] + eps)
        t = raw[f"beta{i}"] - raw[f"mean{i}"] * s
        return s, t

    s1, t1 = bn(1)
    s2, t2 = bn(2)
    s3, t3 = bn(3)

    w2f, b2f = s1[:, None] * w2, t1 @ w2 + b2
    w3f, b3f = s2[:, None] * w3, t2 @ w3 + b3
    w4f, b4f = s3[:, None] * w4, t3 @ w4 + b4

    def pad_w(w, rows, cols):
        return jnp.pad(w, ((0, rows - w.shape[0]), (0, cols - w.shape[1])))

    def pad_b(b, cols):
        return jnp.pad(b, (0, cols - b.shape[0])).reshape(1, cols)

    kp = {
        "w1": pad_w(w1, w1.shape[0], HIDDEN_PAD).astype(jnp.bfloat16),
        "b1": pad_b(b1, HIDDEN_PAD),                               # biases stay f32
        "w2": pad_w(w2f, HIDDEN_PAD, latent_pad).astype(jnp.bfloat16),
        "b2": pad_b(b2f, latent_pad),
        "w3": pad_w(w3f, latent_pad, latent_pad).astype(jnp.bfloat16),
        "b3": pad_b(b3f, latent_pad),
        "w4": pad_w(w4f, latent_pad, latent_pad).astype(jnp.bfloat16),
        "b4": pad_b(b4f, latent_pad),
    }
    return kp


# ----------------------------------------------------------------------------- references
def reference_semantic(x, raw, eps=1e-5):
    """Original module semantics (eval), f32, unfolded BN."""
    act = lambda v: jnp.maximum(v, 0.0)

    def bn(h, i):
        s = raw[f"gamma{i}"] / jnp.sqrt(raw[f"var{i}"] + eps)
        t = raw[f"beta{i}"] - raw[f"mean{i}"] * s
        return h * s + t

    h = bn(act(x @ raw["w1"].T + raw["b1"]), 1)
    h = bn(act(h @ raw["w2"].T + raw["b2"]), 2)
    h = bn(act(h @ raw["w3"].T + raw["b3"]), 3)
    h = act(h @ raw["w4"].T + raw["b4"])
    return act(h)   # trailing non_linearity child (idempotent)


def reference_folded(x, kp, latent_dim):
    """Same math/dtype path as the kernel (folded bf16 weights, f32 accumulation)."""
    act = lambda v: jnp.maximum(v, 0.0)
    h = act(jnp.dot(x.astype(jnp.bfloat16), kp["w1"],
                    preferred_element_type=jnp.float32) + kp["b1"]).astype(jnp.bfloat16)
    h = act(jnp.dot(h, kp["w2"],
                    preferred_element_type=jnp.float32) + kp["b2"]).astype(jnp.bfloat16)
    h = act(jnp.dot(h, kp["w3"],
                    preferred_element_type=jnp.float32) + kp["b3"]).astype(jnp.bfloat16)
    h = act(jnp.dot(h, kp["w4"],
                    preferred_element_type=jnp.float32) + kp["b4"])
    return h[:, :latent_dim]


# ----------------------------------------------------------------------------- main
if __name__ == "__main__":
    drug_dim, latent_dim, batch = 32, 64, 200   # batch pads to 256 -> grid=(2,) with tile 128
    key = jax.random.PRNGKey(0)
    kx, kparams = jax.random.split(key)

    x = jax.random.normal(kx, (batch, drug_dim), dtype=jnp.float32)
    raw = init_raw_params(kparams, drug_dim, latent_dim)
    kp = fold_and_pad_params(raw, latent_dim)

    out = large_drug_projector(x, kp, latent_dim, batch_tile=128)
    out = jax.block_until_ready(out)
    assert out.shape == (batch, latent_dim)

    # Tight check: kernel vs. identical-path pure-JAX computation.
    ref_match = reference_folded(x, kp, latent_dim)
    assert jnp.allclose(out, ref_match, atol=2e-3, rtol=2e-3), "mismatch vs folded reference"

    # Semantic check: kernel (bf16, folded BN) vs. original f32 module semantics.
    ref_sem = reference_semantic(x, raw)
    assert jnp.allclose(out, ref_sem, atol=5e-2, rtol=5e-2), "mismatch vs module semantics"

    print("KERNEL_OK")
</pallas_src>

<mosaic_0001>
module attributes {stable_mosaic.version = 11 : i64} {
  func.func @_mlp_kernel(%arg0: i32, %arg1: memref<128x32xf32, #tpu.memory_space<vmem>>, %arg2: memref<32x1280xbf16, #tpu.memory_space<vmem>>, %arg3: memref<1x1280xf32, #tpu.memory_space<vmem>>, %arg4: memref<1280x128xbf16, #tpu.memory_space<vmem>>, %arg5: memref<1x128xf32, #tpu.memory_space<vmem>>, %arg6: memref<128x128xbf16, #tpu.memory_space<vmem>>, %arg7: memref<1x128xf32, #tpu.memory_space<vmem>>, %arg8: memref<128x128xbf16, #tpu.memory_space<vmem>>, %arg9: memref<1x128xf32, #tpu.memory_space<vmem>>, %arg10: memref<128x128xf32, #tpu.memory_space<vmem>>) attributes {dimension_semantics = [#tpu.dimension_semantics<parallel>], iteration_bounds = array<i64: 2>, scalar_prefetch = 0 : i64, scratch_operands = 0 : i64, tpu.core_type = #tpu.core_type<tc>, window_params = [{transform_indices = @transform_0, window_bounds = array<i64: 128, 32>}, {pipeline_mode = #tpu.pipeline_mode<synchronous>, transform_indices = @transform_1, window_bounds = array<i64: 32, 1280>}, {pipeline_mode = #tpu.pipeline_mode<synchronous>, transform_indices = @transform_2, window_bounds = array<i64: 1, 1280>}, {pipeline_mode = #tpu.pipeline_mode<synchronous>, transform_indices = @transform_3, window_bounds = array<i64: 1280, 128>}, {pipeline_mode = #tpu.pipeline_mode<synchronous>, transform_indices = @transform_4, window_bounds = array<i64: 1, 128>}, {pipeline_mode = #tpu.pipeline_mode<synchronous>, transform_indices = @transform_5, window_bounds = array<i64: 128, 128>}, {pipeline_mode = #tpu.pipeline_mode<synchronous>, transform_indices = @transform_6, window_bounds = array<i64: 1, 128>}, {pipeline_mode = #tpu.pipeline_mode<synchronous>, transform_indices = @transform_7, window_bounds = array<i64: 128, 128>}, {pipeline_mode = #tpu.pipeline_mode<synchronous>, transform_indices = @transform_8, window_bounds = array<i64: 1, 128>}, {transform_indices = @transform_9, window_bounds = array<i64: 128, 128>}]} {
    %c0 = arith.constant 0 : index
    %c0_0 = arith.constant 0 : index
    %0 = vector.load %arg1[%c0, %c0_0] : memref<128x32xf32, #tpu.memory_space<vmem>>, vector<128x32xf32>
    %1 = arith.truncf %0 : vector<128x32xf32> to vector<128x32xbf16>
    %c0_1 = arith.constant 0 : index
    %c0_2 = arith.constant 0 : index
    %2 = vector.load %arg2[%c0_1, %c0_2] : memref<32x1280xbf16, #tpu.memory_space<vmem>>, vector<32x1280xbf16>
    %cst = arith.constant dense<0.000000e+00> : vector<128x1280xf32>
    %3 = tpu.matmul %1, %2, %cst {dimension_numbers = #tpu.dot_dimension_numbers<[1], [0], [0], [1], [0, 0, 1, 1], [], []>} : vector<128x32xbf16>, vector<32x1280xbf16>, vector<128x1280xf32> -> vector<128x1280xf32>
    %c0_3 = arith.constant 0 : index
    %c0_4 = arith.constant 0 : index
    %4 = vector.load %arg3[%c0_3, %c0_4] : memref<1x1280xf32, #tpu.memory_space<vmem>>, vector<1x1280xf32>
    %5 = vector.broadcast %4 : vector<1x1280xf32> to vector<128x1280xf32>
    %6 = arith.addf %3, %5 : vector<128x1280xf32>
    %cst_5 = arith.constant 0.000000e+00 : f32
    %7 = vector.broadcast %cst_5 : f32 to vector<128x1280xf32>
    %8 = arith.maximumf %6, %7 : vector<128x1280xf32>
    %9 = arith.truncf %8 : vector<128x1280xf32> to vector<128x1280xbf16>
    %c0_6 = arith.constant 0 : index
    %c0_7 = arith.constant 0 : index
    %10 = vector.load %arg4[%c0_6, %c0_7] : memref<1280x128xbf16, #tpu.memory_space<vmem>>, vector<1280x128xbf16>
    %cst_8 = arith.constant dense<0.000000e+00> : vector<128x128xf32>
    %11 = tpu.matmul %9, %10, %cst_8 {dimension_numbers = #tpu.dot_dimension_numbers<[1], [0], [0], [1], [0, 0, 1, 1], [], []>} : vector<128x1280xbf16>, vector<1280x128xbf16>, vector<128x128xf32> -> vector<128x128xf32>
    %c0_9 = arith.constant 0 : index
    %c0_10 = arith.constant 0 : index
    %12 = vector.load %arg5[%c0_9, %c0_10] : memref<1x128xf32, #tpu.memory_space<vmem>>, vector<1x128xf32>
    %13 = vector.broadcast %12 : vector<1x128xf32> to vector<128x128xf32>
    %14 = arith.addf %11, %13 : vector<128x128xf32>
    %cst_11 = arith.constant 0.000000e+00 : f32
    %15 = vector.broadcast %cst_11 : f32 to vector<128x128xf32>
    %16 = arith.maximumf %14, %15 : vector<128x128xf32>
    %17 = arith.truncf %16 : vector<128x128xf32> to vector<128x128xbf16>
    %c0_12 = arith.constant 0 : index
    %c0_13 = arith.constant 0 : index
    %18 = vector.load %arg6[%c0_12, %c0_13] : memref<128x128xbf16, #tpu.memory_space<vmem>>, vector<128x128xbf16>
    %cst_14 = arith.constant dense<0.000000e+00> : vector<128x128xf32>
    %19 = tpu.matmul %17, %18, %cst_14 {dimension_numbers = #tpu.dot_dimension_numbers<[1], [0], [0], [1], [0, 0, 1, 1], [], []>} : vector<128x128xbf16>, vector<128x128xbf16>, vector<128x128xf32> -> vector<128x128xf32>
    %c0_15 = arith.constant 0 : index
    %c0_16 = arith.constant 0 : index
    %20 = vector.load %arg7[%c0_15, %c0_16] : memref<1x128xf32, #tpu.memory_space<vmem>>, vector<1x128xf32>
    %21 = vector.broadcast %20 : vector<1x128xf32> to vector<128x128xf32>
    %22 = arith.addf %19, %21 : vector<128x128xf32>
    %cst_17 = arith.constant 0.000000e+00 : f32
    %23 = vector.broadcast %cst_17 : f32 to vector<128x128xf32>
    %24 = arith.maximumf %22, %23 : vector<128x128xf32>
    %25 = arith.truncf %24 : vector<128x128xf32> to vector<128x128xbf16>
    %c0_18 = arith.constant 0 : index
    %c0_19 = arith.constant 0 : index
    %26 = vector.load %arg8[%c0_18, %c0_19] : memref<128x128xbf16, #tpu.memory_space<vmem>>, vector<128x128xbf16>
    %cst_20 = arith.constant dense<0.000000e+00> : vector<128x128xf32>
    %27 = tpu.matmul %25, %26, %cst_20 {dimension_numbers = #tpu.dot_dimension_numbers<[1], [0], [0], [1], [0, 0, 1, 1], [], []>} : vector<128x128xbf16>, vector<128x128xbf16>, vector<128x128xf32> -> vector<128x128xf32>
    %c0_21 = arith.constant 0 : index
    %c0_22 = arith.constant 0 : index
    %28 = vector.load %arg9[%c0_21, %c0_22] : memref<1x128xf32, #tpu.memory_space<vmem>>, vector<1x128xf32>
    %29 = vector.broadcast %28 : vector<1x128xf32> to vector<128x128xf32>
    %30 = arith.addf %27, %29 : vector<128x128xf32>
    %cst_23 = arith.constant 0.000000e+00 : f32
    %31 = vector.broadcast %cst_23 : f32 to vector<128x128xf32>
    %32 = arith.maximumf %30, %31 : vector<128x128xf32>
    %c0_24 = arith.constant 0 : index
    %c0_25 = arith.constant 0 : index
    %33 = vector.load %arg10[%c0_24, %c0_25] : memref<128x128xf32, #tpu.memory_space<vmem>>, vector<128x128xf32>
    tpu.vector_store %arg10[%c0_24, %c0_25], %32 {strides = array<i32>} : memref<128x128xf32, #tpu.memory_space<vmem>>, vector<128x128xf32>,
    return
  }
  func.func @transform_0(%arg0: i32) -> (i32, i32) {
    %c0_i32 = arith.constant 0 : i32
    %c0_i32_0 = arith.constant 0 : i32
    return %arg0, %c0_i32 : i32, i32
  }
  func.func @transform_1(%arg0: i32) -> (i32, i32) {
    %c0_i32 = arith.constant 0 : i32
    %c0_i32_0 = arith.constant 0 : i32
    %c0_i32_1 = arith.constant 0 : i32
    return %c0_i32, %c0_i32_0 : i32, i32
  }
  func.func @transform_2(%arg0: i32) -> (i32, i32) {
    %c0_i32 = arith.constant 0 : i32
    %c0_i32_0 = arith.constant 0 : i32
    %c0_i32_1 = arith.constant 0 : i32
    return %c0_i32, %c0_i32_0 : i32, i32
  }
  func.func @transform_3(%arg0: i32) -> (i32, i32) {
    %c0_i32 = arith.constant 0 : i32
    %c0_i32_0 = arith.constant 0 : i32
    %c0_i32_1 = arith.constant 0 : i32
    return %c0_i32, %c0_i32_0 : i32, i32
  }
  func.func @transform_4(%arg0: i32) -> (i32, i32) {
    %c0_i32 = arith.constant 0 : i32
    %c0_i32_0 = arith.constant 0 : i32
    %c0_i32_1 = arith.constant 0 : i32
    return %c0_i32, %c0_i32_0 : i32, i32
  }
  func.func @transform_5(%arg0: i32) -> (i32, i32) {
    %c0_i32 = arith.constant 0 : i32
    %c0_i32_0 = arith.constant 0 : i32
    %c0_i32_1 = arith.constant 0 : i32
    return %c0_i32, %c0_i32_0 : i32, i32
  }
  func.func @transform_6(%arg0: i32) -> (i32, i32) {
    %c0_i32 = arith.constant 0 : i32
    %c0_i32_0 = arith.constant 0 : i32
    %c0_i32_1 = arith.constant 0 : i32
    return %c0_i32, %c0_i32_0 : i32, i32
  }
  func.func @transform_7(%arg0: i32) -> (i32, i32) {
    %c0_i32 = arith.constant 0 : i32
    %c0_i32_0 = arith.constant 0 : i32
    %c0_i32_1 = arith.constant 0 : i32
    return %c0_i32, %c0_i32_0 : i32, i32
  }
  func.func @transform_8(%arg0: i32) -> (i32, i32) {
    %c0_i32 = arith.constant 0 : i32
    %c0_i32_0 = arith.constant 0 : i32
    %c0_i32_1 = arith.constant 0 : i32
    return %c0_i32, %c0_i32_0 : i32, i32
  }
  func.func @transform_9(%arg0: i32) -> (i32, i32) {
    %c0_i32 = arith.constant 0 : i32
    %c0_i32_0 = arith.constant 0 : i32
    return %arg0, %c0_i32 : i32, i32
  }
}

module attributes {stable_mosaic.version = 11 : i64} {
  func.func @_mlp_kernel(%arg0: i32, %arg1: memref<128x32xf32, #tpu.memory_space<vmem>>, %arg2: memref<32x1280xbf16, #tpu.memory_space<vmem>>, %arg3: memref<1x1280xf32, #tpu.memory_space<vmem>>, %arg4: memref<1280x128xbf16, #tpu.memory_space<vmem>>, %arg5: memref<1x128xf32, #tpu.memory_space<vmem>>, %arg6: memref<128x128xbf16, #tpu.memory_space<vmem>>, %arg7: memref<1x128xf32, #tpu.memory_space<vmem>>, %arg8: memref<128x128xbf16, #tpu.memory_space<vmem>>, %arg9: memref<1x128xf32, #tpu.memory_space<vmem>>, %arg10: memref<128x128xf32, #tpu.memory_space<vmem>>) attributes {dimension_semantics = [#tpu.dimension_semantics<parallel>], iteration_bounds = array<i64: 2>, scalar_prefetch = 0 : i64, scratch_operands = 0 : i64, tpu.core_type = #tpu.core_type<tc>, window_params = [{transform_indices = @transform_0, window_bounds = array<i64: 128, 32>}, {pipeline_mode = #tpu.pipeline_mode<synchronous>, transform_indices = @transform_1, window_bounds = array<i64: 32, 1280>}, {pipeline_mode = #tpu.pipeline_mode<synchronous>, transform_indices = @transform_2, window_bounds = array<i64: 1, 1280>}, {pipeline_mode = #tpu.pipeline_mode<synchronous>, transform_indices = @transform_3, window_bounds = array<i64: 1280, 128>}, {pipeline_mode = #tpu.pipeline_mode<synchronous>, transform_indices = @transform_4, window_bounds = array<i64: 1, 128>}, {pipeline_mode = #tpu.pipeline_mode<synchronous>, transform_indices = @transform_5, window_bounds = array<i64: 128, 128>}, {pipeline_mode = #tpu.pipeline_mode<synchronous>, transform_indices = @transform_6, window_bounds = array<i64: 1, 128>}, {pipeline_mode = #tpu.pipeline_mode<synchronous>, transform_indices = @transform_7, window_bounds = array<i64: 128, 128>}, {pipeline_mode = #tpu.pipeline_mode<synchronous>, transform_indices = @transform_8, window_bounds = array<i64: 1, 128>}, {transform_indices = @transform_9, window_bounds = array<i64: 128, 128>}]} {
    %c0 = arith.constant 0 : index
    %c0_0 = arith.constant 0 : index
    %0 = vector.load %arg1[%c0, %c0_0] : memref<128x32xf32, #tpu.memory_space<vmem>>, vector<128x32xf32>
    %1 = arith.truncf %0 : vector<128x32xf32> to vector<128x32xbf16>
    %c0_1 = arith.constant 0 : index
    %c0_2 = arith.constant 0 : index
    %2 = vector.load %arg2[%c0_1, %c0_2] : memref<32x1280xbf16, #tpu.memory_space<vmem>>, vector<32x1280xbf16>
    %cst = arith.constant dense<0.000000e+00> : vector<128x1280xf32>
    %3 = tpu.matmul %1, %2, %cst {dimension_numbers = #tpu.dot_dimension_numbers<[1], [0], [0], [1], [0, 0, 1, 1], [], []>} : vector<128x32xbf16>, vector<32x1280xbf16>, vector<128x1280xf32> -> vector<128x1280xf32>
    %c0_3 = arith.constant 0 : index
    %c0_4 = arith.constant 0 : index
    %4 = vector.load %arg3[%c0_3, %c0_4] : memref<1x1280xf32, #tpu.memory_space<vmem>>, vector<1x1280xf32>
    %5 = vector.broadcast %4 : vector<1x1280xf32> to vector<128x1280xf32>
    %6 = arith.addf %3, %5 : vector<128x1280xf32>
    %cst_5 = arith.constant 0.000000e+00 : f32
    %7 = vector.broadcast %cst_5 : f32 to vector<128x1280xf32>
    %8 = arith.maximumf %6, %7 : vector<128x1280xf32>
    %9 = arith.truncf %8 : vector<128x1280xf32> to vector<128x1280xbf16>
    %c0_6 = arith.constant 0 : index
    %c0_7 = arith.constant 0 : index
    %10 = vector.load %arg4[%c0_6, %c0_7] : memref<1280x128xbf16, #tpu.memory_space<vmem>>, vector<1280x128xbf16>
    %cst_8 = arith.constant dense<0.000000e+00> : vector<128x128xf32>
    %11 = tpu.matmul %9, %10, %cst_8 {dimension_numbers = #tpu.dot_dimension_numbers<[1], [0], [0], [1], [0, 0, 1, 1], [], []>} : vector<128x1280xbf16>, vector<1280x128xbf16>, vector<128x128xf32> -> vector<128x128xf32>
    %c0_9 = arith.constant 0 : index
    %c0_10 = arith.constant 0 : index
    %12 = vector.load %arg5[%c0_9, %c0_10] : memref<1x128xf32, #tpu.memory_space<vmem>>, vector<1x128xf32>
    %13 = vector.broadcast %12 : vector<1x128xf32> to vector<128x128xf32>
    %14 = arith.addf %11, %13 : vector<128x128xf32>
    %cst_11 = arith.constant 0.000000e+00 : f32
    %15 = vector.broadcast %cst_11 : f32 to vector<128x128xf32>
    %16 = arith.maximumf %14, %15 : vector<128x128xf32>
    %17 = arith.truncf %16 : vector<128x128xf32> to vector<128x128xbf16>
    %c0_12 = arith.constant 0 : index
    %c0_13 = arith.constant 0 : index
    %18 = vector.load %arg6[%c0_12, %c0_13] : memref<128x128xbf16, #tpu.memory_space<vmem>>, vector<128x128xbf16>
    %cst_14 = arith.constant dense<0.000000e+00> : vector<128x128xf32>
    %19 = tpu.matmul %17, %18, %cst_14 {dimension_numbers = #tpu.dot_dimension_numbers<[1], [0], [0], [1], [0, 0, 1, 1], [], []>} : vector<128x128xbf16>, vector<128x128xbf16>, vector<128x128xf32> -> vector<128x128xf32>
    %c0_15 = arith.constant 0 : index
    %c0_16 = arith.constant 0 : index
    %20 = vector.load %arg7[%c0_15, %c0_16] : memref<1x128xf32, #tpu.memory_space<vmem>>, vector<1x128xf32>
    %21 = vector.broadcast %20 : vector<1x128xf32> to vector<128x128xf32>
    %22 = arith.addf %19, %21 : vector<128x128xf32>
    %cst_17 = arith.constant 0.000000e+00 : f32
    %23 = vector.broadcast %cst_17 : f32 to vector<128x128xf32>
    %24 = arith.maximumf %22, %23 : vector<128x128xf32>
    %25 = arith.truncf %24 : vector<128x128xf32> to vector<128x128xbf16>
    %c0_18 = arith.constant 0 : index
    %c0_19 = arith.constant 0 : index
    %26 = vector.load %arg8[%c0_18, %c0_19] : memref<128x128xbf16, #tpu.memory_space<vmem>>, vector<128x128xbf16>
    %cst_20 = arith.constant dense<0.000000e+00> : vector<128x128xf32>
    %27 = tpu.matmul %25, %26, %cst_20 {dimension_numbers = #tpu.dot_dimension_numbers<[1], [0], [0], [1], [0, 0, 1, 1], [], []>} : vector<128x128xbf16>, vector<128x128xbf16>, vector<128x128xf32> -> vector<128x128xf32>
    %c0_21 = arith.constant 0 : index
    %c0_22 = arith.constant 0 : index
    %28 = vector.load %arg9[%c0_21, %c0_22] : memref<1x128xf32, #tpu.memory_space<vmem>>, vector<1x128xf32>
    %29 = vector.broadcast %28 : vector<1x128xf32> to vector<128x128xf32>
    %30 = arith.addf %27, %29 : vector<128x128xf32>
    %cst_23 = arith.constant 0.000000e+00 : f32
    %31 = vector.broadcast %cst_23 : f32 to vector<128x128xf32>
    %32 = arith.maximumf %30, %31 : vector<128x128xf32>
    %c0_24 = arith.constant 0 : index
    %c0_25 = arith.constant 0 : index
    %33 = vector.load %arg10[%c0_24, %c0_25] : memref<128x128xf32, #tpu.memory_space<vmem>>, vector<128x128xf32>
    tpu.vector_store %arg10[%c0_24, %c0_25], %32 {strides = array<i32>} : memref<128x128xf32, #tpu.memory_space<vmem>>, vector<128x128xf32>,
    return
  }
  func.func @transform_0(%arg0: i32) -> (i32, i32) {
    %c0_i32 = arith.constant 0 : i32
    %c0_i32_0 = arith.constant 0 : i32
    return %arg0, %c0_i32 : i32, i32
  }
  func.func @transform_1(%arg0: i32) -> (i32, i32) {
    %c0_i32 = arith.constant 0 : i32
    %c0_i32_0 = arith.constant 0 : i32
    %c0_i32_1 = arith.constant 0 : i32
    return %c0_i32, %c0_i32_0 : i32, i32
  }
  func.func @transform_2(%arg0: i32) -> (i32, i32) {
    %c0_i32 = arith.constant 0 : i32
    %c0_i32_0 = arith.constant 0 : i32
    %c0_i32_1 = arith.constant 0 : i32
    return %c0_i32, %c0_i32_0 : i32, i32
  }
  func.func @transform_3(%arg0: i32) -> (i32, i32) {
    %c0_i32 = arith.constant 0 : i32
    %c0_i32_0 = arith.constant 0 : i32
    %c0_i32_1 = arith.constant 0 : i32
    return %c0_i32, %c0_i32_0 : i32, i32
  }
  func.func @transform_4(%arg0: i32) -> (i32, i32) {
    %c0_i32 = arith.constant 0 : i32
    %c0_i32_0 = arith.constant 0 : i32
    %c0_i32_1 = arith.constant 0 : i32
    return %c0_i32, %c0_i32_0 : i32, i32
  }
  func.func @transform_5(%arg0: i32) -> (i32, i32) {
    %c0_i32 = arith.constant 0 : i32
    %c0_i32_0 = arith.constant 0 : i32
    %c0_i32_1 = arith.constant 0 : i32
    return %c0_i32, %c0_i32_0 : i32, i32
  }
  func.func @transform_6(%arg0: i32) -> (i32, i32) {
    %c0_i32 = arith.constant 0 : i32
    %c0_i32_0 = arith.constant 0 : i32
    %c0_i32_1 = arith.constant 0 : i32
    return %c0_i32, %c0_i32_0 : i32, i32
  }
  func.func @transform_7(%arg0: i32) -> (i32, i32) {
    %c0_i32 = arith.constant 0 : i32
    %c0_i32_0 = arith.constant 0 : i32
    %c0_i32_1 = arith.constant 0 : i32
    return %c0_i32, %c0_i32_0 : i32, i32
  }
  func.func @transform_8(%arg0: i32) -> (i32, i32) {
    %c0_i32 = arith.constant 0 : i32
    %c0_i32_0 = arith.constant 0 : i32
    %c0_i32_1 = arith.constant 0 : i32
    return %c0_i32, %c0_i32_0 : i32, i32
  }
  func.func @transform_9(%arg0: i32) -> (i32, i32) {
    %c0_i32 = arith.constant 0 : i32
    %c0_i32_0 = arith.constant 0 : i32
    return %arg0, %c0_i32 : i32, i32
  }
}

</mosaic_0001>

<bundles_post_ra>
// kernel: tpu_custom_call.1
= control target key start
LH: loop header
LB: loop body
LE: loop exit
PB: predicated region body
PF: predicated region fallthrough
CT: control target
= control target key end

     0   :  { %14 = vsyncpa [#allocation3], 0  ;;  %s4697_s0 = inlined_call_operand.vmem [shape: f32[256,32], index: 0, kind: input, shape index: {}]   ;;  %s4698_s1 = inlined_call_operand.vmem [shape: bf16[32,1280], index: 1, kind: input, shape index: {}]   ;;  %s4699_s2 = inlined_call_operand.vmem [shape: f32[1,1280], index: 2, kind: input, shape index: {}]   ;;  %s4700_s3 = inlined_call_operand.hbm [shape: bf16[1280,128], index: 3, kind: input, shape index: {}]   ;;  %s4701_s4 = inlined_call_operand.vmem [shape: f32[1,128], index: 4, kind: input, shape index: {}]   ;;  %s4702_s5 = inlined_call_operand.vmem [shape: bf16[128,128], index: 5, kind: input, shape index: {}]   ;;  %s4703_s6 = inlined_call_operand.vmem [shape: f32[1,128], index: 6, kind: input, shape index: {}]   ;;  %s4704_s7 = inlined_call_operand.vmem [shape: bf16[128,128], index: 7, kind: input, shape index: {}]   ;;  %s4705_s8 = inlined_call_operand.vmem [shape: f32[1,128], index: 8, kind: input, shape index: {}]   ;;  %s4706_s9 = inlined_call_operand.hbm [shape: f32[256,128], index: 9, kind: output, shape index: {}]  }
   0x1   :  { %15 = vsyncpa [#allocation4], 0 }
   0x2   :  { %17 = vsyncpa [#allocation4 + $0x1], 0  ;;  %s3938_s30 = smov 0   ;;  %s3940_s10 = smov 0  }
   0x3   :  { %s3942_s11 = smov 0   ;;  %s3944_s12 = smov 0  }
   0x4 LB: > { %s3959_s13 = sadd.s32 4294967295, %s3879_s12   ;;  %s3014_s14 = sadd.s32 4294967294, %s3879_s12   ;;  %s3879_s12 = sphi %s3944_s12, %s4722_s12   ;;  %s3875_s11 = sphi %s3942_s11, %s4721_s11   ;;  %s3871_s10 = sphi %s3940_s10, %s4720_s10   ;;  %s3867_s30 = sphi %s3938_s30, %s4719_s30  }
   0x5   : > { %s3963_s15 = sadd.s32 1, %s3879_s12   ;;  %s224_s16 = sadd.s32 1, %s3875_s11 }
   0x6   : > { %s221_s17 = ssub.s32 %s3879_s12, %s3963_s15  ;;  %p234_p0 = scmp.ne.s32.totalorder %s3875_s11, %s3871_s10 }
   0x7   : > { %p222_p1 = scmp.eq.s32.totalorder %s221_s17, 0  ;;  %p235_p2 = scmp.eq.s32.totalorder %s3959_s13, 1 }
   0x8   : > { %p240_p3 = scmp.ne.s32.totalorder %s3871_s10, %s3867_s30  ;;  %p241_p4 = scmp.eq.s32.totalorder %s3014_s14, 1 }
   0x9   : > { %s3974_s18 = scalar_select %p222_p1, %s3875_s11, %s224_s16  }
   0xa   : > { %p3976_p5 = por %p235_p2, %p234_p0  ;;  %p3980_p6 = por %p241_p4, %p240_p3 }
   0xb   : > { %p3015_p7 = scmp.ge.s32.totalorder %s3879_s12, 1  ;;  %p248_p8 = scmp.lt.s32.totalorder %s3879_s12, 3 }
   0xc   : > { %s4710_s19 = scalar_select %p3976_p5, 1, 0 }
   0xd   : > { %s4711_s20 = scalar_select %p3980_p6, 1, 0 }
   0xe   : > { %p4707_p9 = scmp.eq.s32.totalorder %s3959_s13, 0  ;;  %p3987_p10 = pnand %p3015_p7, %p248_p8 }
   0xf   : > { %s3881_s22 = smov [#allocation2]   ;;  %s3785_s27 = scalar_lea.hbm %s4700_s3, 10240 }
  0x10   : > { %s4712_s21 = scalar_select %p3987_p10, 1, 0 }
  0x11   : > { %s266_s23 = sshll.u32 %s3881_s22, 4  ;;  %p3610_p11 = pneg %p3987_p10  ;;  %s267_s23 = int_to_ptr.vmem [resolvable:$true] %s266_s23 }
  0x12   : > { %p3786_p13 = scmp.ne.s32.totalorder %s4700_s3, %s3785_s27  ;;  %p3792_p3 = scmp.lt.u32.totalorder %s3785_s27, %s4700_s3 }
  0x13   : > { %p3995_p12 = pnand %p4707_p9, %p3610_p11 }
  0x15   : > { %p3787_p0 = pneg %p3995_p12 }
  0x17   : > { %p3788_p1 = pnand %p3787_p0, %p3786_p13 }
  0x19   : > { %p3789_p2 = pneg %p3788_p1 }
  0x1b   : > { %p3794_p4 = pnand %p3792_p3, %p3789_p2 }
  0x1d   : > { %3797 = shalt.err (!%p3794_p4)
}
  0x1e   : > { %s3798_s17 = scalar_lea.vmem %s267_s23, 10240  ;;  %p3806_p9 = scmp.lt.s32.totalorder %s267_s23, %s267_s23 }
  0x1f   : > { %p3799_p7 = scmp.ne.s32.totalorder %s267_s23, %s3798_s17  ;;  %p3807_p6 = scmp.lt.s32.totalorder %s3798_s17, %s3798_s17 }
  0x21   : > { %p3801_p8 = pnand %p3799_p7, %p3787_p0  ;;  %p3808_p5 = por %p3807_p6, %p3806_p9 }
  0x23   : > { %p3802_p11 = pneg %p3801_p8 }
  0x25   : > { %p3809_p10 = pnand %p3808_p5, %p3802_p11 }
  0x27   : > { %3812 = shalt.err (!%p3809_p10)
}
  0x28   : > { %s3882_s22 = smov 64   ;;  %s3883_s25 = smov 4  }
  0x29   : > { %3613 = dma.hbm_to_vmem [thread:$0]  (!%p3995_p12), %s4700_s3, 10240, %s267_s23, [#allocation3], %s3882_s22, %s3882_s22, %s3883_s25  }
  0x2a   : > { %p4714_p13 = scmp.ne.s32.totalorder %s4712_s21, 0 }
  0x2b   : > { %p4715_p1 = scmp.eq.s32.totalorder (!%p4714_p13), %s3959_s13, 0 }
  0x2c   : > { %306 = sbr.rel (%p4714_p13) target bundleno = 1147 (0x47b), region = 56 }
  0x33   : > { %3858 = dma.done.wait (%p4715_p1), [#allocation3], 10240   ;;  %p4716_p0 = pmov %p4715_p1 }
  0x34   : > { %s3021_s27 = sshll.u32 %s3959_s13, 4  ;;  %v3884_v0 = vmov 0   ;;  %v3659_v1 = vld [vmem:[%s4698_s1 + $0x4] ss:$40 sps:$4 sm:$0xff]   ;;  %v3661_v2 = vld [vmem:[%s4698_s1] ss:$40 sps:$4 sm:$0xff]  }
  0x35   : > { %3860 = vsyncadd (%p4716_p0), [#allocation3], 4294957056  ;;  %605 = vmatprep.mubr.bf16.mxu0 %v3884_v0  ;;  %p343_p5 = scmp.lt.s32.totalorder %s3021_s27, 31  ;;  %718 = vmatprep.mubr.bf16.mxu1 %v3884_v0  ;;  %v3662_v3 = vld [vmem:[%s4698_s1 + $0xc] ss:$40 sps:$4 sm:$0xff]   ;;  %vm548_vm0 = vcmask 261120  }
  0x36   : > { %573 = vmatprep.subr.bf16.mxu0 %v3659_v1  ;;  %v3664_v4 = vld [vmem:[%s4698_s1 + $0x8] ss:$40 sps:$4 sm:$0xff]   ;;  %v3665_v5 = vld [vmem:[%s4698_s1 + $0x54] ss:$40 sps:$4 sm:$0xff]   ;;  %686 = vmatprep.subr.bf16.mxu1 %v3662_v3  ;;  %v3670_v8 = vld [vmem:[%s4698_s1 + $0x58] ss:$40 sps:$4 sm:$0xff]  }
  0x37   : > { %s4724_s27 = smov (!%p343_p5, %s3021_s27), 31  ;;  %574 = vmatpush1.bf16.msra.mxu0 %v3661_v2  ;;  %v3667_v6 = vld [vmem:[%s4698_s1 + $0x50] ss:$40 sps:$4 sm:$0xff]   ;;  %v3668_v7 = vld [vmem:[%s4698_s1 + $0x5c] ss:$40 sps:$4 sm:$0xff]   ;;  %687 = vmatpush1.bf16.msra.mxu1 %v3664_v4  ;;  %v3691_v46 = vld [vmem:[#allocation2 + $0x48] sm:$0xff]  }
  0x38   : > { %s3022_s24 = sshll.u32 %s4724_s27, 3  ;;  %575 = vmatprep.subr.bf16.mxu0 %v3665_v5  ;;  %688 = vmatprep.subr.bf16.mxu1 %v3668_v7  ;;  %v3671_v12 = vld [vmem:[%s4698_s1 + $0x10] ss:$40 sps:$4 sm:$0xff]   ;;  %v3673_v13 = vld [vmem:[%s4698_s1 + $0x14] ss:$40 sps:$4 sm:$0xff]   ;;  %v3689_v31 = vld [vmem:[#allocation2 + $0x40] sm:$0xff]  }
  0x39   : > { %s4039_s27 = scalar_lea.vmem %s4697_s0, %s3022_s24  ;;  %v3674_v16 = vld [vmem:[%s4698_s1 + $0x60] ss:$40 sps:$4 sm:$0xff]   ;;  %v3676_v17 = vld [vmem:[%s4698_s1 + $0x64] ss:$40 sps:$4 sm:$0xff]   ;;  %v3688_v44 = vld [vmem:[%s4698_s1 + $0x74] ss:$40 sps:$4 sm:$0xff]  }
  0x3a   : > { %v350_v9 = vld [vmem:[%s4039_s27] sm:$0xff]  ;;  %v351_v10 = vld [vmem:[%s4039_s27 + $0x8] sm:$0xff]  ;;  %v352_v14 = vld [vmem:[%s4039_s27 + $0x10] sm:$0xff]  ;;  %s339_s21 = sand.u32 1, %s3871_s10   ;;  %s3187_s24 = sshll.u32 %s3959_s13, 11 }
  0x3b   : > { %v4055_v11 = vpack.c.bf16 %v351_v10, %v350_v9  ;;  %576 = vmatpush1.bf16.msra.mxu0 %v3667_v6  ;;  %689 = vmatpush1.bf16.msra.mxu1 %v3670_v8  ;;  %v353_v15 = vld [vmem:[%s4039_s27 + $0x18] sm:$0xff]  ;;  %v3682_v21 = vld [vmem:[%s4698_s1 + $0x6c] ss:$40 sps:$4 sm:$0xff]   ;;  %v3680_v22 = vld [vmem:[%s4698_s1 + $0x68] ss:$40 sps:$4 sm:$0xff]   ;;  %s3020_s17 = sshll.u32 %s339_s21, 7  ;;  %s4647_s28 = scalar_lea.hbm %s4706_s9, %s3187_s24 }
  0x3c   : > { %799 = vmatprep.subr.bf16.mxu0 %v3673_v13  ;;  %v4077_v18 = vpack.c.bf16 %v353_v15, %v352_v14  ;;  %v3677_v19 = vld [vmem:[%s4698_s1 + $0x18] ss:$40 sps:$4 sm:$0xff]   ;;  %v3679_v20 = vld [vmem:[%s4698_s1 + $0x1c] ss:$40 sps:$4 sm:$0xff]   ;;  %v355_v25 = vld [vmem:[%s4039_s27 + $0x28] sm:$0xff]  ;;  %s4656_s13 = scalar_lea.sflag [#allocation4], %s339_s21 }
  0x3d   : > { %912 = vmatprep.subr.bf16.mxu1 %v3679_v20  ;;  %v3685_v23 = vld [vmem:[%s4698_s1 + $0x24] ss:$40 sps:$4 sm:$0xff]   ;;  %v356_v27 = vld [vmem:[%s4039_s27 + $0x30] sm:$0xff]  ;;  %v357_v28 = vld [vmem:[%s4039_s27 + $0x38] sm:$0xff]  ;;  %p4717_p9 = scmp.ne.s32.totalorder %s4710_s19, 0  ;;  %s3885_s29 = smov [#allocation5]  }
  0x3e   : > { %3043 = vmatmul.mubr.msk.bf16.vlgmr.msra.gmra.mrb[0].mxu0 %vm548_vm0, %v4055_v11  ;;  %3051 = vmatmul.mubr.msk.bf16.vlgmr.msra.gmra.mrb[0].mxu1 %vm548_vm0, %v4055_v11  ;;  %v354_v24 = vld [vmem:[%s4039_s27 + $0x20] sm:$0xff]  ;;  %v4112_v29 = vpack.c.bf16 %v357_v28, %v356_v27  ;;  %v359_v32 = vld [vmem:[%s4039_s27 + $0x48] sm:$0xff]  ;;  %v360_v34 = vld [vmem:[%s4039_s27 + $0x50] sm:$0xff]  ;;  %s3817_s14 = sshll.u32 %s3885_s29, 4  ;;  %s3818_s14 = int_to_ptr.vmem [resolvable:$false] %s3817_s14 }
  0x3f   : > { %800 = vmatpush1.bf16.msra.mxu0 %v3671_v12  ;;  %615 = vmatprep.mubr.bf16.mxu0 %v3884_v0  ;;  %v4102_v26 = vpack.c.bf16 %v355_v25, %v354_v24  ;;  %v358_v30 = vld [vmem:[%s4039_s27 + $0x40] sm:$0xff]  ;;  %v361_v35 = vld [vmem:[%s4039_s27 + $0x58] sm:$0xff]  ;;  %v363_v38 = vld [vmem:[%s4039_s27 + $0x68] sm:$0xff]  ;;  %s3819_s16 = scalar_lea.vmem %s3818_s14, 4096 }
  0x40   : > { %728 = vmatprep.mubr.bf16.mxu1 %v3884_v0  ;;  %801 = vmatprep.subr.bf16.mxu0 %v3676_v17  ;;  %v4122_v33 = vpack.c.bf16 %v359_v32, %v358_v30  ;;  %v4132_v36 = vpack.c.bf16 %v361_v35, %v360_v34  ;;  %v362_v37 = vld [vmem:[%s4039_s27 + $0x60] sm:$0xff]  ;;  %v364_v40 = vld [vmem:[%s4039_s27 + $0x70] sm:$0xff]  ;;  %v365_v41 = vld [vmem:[%s4039_s27 + $0x78] sm:$0xff]  ;;  %s4627_s27 = scalar_lea.vmem [#allocation5], %s3020_s17 }
  0x41   : > { %913 = vmatpush1.bf16.msra.mxu1 %v3677_v19  ;;  %v4142_v39 = vpack.c.bf16 %v363_v38, %v362_v37  ;;  %v4152_v42 = vpack.c.bf16 %v365_v41, %v364_v40  ;;  %v3683_v43 = vld [vmem:[%s4698_s1 + $0x20] ss:$40 sps:$4 sm:$0xff]   ;;  %v3686_v47 = vld [vmem:[%s4698_s1 + $0x70] ss:$40 sps:$4 sm:$0xff]   ;;  %s2940_s22 = sshll.u32 %s4627_s27, 4  ;;  %s4649_s22 = int_to_ptr.vmem [resolvable:$true] %s2940_s22 }
  0x42   : > { %914 = vmatprep.subr.bf16.mxu1 %v3682_v21  ;;  %v3690_v45 = vld [vmem:[#allocation2] sm:$0xff]   ;;  %v3692_v49 = vld [vmem:[#allocation2 + $0x8] sm:$0xff]   ;;  %v3693_v50 = vld [vmem:[#allocation2 + $0x50] sm:$0xff]   ;;  %s3813_s23 = scalar_lea.vmem %s4649_s22, 2048  ;;  %p3820_p2 = scmp.lt.s32.totalorder %s4649_s22, %s3818_s14 }
  0x43   : > { %802 = vmatpush1.bf16.msra.mxu0 %v3674_v16  ;;  %v3699_v48 = vld [vmem:[#allocation2 + $0xc0] sm:$0xff]   ;;  %v3694_v51 = vld [vmem:[#allocation2 + $0x10] sm:$0xff]   ;;  %v3695_v52 = vld [vmem:[#allocation2 + $0x58] sm:$0xff]   ;;  %v398_v16 = vlaneseq  ;;  %p3814_p6 = scmp.ne.s32.totalorder %s4649_s22, %s3813_s23  ;;  %p3821_p3 = scmp.lt.s32.totalorder %s3819_s16, %s3813_s23 }
  0x44   : > { %1025 = vmatprep.subr.bf16.mxu0 %v3685_v23  ;;  %v3696_v53 = vld [vmem:[#allocation2 + $0x18] sm:$0xff]   ;;  %v3697_v54 = vld [vmem:[#allocation2 + $0x60] sm:$0xff]   ;;  %v3703_v56 = vld [vmem:[#allocation2 + $0x68] sm:$0xff]  }
  0x45   : > { %915 = vmatpush1.bf16.msra.mxu1 %v3680_v22  ;;  %v3698_v55 = vld [vmem:[#allocation2 + $0x20] sm:$0xff]   ;;  %v3704_v57 = vld [vmem:[#allocation2 + $0x28] sm:$0xff]   ;;  %v3709_v58 = vld [vmem:[#allocation2 + $0x70] sm:$0xff]   ;;  %v4239_v17 = vshrl.u32 %v398_v16, 7  ;;  %p3815_p10 = pnand %p3814_p6, %p4717_p9  ;;  %p3822_p4 = por %p3821_p3, %p3820_p2 }
  0x46   : > { %3044 = vmatmul.mubr.msk.bf16.gmra.mrb[4].mxu0 %vm548_vm0, %v4077_v18  ;;  %3052 = vmatmul.mubr.msk.bf16.gmra.mrb[4].mxu1 %vm548_vm0, %v4077_v18  ;;  %v3710_v59 = vld [vmem:[#allocation2 + $0x30] sm:$0xff]   ;;  %v3715_v60 = vld [vmem:[#allocation2 + $0x78] sm:$0xff]   ;;  %v3721_v62 = vld [vmem:[#allocation2 + $0x140] sm:$0xff]  }
  0x47   : > { %625 = vmatprep.mubr.bf16.mxu0 %v3884_v0  ;;  %738 = vmatprep.mubr.bf16.mxu1 %v3884_v0  ;;  %v3716_v61 = vld [vmem:[#allocation2 + $0x38] sm:$0xff]   ;;  %v3700_v63 = vld [vmem:[#allocation2 + $0x80] sm:$0xff]   ;;  %v3701_v1 = vld [vmem:[#allocation2 + $0xc8] sm:$0xff]   ;;  %v404_v20 = vsub.s32 1, %v4239_v17  ;;  %v408_v21 = vsub.s32 2, %v4239_v17  ;;  %v412_v22 = vsub.s32 3, %v4239_v17  ;;  %p3816_p12 = pneg %p3815_p10 }
  0x48   : > { %3188 = vmatprep.subr.bf16.mxu1 %v3689_v31  ;;  %v3702_v2 = vld [vmem:[#allocation2 + $0x88] sm:$0xff]   ;;  %v3705_v3 = vld [vmem:[#allocation2 + $0xd0] sm:$0xff]   ;;  %v3707_v5 = vld [vmem:[#allocation2 + $0xd8] sm:$0xff]  }
  0x49   : > { %v3706_v4 = vld [vmem:[#allocation2 + $0x90] sm:$0xff]   ;;  %v3708_v6 = vld [vmem:[#allocation2 + $0x98] sm:$0xff]   ;;  %v3711_v7 = vld [vmem:[#allocation2 + $0xe0] sm:$0xff]   ;;  %p3823_p7 = pnand %p3822_p4, %p3816_p12 }
  0x4a   : > { %v3712_v8 = vld [vmem:[#allocation2 + $0xa0] sm:$0xff]   ;;  %v3713_v9 = vld [vmem:[#allocation2 + $0xe8] sm:$0xff]   ;;  %v3718_v12 = vld [vmem:[#allocation2 + $0xb0] sm:$0xff]  }
  0x4b   : > { %v3714_v10 = vld [vmem:[#allocation2 + $0xa8] sm:$0xff]   ;;  %v3719_v13 = vld [vmem:[#allocation2 + $0xf8] sm:$0xff]   ;;  %v3731_v15 = vld [vmem:[#allocation2 + $0x1c0] sm:$0xff]  }
  0x4c   : > { %v3720_v14 = vld [vmem:[#allocation2 + $0xb8] sm:$0xff]   ;;  %v4245_v19 = vld [vmem:[%s4699_s2] sm:$0xff] }
  0x4d   : > { %v4258_v23 = vrot.slane %v4245_v19, %v404_v20  ;;  %v4261_v24 = vrot.slane %v4245_v19, %v408_v21 }
  0x4e   : > { %3045 = vmatmul.mubr.msk.bf16.gmra.mrb[8].mxu0 %vm548_vm0, %v4102_v26  ;;  %3053 = vmatmul.mubr.msk.bf16.gmra.mrb[8].mxu1 %vm548_vm0, %v4102_v26 }
  0x4f   : > { %635 = vmatprep.mubr.bf16.mxu0 %v3884_v0  ;;  %748 = vmatprep.mubr.bf16.mxu1 %v3884_v0 }
  0x56   : > { %3046 = vmatmul.mubr.msk.bf16.gmra.mrb[12].mxu0 %vm548_vm0, %v4112_v29  ;;  %3054 = vmatmul.mubr.msk.bf16.gmra.mrb[12].mxu1 %vm548_vm0, %v4112_v29 }
  0x57   : > { %645 = vmatprep.mubr.bf16.mxu0 %v3884_v0  ;;  %758 = vmatprep.mubr.bf16.mxu1 %v3884_v0 }
  0x5e   : > { %3047 = vmatmul.mubr.msk.bf16.gmra.mrb[16].mxu0 %vm548_vm0, %v4122_v33  ;;  %3055 = vmatmul.mubr.msk.bf16.gmra.mrb[16].mxu1 %vm548_vm0, %v4122_v33 }
  0x5f   : > { %655 = vmatprep.mubr.bf16.mxu0 %v3884_v0  ;;  %768 = vmatprep.mubr.bf16.mxu1 %v3884_v0 }
  0x66   : > { %3048 = vmatmul.mubr.msk.bf16.gmra.mrb[20].mxu0 %vm548_vm0, %v4132_v36  ;;  %3056 = vmatmul.mubr.msk.bf16.gmra.mrb[20].mxu1 %vm548_vm0, %v4132_v36 }
  0x67   : > { %665 = vmatprep.mubr.bf16.mxu0 %v3884_v0  ;;  %778 = vmatprep.mubr.bf16.mxu1 %v3884_v0 }
  0x6e   : > { %3049 = vmatmul.mubr.msk.bf16.gmra.mrb[24].mxu0 %vm548_vm0, %v4142_v39  ;;  %3057 = vmatmul.mubr.msk.bf16.gmra.mrb[24].mxu1 %vm548_vm0, %v4142_v39 }
  0x6f   : > { %675 = vmatprep.mubr.bf16.mxu0 %v3884_v0  ;;  %788 = vmatprep.mubr.bf16.mxu1 %v3884_v0 }
  0x76   : > { %3050 = vmatmul.mubr.msk.bf16.gmra.mrb[28].mxu0 %vm548_vm0, %v4152_v42  ;;  %3058 = vmatmul.mubr.msk.bf16.gmra.mrb[28].mxu1 %vm548_vm0, %v4152_v42 }
  0x77   : > { %831 = vmatprep.mubr.bf16.mxu0 %v3884_v0  ;;  %944 = vmatprep.mubr.bf16.mxu1 %v3884_v0 }
  0x7e   : > { %3059 = vmatmul.mubr.msk.bf16.vlgmr.msra.gmra.mrb[32].mxu0 %vm548_vm0, %v4055_v11  ;;  %3067 = vmatmul.mubr.msk.bf16.vlgmr.msra.gmra.mrb[32].mxu1 %vm548_vm0, %v4055_v11 }
  0x7f   : > { %1026 = vmatpush1.bf16.msra.mxu0 %v3683_v43  ;;  %841 = vmatprep.mubr.bf16.mxu0 %v3884_v0 }
  0x80   : > { %1027 = vmatprep.subr.bf16.mxu0 %v3688_v44  ;;  %954 = vmatprep.mubr.bf16.mxu1 %v3884_v0 }
  0x81   : > { %3189 = vmatpush3.bf16.msra.mxu1 %v3690_v45 }
  0x82   : > { %3190 = vmatprep.subr.bf16.mxu1 %v3691_v46 }
  0x83   : > { %1028 = vmatpush1.bf16.msra.mxu0 %v3686_v47 }
  0x84   : > { %3252 = vmatprep.subr.bf16.mxu0 %v3699_v48 }
  0x85   : > { %3191 = vmatpush3.bf16.msra.mxu1 %v3692_v49 }
  0x86   : > { %3060 = vmatmul.mubr.msk.bf16.gmra.mrb[36].mxu0 %vm548_vm0, %v4077_v18  ;;  %3192 = vmatprep.subr.bf16.mxu1 %v3693_v50 }
  0x87   : > { %851 = vmatprep.mubr.bf16.mxu0 %v3884_v0  ;;  %3068 = vmatmul.mubr.msk.bf16.gmra.mrb[36].mxu1 %vm548_vm0, %v4077_v18 }
  0x88   : > { %964 = vmatprep.mubr.bf16.mxu1 %v3884_v0 }
  0x89   : > { %3193 = vmatpush3.bf16.msra.mxu1 %v3694_v51 }
  0x8a   : > { %3194 = vmatprep.subr.bf16.mxu1 %v3695_v52 }
  0x8d   : > { %3195 = vmatpush3.bf16.msra.mxu1 %v3696_v53  ;;  %v3722_v53 = vld [vmem:[#allocation2 + $0x100] sm:$0xff]  }
  0x8e   : > { %3061 = vmatmul.mubr.msk.bf16.gmra.mrb[40].mxu0 %vm548_vm0, %v4102_v26  ;;  %3196 = vmatprep.subr.bf16.mxu1 %v3697_v54 }
  0x8f   : > { %861 = vmatprep.mubr.bf16.mxu0 %v3884_v0  ;;  %3069 = vmatmul.mubr.msk.bf16.gmra.mrb[40].mxu1 %vm548_vm0, %v4102_v26 }
  0x90   : > { %974 = vmatprep.mubr.bf16.mxu1 %v3884_v0 }
  0x91   : > { %3197 = vmatpush3.bf16.msra.mxu1 %v3698_v55 }
  0x92   : > { %3198 = vmatprep.subr.bf16.mxu1 %v3703_v56 }
  0x95   : > { %3199 = vmatpush3.bf16.msra.mxu1 %v3704_v57  ;;  %v3723_v57 = vld [vmem:[#allocation2 + $0x148] sm:$0xff]  }
  0x96   : > { %3062 = vmatmul.mubr.msk.bf16.gmra.mrb[44].mxu0 %vm548_vm0, %v4112_v29  ;;  %3200 = vmatprep.subr.bf16.mxu1 %v3709_v58 }
  0x97   : > { %871 = vmatprep.mubr.bf16.mxu0 %v3884_v0  ;;  %3070 = vmatmul.mubr.msk.bf16.gmra.mrb[44].mxu1 %vm548_vm0, %v4112_v29 }
  0x98   : > { %984 = vmatprep.mubr.bf16.mxu1 %v3884_v0 }
  0x99   : > { %3201 = vmatpush3.bf16.msra.mxu1 %v3710_v59 }
  0x9a   : > { %3202 = vmatprep.subr.bf16.mxu1 %v3715_v60 }
  0x9d   : > { %3203 = vmatpush3.bf16.msra.mxu1 %v3716_v61 }
  0x9e   : > { %3063 = vmatmul.mubr.msk.bf16.gmra.mrb[48].mxu0 %vm548_vm0, %v4122_v33  ;;  %3316 = vmatprep.subr.bf16.mxu1 %v3721_v62  ;;  %v3732_v62 = vld [vmem:[#allocation2 + $0x180] sm:$0xff]  }
  0x9f   : > { %881 = vmatprep.mubr.bf16.mxu0 %v3884_v0  ;;  %3071 = vmatmul.mubr.msk.bf16.gmra.mrb[48].mxu1 %vm548_vm0, %v4122_v33 }
  0xa0   : > { %994 = vmatprep.mubr.bf16.mxu1 %v3884_v0 }
  0xa6   : > { %3064 = vmatmul.mubr.msk.bf16.gmra.mrb[52].mxu0 %vm548_vm0, %v4132_v36 }
  0xa7   : > { %891 = vmatprep.mubr.bf16.mxu0 %v3884_v0  ;;  %3072 = vmatmul.mubr.msk.bf16.gmra.mrb[52].mxu1 %vm548_vm0, %v4132_v36 }
  0xa8   : > { %1004 = vmatprep.mubr.bf16.mxu1 %v3884_v0 }
  0xae   : > { %3065 = vmatmul.mubr.msk.bf16.gmra.mrb[56].mxu0 %vm548_vm0, %v4142_v39 }
  0xaf   : > { %901 = vmatprep.mubr.bf16.mxu0 %v3884_v0  ;;  %3073 = vmatmul.mubr.msk.bf16.gmra.mrb[56].mxu1 %vm548_vm0, %v4142_v39 }
  0xb0   : > { %1014 = vmatprep.mubr.bf16.mxu1 %v3884_v0 }
  0xb6   : > { %3066 = vmatmul.mubr.msk.bf16.gmra.mrb[60].mxu0 %vm548_vm0, %v4152_v42 }
  0xb7   : > { %1057 = vmatprep.mubr.bf16.mxu0 %v3884_v0  ;;  %3074 = vmatmul.mubr.msk.bf16.gmra.mrb[60].mxu1 %vm548_vm0, %v4152_v42 }
  0xbe   : > { %3075 = vmatmul.mubr.msk.bf16.vlgmr.msra.gmra.mrb[64].mxu0 %vm548_vm0, %v4055_v11  ;;  %v3717_v11 = vld [vmem:[#allocation2 + $0xf0] sm:$0xff]  }
  0xbf   : > { %1067 = vmatprep.mubr.bf16.mxu0 %v3884_v0  ;;  %3253 = vmatpush3.bf16.msra.mxu0 %v3700_v63 }
  0xc0   : > { %3254 = vmatprep.subr.bf16.mxu0 %v3701_v1 }
  0xc3   : > { %3255 = vmatpush3.bf16.msra.mxu0 %v3702_v2 }
  0xc4   : > { %3256 = vmatprep.subr.bf16.mxu0 %v3705_v3 }
  0xc6   : > { %3076 = vmatmul.mubr.msk.bf16.gmra.mrb[68].mxu0 %vm548_vm0, %v4077_v18  ;;  %v400_v18 = vsub.s32 0, %v4239_v17 }
  0xc7   : > { %1077 = vmatprep.mubr.bf16.mxu0 %v3884_v0  ;;  %3257 = vmatpush3.bf16.msra.mxu0 %v3706_v4  ;;  %v3733_v4 = vld [vmem:[#allocation2 + $0x1c8] sm:$0xff]  }
  0xc8   : > { %3258 = vmatprep.subr.bf16.mxu0 %v3707_v5 }
  0xcb   : > { %3259 = vmatpush3.bf16.msra.mxu0 %v3708_v6 }
  0xcc   : > { %3260 = vmatprep.subr.bf16.mxu0 %v3711_v7 }
  0xce   : > { %3077 = vmatmul.mubr.msk.bf16.gmra.mrb[72].mxu0 %vm548_vm0, %v4102_v26  ;;  %v4264_v26 = vrot.slane %v4245_v19, %v412_v22 }
  0xcf   : > { %1087 = vmatprep.mubr.bf16.mxu0 %v3884_v0  ;;  %3261 = vmatpush3.bf16.msra.mxu0 %v3712_v8  ;;  %v3724_v8 = vld [vmem:[#allocation2 + $0x108] sm:$0xff]  }
  0xd0   : > { %3262 = vmatprep.subr.bf16.mxu0 %v3713_v9 }
  0xd3   : > { %3263 = vmatpush3.bf16.msra.mxu0 %v3714_v10 }
  0xd4   : > { %3264 = vmatprep.subr.bf16.mxu0 %v3717_v11 }
  0xd6   : > { %3078 = vmatmul.mubr.msk.bf16.gmra.mrb[76].mxu0 %vm548_vm0, %v4112_v29 }
  0xd7   : > { %1097 = vmatprep.mubr.bf16.mxu0 %v3884_v0  ;;  %3265 = vmatpush3.bf16.msra.mxu0 %v3718_v12 }
  0xd8   : > { %3266 = vmatprep.subr.bf16.mxu0 %v3719_v13 }
  0xdb   : > { %3267 = vmatpush3.bf16.msra.mxu0 %v3720_v14  ;;  %v3725_v14 = vld [vmem:[#allocation2 + $0x150] sm:$0xff]  }
  0xdc   : > { %3380 = vmatprep.subr.bf16.mxu0 %v3731_v15 }
  0xde   : > { %3079 = vmatmul.mubr.msk.bf16.gmra.mrb[80].mxu0 %vm548_vm0, %v4122_v33 }
  0xdf   : > { %1107 = vmatprep.mubr.bf16.mxu0 %v3884_v0 }
  0xe6   : > { %3080 = vmatmul.mubr.msk.bf16.gmra.mrb[84].mxu0 %vm548_vm0, %v4132_v36 }
  0xe7   : > { %1117 = vmatprep.mubr.bf16.mxu0 %v3884_v0 }
  0xee   : > { %3081 = vmatmul.mubr.msk.bf16.gmra.mrb[88].mxu0 %vm548_vm0, %v4142_v39 }
  0xef   : > { %1127 = vmatprep.mubr.bf16.mxu0 %v3884_v0  ;;  %v4253_v0 = vrot.slane %v4245_v19, %v400_v18 }
  0xf6   : > { %3082 = vmatmul.mubr.msk.bf16.gmra.mrb[92].mxu0 %vm548_vm0, %v4152_v42 }
 0x111   : > { %v607_v25 = vpop.f32.mrb[0].mxu0  ;;  %v720_v31 = vpop.f32.mrb[0].mxu1 }
 0x112   : > { %v608_v27 = vadd.f32 %v607_v25, %v4253_v0  ;;  %v609_v28 = vpop.f32.mrb[1].mxu0  ;;  %v721_v33 = vadd.f32 %v720_v31, %v4261_v24  ;;  %v722_v35 = vpop.f32.mrb[1].mxu1  ;;  %v3734_v25 = vld [vmem:[#allocation2 + $0x188] sm:$0xff]  }
 0x113   : > { %v610_v29 = vadd.f32 %v609_v28, %v4258_v23  ;;  %v611_v30 = vpop.f32.mrb[2].mxu0  ;;  %v723_v37 = vadd.f32 %v722_v35, %v4264_v26  ;;  %v724_v38 = vpop.f32.mrb[2].mxu1 }
 0x114   : > { %v612_v32 = vadd.f32 %v611_v30, %v4253_v0  ;;  %v613_v34 = vpop.f32.mrb[3].mxu0  ;;  %v1138_v39 = vmax.f32 %v608_v27, 0.0  ;;  %v1140_v41 = vmax.f32 %v721_v33, 0.0  ;;  %v725_v42 = vadd.f32 %v724_v38, %v4261_v24  ;;  %v726_v43 = vpop.f32.mrb[3].mxu1  ;;  %v3726_v33 = vld [vmem:[#allocation2 + $0x110] sm:$0xff]  }
 0x115   : > { %v614_v36 = vadd.f32 %v613_v34, %v4258_v23  ;;  %v1139_v44 = vmax.f32 %v610_v29, 0.0  ;;  %v1141_v46 = vmax.f32 %v723_v37, 0.0  ;;  %v727_v47 = vadd.f32 %v726_v43, %v4264_v26  ;;  %v3737_v29 = vld [vmem:[#allocation2 + $0x1d0] sm:$0xff]   ;;  %v3727_v37 = vld [vmem:[#allocation2 + $0x158] sm:$0xff]  }
 0x116   : > { %v1148_v40 = vmax.f32 %v612_v32, 0.0  ;;  %v1150_v49 = vmax.f32 %v725_v42, 0.0  ;;  %v3738_v42 = vld [vmem:[#allocation2 + $0x190] sm:$0xff]  }
 0x117   : > { %v1149_v45 = vmax.f32 %v614_v36, 0.0  ;;  %v1151_v51 = vmax.f32 %v727_v47, 0.0  ;;  %v3739_v47 = vld [vmem:[#allocation2 + $0x1d8] sm:$0xff]  }
 0x118   : > { %v1298_v48 = vpack.c.bf16 %v1148_v40, %v1138_v39  ;;  %v1300_v54 = vpack.c.bf16 %v1150_v49, %v1140_v41 }
 0x119   : > { %v1299_v50 = vpack.c.bf16 %v1149_v45, %v1139_v44  ;;  %v617_v52 = vpop.f32.mrb[4].mxu0  ;;  %v1301_v58 = vpack.c.bf16 %v1151_v51, %v1141_v46  ;;  %v730_v61 = vpop.f32.mrb[4].mxu1  ;;  %v3728_v51 = vld [vmem:[#allocation2 + $0x118] sm:$0xff]  }
 0x11a   : > { %v618_v55 = vadd.f32 %v617_v52, %v4253_v0  ;;  %v619_v56 = vpop.f32.mrb[5].mxu0  ;;  %v731_v1 = vadd.f32 %v730_v61, %v4261_v24  ;;  %v732_v3 = vpop.f32.mrb[5].mxu1 }
 0x11b   : > { %v620_v59 = vadd.f32 %v619_v56, %v4258_v23  ;;  %v621_v60 = vpop.f32.mrb[6].mxu0  ;;  %2057 = vmatprep.mubr.bf16.mxu1 %v1299_v50  ;;  %v733_v6 = vadd.f32 %v732_v3, %v4264_v26  ;;  %v734_v7 = vpop.f32.mrb[6].mxu1  ;;  %2154 = vmatprep.mubr.bf16.mxu0 %v1301_v58 }
 0x11c   : > { %v622_v63 = vadd.f32 %v621_v60, %v4253_v0  ;;  %v623_v2 = vpop.f32.mrb[7].mxu0  ;;  %2058 = vmatmul.mubr.bf16.vlgmr.msra.gmra.mrb[64].mxu1 %v1298_v48  ;;  %v1158_v9 = vmax.f32 %v618_v55, 0.0  ;;  %v1160_v11 = vmax.f32 %v731_v1, 0.0  ;;  %v735_v12 = vadd.f32 %v734_v7, %v4261_v24  ;;  %v736_v13 = vpop.f32.mrb[7].mxu1  ;;  %2155 = vmatmul.mubr.bf16.vlgmr.msra.gmra.mrb[96].mxu0 %v1300_v54 }
 0x11d   : > { %v624_v5 = vadd.f32 %v623_v2, %v4258_v23  ;;  %3317 = vmatpush3.bf16.msra.mxu1 %v3722_v53  ;;  %v1159_v15 = vmax.f32 %v620_v59, 0.0  ;;  %v1161_v21 = vmax.f32 %v733_v6, 0.0  ;;  %v737_v22 = vadd.f32 %v736_v13, %v4264_v26  ;;  %3381 = vmatpush3.bf16.msra.mxu0 %v3732_v62  ;;  %v3740_v62 = vld [vmem:[#allocation2 + $0x198] sm:$0xff]   ;;  %v3743_v2 = vld [vmem:[#allocation2 + $0x1e0] sm:$0xff]  }
 0x11e   : > { %v1168_v10 = vmax.f32 %v622_v63, 0.0  ;;  %3318 = vmatprep.subr.bf16.mxu1 %v3723_v57  ;;  %v1170_v28 = vmax.f32 %v735_v12, 0.0  ;;  %3382 = vmatprep.subr.bf16.mxu0 %v3733_v4  ;;  %v3729_v57 = vld [vmem:[#allocation2 + $0x160] sm:$0xff]  }
 0x11f   : > { %v1169_v16 = vmax.f32 %v624_v5, 0.0  ;;  %v1171_v31 = vmax.f32 %v737_v22, 0.0  ;;  %v3730_v6 = vld [vmem:[#allocation2 + $0x120] sm:$0xff]  }
 0x120   : > { %v1308_v27 = vpack.c.bf16 %v1168_v10, %v1158_v9  ;;  %v1310_v34 = vpack.c.bf16 %v1170_v28, %v1160_v11  ;;  %v3735_v10 = vld [vmem:[#allocation2 + $0x168] sm:$0xff]  }
 0x121   : > { %v1309_v30 = vpack.c.bf16 %v1169_v16, %v1159_v15  ;;  %v627_v32 = vpop.f32.mrb[8].mxu0  ;;  %3319 = vmatpush3.bf16.msra.mxu1 %v3724_v8  ;;  %v1311_v38 = vpack.c.bf16 %v1171_v31, %v1161_v21  ;;  %v740_v41 = vpop.f32.mrb[8].mxu1  ;;  %3383 = vmatpush3.bf16.msra.mxu0 %v3734_v25  ;;  %v3744_v15 = vld [vmem:[#allocation2 + $0x1a0] sm:$0xff]   ;;  %v3736_v31 = vld [vmem:[#allocation2 + $0x128] sm:$0xff]  }
 0x122   : > { %v628_v35 = vadd.f32 %v627_v32, %v4253_v0  ;;  %v629_v36 = vpop.f32.mrb[9].mxu0  ;;  %3320 = vmatprep.subr.bf16.mxu1 %v3725_v14  ;;  %v741_v44 = vadd.f32 %v740_v41, %v4261_v24  ;;  %v742_v46 = vpop.f32.mrb[9].mxu1  ;;  %3384 = vmatprep.subr.bf16.mxu0 %v3737_v29 }
 0x123   : > { %v630_v39 = vadd.f32 %v629_v36, %v4258_v23  ;;  %v631_v40 = vpop.f32.mrb[10].mxu0  ;;  %2065 = vmatprep.mubr.bf16.mxu1 %v1309_v30  ;;  %v743_v49 = vadd.f32 %v742_v46, %v4264_v26  ;;  %v744_v50 = vpop.f32.mrb[10].mxu1  ;;  %2162 = vmatprep.mubr.bf16.mxu0 %v1311_v38 }
 0x124   : > { %v632_v43 = vadd.f32 %v631_v40, %v4253_v0  ;;  %v633_v45 = vpop.f32.mrb[11].mxu0  ;;  %2066 = vmatmul.mubr.bf16.gmra.mrb[68].mxu1 %v1308_v27  ;;  %v1178_v52 = vmax.f32 %v628_v35, 0.0  ;;  %v1180_v54 = vmax.f32 %v741_v44, 0.0  ;;  %v745_v55 = vadd.f32 %v744_v50, %v4261_v24  ;;  %v746_v56 = vpop.f32.mrb[11].mxu1  ;;  %2163 = vmatmul.mubr.bf16.gmra.mrb[100].mxu0 %v1310_v34  ;;  %v3745_v27 = vld [vmem:[#allocation2 + $0x1e8] sm:$0xff]  }
 0x125   : > { %v634_v48 = vadd.f32 %v633_v45, %v4258_v23  ;;  %3321 = vmatpush3.bf16.msra.mxu1 %v3726_v33  ;;  %v1179_v58 = vmax.f32 %v630_v39, 0.0  ;;  %v1181_v60 = vmax.f32 %v743_v49, 0.0  ;;  %v747_v61 = vadd.f32 %v746_v56, %v4264_v26  ;;  %3385 = vmatpush3.bf16.msra.mxu0 %v3738_v42  ;;  %v3746_v42 = vld [vmem:[#allocation2 + $0x1a8] sm:$0xff]   ;;  %v3749_v45 = vld [vmem:[#allocation2 + $0x1f0] sm:$0xff]  }
 0x126   : > { %v1188_v53 = vmax.f32 %v632_v43, 0.0  ;;  %3322 = vmatprep.subr.bf16.mxu1 %v3727_v37  ;;  %v1190_v1 = vmax.f32 %v745_v55, 0.0  ;;  %3386 = vmatprep.subr.bf16.mxu0 %v3739_v47  ;;  %v3741_v37 = vld [vmem:[#allocation2 + $0x170] sm:$0xff]  }
 0x127   : > { %v1189_v59 = vmax.f32 %v634_v48, 0.0  ;;  %v1191_v4 = vmax.f32 %v747_v61, 0.0  ;;  %v3742_v49 = vld [vmem:[#allocation2 + $0x130] sm:$0xff]  }
 0x128   : > { %v1318_v63 = vpack.c.bf16 %v1188_v53, %v1178_v52  ;;  %v1320_v7 = vpack.c.bf16 %v1190_v1, %v1180_v54  ;;  %v3747_v53 = vld [vmem:[#allocation2 + $0x178] sm:$0xff]  }
 0x129   : > { %v1319_v3 = vpack.c.bf16 %v1189_v59, %v1179_v58  ;;  %v637_v5 = vpop.f32.mrb[12].mxu0  ;;  %3323 = vmatpush3.bf16.msra.mxu1 %v3728_v51  ;;  %v1321_v11 = vpack.c.bf16 %v1191_v4, %v1181_v60  ;;  %v750_v14 = vpop.f32.mrb[12].mxu1  ;;  %3387 = vmatpush3.bf16.msra.mxu0 %v3740_v62  ;;  %v3750_v58 = vld [vmem:[#allocation2 + $0x1b0] sm:$0xff]   ;;  %v3748_v4 = vld [vmem:[#allocation2 + $0x138] sm:$0xff]  }
 0x12a   : > { %v638_v8 = vadd.f32 %v637_v5, %v4253_v0  ;;  %v639_v9 = vpop.f32.mrb[13].mxu0  ;;  %3324 = vmatprep.subr.bf16.mxu1 %v3729_v57  ;;  %v751_v21 = vadd.f32 %v750_v14, %v4261_v24  ;;  %v752_v25 = vpop.f32.mrb[13].mxu1  ;;  %3388 = vmatprep.subr.bf16.mxu0 %v3743_v2 }
 0x12b   : > { %v640_v12 = vadd.f32 %v639_v9, %v4258_v23  ;;  %v641_v13 = vpop.f32.mrb[14].mxu0  ;;  %2073 = vmatprep.mubr.bf16.mxu1 %v1319_v3  ;;  %v753_v29 = vadd.f32 %v752_v25, %v4264_v26  ;;  %v754_v30 = vpop.f32.mrb[14].mxu1  ;;  %2170 = vmatprep.mubr.bf16.mxu0 %v1321_v11 }
 0x12c   : > { %v642_v16 = vadd.f32 %v641_v13, %v4253_v0  ;;  %v643_v22 = vpop.f32.mrb[15].mxu0  ;;  %2074 = vmatmul.mubr.bf16.gmra.mrb[72].mxu1 %v1318_v63  ;;  %v1198_v32 = vmax.f32 %v638_v8, 0.0  ;;  %v1200_v34 = vmax.f32 %v751_v21, 0.0  ;;  %v755_v35 = vadd.f32 %v754_v30, %v4261_v24  ;;  %v756_v36 = vpop.f32.mrb[15].mxu1  ;;  %2171 = vmatmul.mubr.bf16.gmra.mrb[104].mxu0 %v1320_v7  ;;  %v3751_v63 = vld [vmem:[#allocation2 + $0x1f8] sm:$0xff]  }
 0x12d   : > { %v644_v28 = vadd.f32 %v643_v22, %v4258_v23  ;;  %3325 = vmatpush3.bf16.msra.mxu1 %v3730_v6  ;;  %v1199_v38 = vmax.f32 %v640_v12, 0.0  ;;  %v1201_v40 = vmax.f32 %v753_v29, 0.0  ;;  %v757_v41 = vadd.f32 %v756_v36, %v4264_v26  ;;  %3389 = vmatpush3.bf16.msra.mxu0 %v3744_v15  ;;  %v3752_v15 = vld [vmem:[#allocation2 + $0x1b8] sm:$0xff]  }
 0x12e   : > { %v1208_v33 = vmax.f32 %v642_v16, 0.0  ;;  %3326 = vmatprep.subr.bf16.mxu1 %v3735_v10  ;;  %v1210_v44 = vmax.f32 %v755_v35, 0.0  ;;  %3390 = vmatprep.subr.bf16.mxu0 %v3745_v27  ;;  %v3753_v10 = vld [vmem:[#allocation2 + $0x240] sm:$0xff]  }
 0x12f   : > { %v1209_v39 = vmax.f32 %v644_v28, 0.0  ;;  %v1211_v47 = vmax.f32 %v757_v41, 0.0 }
 0x130   : > { %v1328_v43 = vpack.c.bf16 %v1208_v33, %v1198_v32  ;;  %v1330_v50 = vpack.c.bf16 %v1210_v44, %v1200_v34 }
 0x131   : > { %v1329_v46 = vpack.c.bf16 %v1209_v39, %v1199_v38  ;;  %v647_v48 = vpop.f32.mrb[16].mxu0  ;;  %3327 = vmatpush3.bf16.msra.mxu1 %v3736_v31  ;;  %v1331_v54 = vpack.c.bf16 %v1211_v47, %v1201_v40  ;;  %v760_v57 = vpop.f32.mrb[16].mxu1  ;;  %3391 = vmatpush3.bf16.msra.mxu0 %v3746_v42 }
 0x132   : > { %v648_v51 = vadd.f32 %v647_v48, %v4253_v0  ;;  %v649_v52 = vpop.f32.mrb[17].mxu0  ;;  %3328 = vmatprep.subr.bf16.mxu1 %v3741_v37  ;;  %v761_v60 = vadd.f32 %v760_v57, %v4261_v24  ;;  %v762_v62 = vpop.f32.mrb[17].mxu1  ;;  %3392 = vmatprep.subr.bf16.mxu0 %v3749_v45 }
 0x133   : > { %v650_v55 = vadd.f32 %v649_v52, %v4258_v23  ;;  %v651_v56 = vpop.f32.mrb[18].mxu0  ;;  %2081 = vmatprep.mubr.bf16.mxu1 %v1329_v46  ;;  %v763_v2 = vadd.f32 %v762_v62, %v4264_v26  ;;  %v764_v3 = vpop.f32.mrb[18].mxu1  ;;  %2178 = vmatprep.mubr.bf16.mxu0 %v1331_v54 }
 0x134   : > { %v652_v59 = vadd.f32 %v651_v56, %v4253_v0  ;;  %v653_v61 = vpop.f32.mrb[19].mxu0  ;;  %2082 = vmatmul.mubr.bf16.gmra.mrb[76].mxu1 %v1328_v43  ;;  %v1218_v5 = vmax.f32 %v648_v51, 0.0  ;;  %v1220_v7 = vmax.f32 %v761_v60, 0.0  ;;  %v765_v8 = vadd.f32 %v764_v3, %v4261_v24  ;;  %v766_v9 = vpop.f32.mrb[19].mxu1  ;;  %2179 = vmatmul.mubr.bf16.gmra.mrb[108].mxu0 %v1330_v50 }
 0x135   : > { %v654_v1 = vadd.f32 %v653_v61, %v4258_v23  ;;  %3329 = vmatpush3.bf16.msra.mxu1 %v3742_v49  ;;  %v1219_v11 = vmax.f32 %v650_v55, 0.0  ;;  %v1221_v13 = vmax.f32 %v763_v2, 0.0  ;;  %v767_v14 = vadd.f32 %v766_v9, %v4264_v26  ;;  %3393 = vmatpush3.bf16.msra.mxu0 %v3750_v58 }
 0x136   : > { %v1228_v6 = vmax.f32 %v652_v59, 0.0  ;;  %3330 = vmatprep.subr.bf16.mxu1 %v3747_v53  ;;  %v1230_v21 = vmax.f32 %v765_v8, 0.0  ;;  %3394 = vmatprep.subr.bf16.mxu0 %v3751_v63 }
 0x137   : > { %v1229_v12 = vmax.f32 %v654_v1, 0.0  ;;  %v1231_v25 = vmax.f32 %v767_v14, 0.0 }
 0x138   : > { %v1338_v16 = vpack.c.bf16 %v1228_v6, %v1218_v5  ;;  %v1340_v28 = vpack.c.bf16 %v1230_v21, %v1220_v7 }
 0x139   : > { %v1339_v22 = vpack.c.bf16 %v1229_v12, %v1219_v11  ;;  %v657_v27 = vpop.f32.mrb[20].mxu0  ;;  %3331 = vmatpush3.bf16.msra.mxu1 %v3748_v4  ;;  %v1341_v31 = vpack.c.bf16 %v1231_v25, %v1221_v13  ;;  %v770_v34 = vpop.f32.mrb[20].mxu1  ;;  %3395 = vmatpush3.bf16.msra.mxu0 %v3752_v15 }
 0x13a   : > { %v658_v29 = vadd.f32 %v657_v27, %v4253_v0  ;;  %v659_v30 = vpop.f32.mrb[21].mxu0  ;;  %3444 = vmatprep.subr.bf16.mxu1 %v3753_v10  ;;  %v771_v36 = vadd.f32 %v770_v34, %v4261_v24  ;;  %v772_v38 = vpop.f32.mrb[21].mxu1 }
 0x13b   : > { %v660_v32 = vadd.f32 %v659_v30, %v4258_v23  ;;  %v661_v33 = vpop.f32.mrb[22].mxu0  ;;  %2089 = vmatprep.mubr.bf16.mxu1 %v1339_v22  ;;  %v773_v40 = vadd.f32 %v772_v38, %v4264_v26  ;;  %v774_v41 = vpop.f32.mrb[22].mxu1  ;;  %2186 = vmatprep.mubr.bf16.mxu0 %v1341_v31  ;;  %v416_v22 = vsub.s32 4, %v4239_v17 }
 0x13c   : > { %v662_v35 = vadd.f32 %v661_v33, %v4253_v0  ;;  %v663_v37 = vpop.f32.mrb[23].mxu0  ;;  %2090 = vmatmul.mubr.bf16.gmra.mrb[80].mxu1 %v1338_v16  ;;  %v1238_v42 = vmax.f32 %v658_v29, 0.0  ;;  %v1240_v44 = vmax.f32 %v771_v36, 0.0  ;;  %v775_v45 = vadd.f32 %v774_v41, %v4261_v24  ;;  %v776_v46 = vpop.f32.mrb[23].mxu1  ;;  %2187 = vmatmul.mubr.bf16.gmra.mrb[112].mxu0 %v1340_v28 }
 0x13d   : > { %v664_v39 = vadd.f32 %v663_v37, %v4258_v23  ;;  %v1239_v47 = vmax.f32 %v660_v32, 0.0  ;;  %v1241_v49 = vmax.f32 %v773_v40, 0.0  ;;  %v777_v50 = vadd.f32 %v776_v46, %v4264_v26 }
 0x13e   : > { %v1248_v43 = vmax.f32 %v662_v35, 0.0  ;;  %v1250_v52 = vmax.f32 %v775_v45, 0.0  ;;  %v420_v29 = vsub.s32 5, %v4239_v17  ;;  %v4329_v41 = vrot.slane %v4245_v19, %v416_v22 }
 0x13f   : > { %v1249_v48 = vmax.f32 %v664_v39, 0.0  ;;  %v1251_v54 = vmax.f32 %v777_v50, 0.0 }
 0x140   : > { %v1348_v51 = vpack.c.bf16 %v1248_v43, %v1238_v42  ;;  %v1350_v56 = vpack.c.bf16 %v1250_v52, %v1240_v44  ;;  %v424_v42 = vsub.s32 6, %v4239_v17  ;;  %v4335_v46 = vrot.slane %v4245_v19, %v420_v29 }
 0x141   : > { %v1349_v53 = vpack.c.bf16 %v1249_v48, %v1239_v47  ;;  %v667_v55 = vpop.f32.mrb[24].mxu0  ;;  %v1351_v59 = vpack.c.bf16 %v1251_v54, %v1241_v49  ;;  %v780_v62 = vpop.f32.mrb[24].mxu1 }
 0x142   : > { %v668_v57 = vadd.f32 %v667_v55, %v4253_v0  ;;  %v669_v58 = vpop.f32.mrb[25].mxu0  ;;  %v781_v1 = vadd.f32 %v780_v62, %v4261_v24  ;;  %v782_v3 = vpop.f32.mrb[25].mxu1 }
 0x143   : > { %v670_v60 = vadd.f32 %v669_v58, %v4258_v23  ;;  %v671_v61 = vpop.f32.mrb[26].mxu0  ;;  %2097 = vmatprep.mubr.bf16.mxu1 %v1349_v53  ;;  %v783_v5 = vadd.f32 %v782_v3, %v4264_v26  ;;  %v784_v6 = vpop.f32.mrb[26].mxu1  ;;  %2194 = vmatprep.mubr.bf16.mxu0 %v1351_v59 }
 0x144   : > { %v672_v63 = vadd.f32 %v671_v61, %v4253_v0  ;;  %v673_v2 = vpop.f32.mrb[27].mxu0  ;;  %2098 = vmatmul.mubr.bf16.gmra.mrb[84].mxu1 %v1348_v51  ;;  %v1258_v7 = vmax.f32 %v668_v57, 0.0  ;;  %v1260_v9 = vmax.f32 %v781_v1, 0.0  ;;  %v785_v10 = vadd.f32 %v784_v6, %v4261_v24  ;;  %v786_v11 = vpop.f32.mrb[27].mxu1  ;;  %2195 = vmatmul.mubr.bf16.gmra.mrb[116].mxu0 %v1350_v56 }
 0x145   : > { %v674_v4 = vadd.f32 %v673_v2, %v4258_v23  ;;  %v1259_v12 = vmax.f32 %v670_v60, 0.0  ;;  %v1261_v14 = vmax.f32 %v783_v5, 0.0  ;;  %v787_v15 = vadd.f32 %v786_v11, %v4264_v26 }
 0x146   : > { %v1268_v8 = vmax.f32 %v672_v63, 0.0  ;;  %v1270_v21 = vmax.f32 %v785_v10, 0.0  ;;  %v4341_v57 = vrot.slane %v4245_v19, %v424_v42 }
 0x147   : > { %v1269_v13 = vmax.f32 %v674_v4, 0.0  ;;  %v1271_v27 = vmax.f32 %v787_v15, 0.0 }
 0x148   : > { %v1358_v16 = vpack.c.bf16 %v1268_v8, %v1258_v7  ;;  %v1360_v30 = vpack.c.bf16 %v1270_v21, %v1260_v9 }
 0x149   : > { %v1359_v25 = vpack.c.bf16 %v1269_v13, %v1259_v12  ;;  %v677_v28 = vpop.f32.mrb[28].mxu0  ;;  %v1361_v33 = vpack.c.bf16 %v1271_v27, %v1261_v14  ;;  %v790_v36 = vpop.f32.mrb[28].mxu1 }
 0x14a   : > { %v678_v31 = vadd.f32 %v677_v28, %v4253_v0  ;;  %v679_v32 = vpop.f32.mrb[29].mxu0  ;;  %v791_v38 = vadd.f32 %v790_v36, %v4261_v24  ;;  %v792_v40 = vpop.f32.mrb[29].mxu1 }
 0x14b   : > { %v680_v34 = vadd.f32 %v679_v32, %v4258_v23  ;;  %v681_v35 = vpop.f32.mrb[30].mxu0  ;;  %2105 = vmatprep.mubr.bf16.mxu1 %v1359_v25  ;;  %v793_v44 = vadd.f32 %v792_v40, %v4264_v26  ;;  %v794_v45 = vpop.f32.mrb[30].mxu1  ;;  %2202 = vmatprep.mubr.bf16.mxu0 %v1361_v33 }
 0x14c   : > { %v682_v37 = vadd.f32 %v681_v35, %v4253_v0  ;;  %v683_v39 = vpop.f32.mrb[31].mxu0  ;;  %2106 = vmatmul.mubr.bf16.gmra.mrb[88].mxu1 %v1358_v16  ;;  %v428_v0 = vsub.s32 7, %v4239_v17  ;;  %v1278_v47 = vmax.f32 %v678_v31, 0.0  ;;  %v1280_v49 = vmax.f32 %v791_v38, 0.0  ;;  %v796_v51 = vpop.f32.mrb[31].mxu1  ;;  %2203 = vmatmul.mubr.bf16.gmra.mrb[120].mxu0 %v1360_v30  ;;  %v3754_v31 = vld [vmem:[#allocation2 + $0x200] sm:$0xff]  }
 0x14d   : > { %v684_v43 = vadd.f32 %v683_v39, %v4258_v23  ;;  %v795_v50 = vadd.f32 %v794_v45, %v4261_v24  ;;  %v1279_v52 = vmax.f32 %v680_v34, 0.0  ;;  %v1281_v54 = vmax.f32 %v793_v44, 0.0  ;;  %v3755_v35 = vld [vmem:[#allocation2 + $0x248] sm:$0xff]  }
 0x14e   : > { %v1288_v48 = vmax.f32 %v682_v37, 0.0  ;;  %v797_v23 = vadd.f32 %v796_v51, %v4264_v26  ;;  %v4344_v61 = vrot.slane %v4245_v19, %v428_v0 }
 0x14f   : > { %v1289_v53 = vmax.f32 %v684_v43, 0.0  ;;  %v1290_v56 = vmax.f32 %v795_v50, 0.0 }
 0x150   : > { %v1368_v55 = vpack.c.bf16 %v1288_v48, %v1278_v47  ;;  %v1291_v59 = vmax.f32 %v797_v23, 0.0  ;;  %v3756_v48 = vld [vmem:[#allocation2 + $0x208] sm:$0xff]  }
 0x151   : > { %v1369_v58 = vpack.c.bf16 %v1289_v53, %v1279_v52  ;;  %v833_v60 = vpop.f32.mrb[32].mxu0  ;;  %v1370_v62 = vpack.c.bf16 %v1290_v56, %v1280_v49  ;;  %v946_v26 = vpop.f32.mrb[32].mxu1 }
 0x152   : > { %v834_v24 = vadd.f32 %v833_v60, %v4329_v41  ;;  %v835_v63 = vpop.f32.mrb[33].mxu0  ;;  %v1371_v1 = vpack.c.bf16 %v1291_v59, %v1281_v54  ;;  %v947_v5 = vadd.f32 %v946_v26, %v4341_v57  ;;  %v948_v7 = vpop.f32.mrb[33].mxu1  ;;  %v3757_v54 = vld [vmem:[#allocation2 + $0x250] sm:$0xff]  }
 0x153   : > { %v836_v2 = vadd.f32 %v835_v63, %v4335_v46  ;;  %v837_v3 = vpop.f32.mrb[34].mxu0  ;;  %2113 = vmatprep.mubr.bf16.mxu1 %v1369_v58  ;;  %v949_v8 = vadd.f32 %v948_v7, %v4344_v61  ;;  %v950_v9 = vpop.f32.mrb[34].mxu1 }
 0x154   : > { %v838_v4 = vadd.f32 %v837_v3, %v4329_v41  ;;  %v839_v6 = vpop.f32.mrb[35].mxu0  ;;  %2114 = vmatmul.mubr.bf16.gmra.mrb[92].mxu1 %v1368_v55  ;;  %2210 = vmatprep.mubr.bf16.mxu0 %v1371_v1  ;;  %v1142_v10 = vmax.f32 %v834_v24, 0.0  ;;  %v1144_v12 = vmax.f32 %v947_v5, 0.0  ;;  %v951_v13 = vadd.f32 %v950_v9, %v4341_v57  ;;  %v952_v14 = vpop.f32.mrb[35].mxu1  ;;  %v3758_v1 = vld [vmem:[#allocation2 + $0x210] sm:$0xff]  }
 0x155   : > { %v840_v19 = vadd.f32 %v839_v6, %v4335_v46  ;;  %2211 = vmatmul.mubr.bf16.gmra.mrb[124].mxu0 %v1370_v62  ;;  %v1143_v15 = vmax.f32 %v836_v2, 0.0  ;;  %v1145_v21 = vmax.f32 %v949_v8, 0.0  ;;  %v953_v22 = vadd.f32 %v952_v14, %v4344_v61 }
 0x156   : > { %v1152_v11 = vmax.f32 %v838_v4, 0.0  ;;  %v1154_v27 = vmax.f32 %v951_v13, 0.0  ;;  %v3759_v4 = vld [vmem:[#allocation2 + $0x258] sm:$0xff]  }
 0x157   : > { %v1153_v16 = vmax.f32 %v840_v19, 0.0  ;;  %v1155_v29 = vmax.f32 %v953_v22, 0.0 }
 0x158   : > { %v1302_v25 = vpack.c.bf16 %v1152_v11, %v1142_v10  ;;  %v1304_v32 = vpack.c.bf16 %v1154_v27, %v1144_v12 }
 0x159   : > { %v1303_v28 = vpack.c.bf16 %v1153_v16, %v1143_v15  ;;  %v843_v30 = vpop.f32.mrb[36].mxu0  ;;  %v1305_v36 = vpack.c.bf16 %v1155_v29, %v1145_v21  ;;  %v3760_v15 = vld [vmem:[#allocation2 + $0x218] sm:$0xff]  }
 0x15a   : > { %v844_v33 = vadd.f32 %v843_v30, %v4329_v41  ;;  %v845_v34 = vpop.f32.mrb[37].mxu0  ;;  %v956_v39 = vpop.f32.mrb[36].mxu1 }
 0x15b   : > { %v846_v37 = vadd.f32 %v845_v34, %v4335_v46  ;;  %v847_v38 = vpop.f32.mrb[38].mxu0  ;;  %2251 = vmatprep.mubr.bf16.mxu1 %v1303_v28  ;;  %v957_v42 = vadd.f32 %v956_v39, %v4341_v57  ;;  %v958_v44 = vpop.f32.mrb[37].mxu1  ;;  %2348 = vmatprep.mubr.bf16.mxu0 %v1305_v36  ;;  %v3761_v28 = vld [vmem:[#allocation2 + $0x260] sm:$0xff]  }
 0x15c   : > { %v848_v40 = vadd.f32 %v847_v38, %v4329_v41  ;;  %v849_v43 = vpop.f32.mrb[39].mxu0  ;;  %2252 = vmatmul.mubr.bf16.vlgmr.msra.gmra.mrb[96].mxu1 %v1302_v25  ;;  %v959_v0 = vadd.f32 %v958_v44, %v4344_v61  ;;  %v960_v47 = vpop.f32.mrb[38].mxu1  ;;  %v1162_v49 = vmax.f32 %v844_v33, 0.0  ;;  %v3762_v38 = vld [vmem:[#allocation2 + $0x220] sm:$0xff]  }
 0x15d   : > { %v850_v45 = vadd.f32 %v849_v43, %v4335_v46  ;;  %3445 = vmatpush3.bf16.msra.mxu1 %v3754_v31  ;;  %v1164_v51 = vmax.f32 %v957_v42, 0.0  ;;  %v961_v52 = vadd.f32 %v960_v47, %v4341_v57  ;;  %v962_v53 = vpop.f32.mrb[39].mxu1  ;;  %2349 = vmatmul.mubr.bf16.vlgmr.msra.gmra.mrb[128].mxu0 %v1304_v32  ;;  %v1163_v23 = vmax.f32 %v846_v37, 0.0  ;;  %v3763_v43 = vld [vmem:[#allocation2 + $0x268] sm:$0xff]  }
 0x15e   : > { %v1172_v50 = vmax.f32 %v848_v40, 0.0  ;;  %3446 = vmatprep.subr.bf16.mxu1 %v3755_v35  ;;  %v1165_v56 = vmax.f32 %v959_v0, 0.0  ;;  %v963_v58 = vadd.f32 %v962_v53, %v4344_v61 }
 0x15f   : > { %v1173_v55 = vmax.f32 %v850_v45, 0.0  ;;  %v1174_v60 = vmax.f32 %v961_v52, 0.0 }
 0x160   : > { %v1312_v59 = vpack.c.bf16 %v1172_v50, %v1162_v49  ;;  %v1175_v24 = vmax.f32 %v963_v58, 0.0 }
 0x161   : > { %v1313_v62 = vpack.c.bf16 %v1173_v55, %v1163_v23  ;;  %v853_v63 = vpop.f32.mrb[40].mxu0  ;;  %3447 = vmatpush3.bf16.msra.mxu1 %v3756_v48  ;;  %v1314_v2 = vpack.c.bf16 %v1174_v60, %v1164_v51  ;;  %v3764_v23 = vld [vmem:[#allocation2 + $0x228] sm:$0xff]  }
 0x162   : > { %v854_v3 = vadd.f32 %v853_v63, %v4329_v41  ;;  %v855_v26 = vpop.f32.mrb[41].mxu0  ;;  %3448 = vmatprep.subr.bf16.mxu1 %v3757_v54  ;;  %v1315_v5 = vpack.c.bf16 %v1175_v24, %v1165_v56  ;;  %v966_v19 = vpop.f32.mrb[40].mxu1 }
 0x163   : > { %v856_v6 = vadd.f32 %v855_v26, %v4335_v46  ;;  %v857_v7 = vpop.f32.mrb[42].mxu0  ;;  %2259 = vmatprep.mubr.bf16.mxu1 %v1313_v62  ;;  %v967_v9 = vadd.f32 %v966_v19, %v4341_v57  ;;  %v968_v11 = vpop.f32.mrb[41].mxu1  ;;  %v3765_v62 = vld [vmem:[#allocation2 + $0x270] sm:$0xff]  }
 0x164   : > { %v858_v8 = vadd.f32 %v857_v7, %v4329_v41  ;;  %v859_v10 = vpop.f32.mrb[43].mxu0  ;;  %2260 = vmatmul.mubr.bf16.gmra.mrb[100].mxu1 %v1312_v59  ;;  %v969_v13 = vadd.f32 %v968_v11, %v4344_v61  ;;  %v970_v14 = vpop.f32.mrb[42].mxu1  ;;  %2356 = vmatprep.mubr.bf16.mxu0 %v1315_v5  ;;  %v1182_v16 = vmax.f32 %v854_v3, 0.0  ;;  %v3766_v7 = vld [vmem:[#allocation2 + $0x230] sm:$0xff]  }
 0x165   : > { %v860_v12 = vadd.f32 %v859_v10, %v4335_v46  ;;  %3449 = vmatpush3.bf16.msra.mxu1 %v3758_v1  ;;  %v1184_v22 = vmax.f32 %v967_v9, 0.0  ;;  %v971_v25 = vadd.f32 %v970_v14, %v4341_v57  ;;  %v972_v27 = vpop.f32.mrb[43].mxu1  ;;  %2357 = vmatmul.mubr.bf16.gmra.mrb[132].mxu0 %v1314_v2  ;;  %v1183_v29 = vmax.f32 %v856_v6, 0.0  ;;  %v3767_v10 = vld [vmem:[#allocation2 + $0x278] sm:$0xff]  }
 0x166   : > { %v1192_v21 = vmax.f32 %v858_v8, 0.0  ;;  %3450 = vmatprep.subr.bf16.mxu1 %v3759_v4  ;;  %v1185_v31 = vmax.f32 %v969_v13, 0.0  ;;  %v973_v32 = vadd.f32 %v972_v27, %v4344_v61 }
 0x167   : > { %v1193_v30 = vmax.f32 %v860_v12, 0.0  ;;  %v1194_v34 = vmax.f32 %v971_v25, 0.0 }
 0x168   : > { %v1322_v33 = vpack.c.bf16 %v1192_v21, %v1182_v16  ;;  %v1195_v36 = vmax.f32 %v973_v32, 0.0 }
 0x169   : > { %v1323_v35 = vpack.c.bf16 %v1193_v30, %v1183_v29  ;;  %v863_v37 = vpop.f32.mrb[44].mxu0  ;;  %3451 = vmatpush3.bf16.msra.mxu1 %v3760_v15  ;;  %v1324_v39 = vpack.c.bf16 %v1194_v34, %v1184_v22  ;;  %v3768_v29 = vld [vmem:[#allocation2 + $0x238] sm:$0xff]  }
 0x16a   : > { %v864_v40 = vadd.f32 %v863_v37, %v4329_v41  ;;  %v865_v42 = vpop.f32.mrb[45].mxu0  ;;  %3452 = vmatprep.subr.bf16.mxu1 %v3761_v28  ;;  %v1325_v44 = vpack.c.bf16 %v1195_v36, %v1185_v31  ;;  %v976_v47 = vpop.f32.mrb[44].mxu1 }
 0x16b   : > { %v866_v45 = vadd.f32 %v865_v42, %v4335_v46  ;;  %v867_v0 = vpop.f32.mrb[46].mxu0  ;;  %2267 = vmatprep.mubr.bf16.mxu1 %v1323_v35  ;;  %v977_v49 = vadd.f32 %v976_v47, %v4341_v57  ;;  %v978_v51 = vpop.f32.mrb[45].mxu1 }
 0x16c   : > { %v868_v48 = vadd.f32 %v867_v0, %v4329_v41  ;;  %v869_v50 = vpop.f32.mrb[47].mxu0  ;;  %2268 = vmatmul.mubr.bf16.gmra.mrb[104].mxu1 %v1322_v33  ;;  %v979_v53 = vadd.f32 %v978_v51, %v4344_v61  ;;  %v980_v54 = vpop.f32.mrb[46].mxu1  ;;  %2364 = vmatprep.mubr.bf16.mxu0 %v1325_v44  ;;  %v1202_v55 = vmax.f32 %v864_v40, 0.0 }
 0x16d   : > { %v870_v52 = vadd.f32 %v869_v50, %v4335_v46  ;;  %3453 = vmatpush3.bf16.msra.mxu1 %v3762_v38  ;;  %v1204_v58 = vmax.f32 %v977_v49, 0.0  ;;  %v981_v59 = vadd.f32 %v980_v54, %v4341_v57  ;;  %v982_v60 = vpop.f32.mrb[47].mxu1  ;;  %2365 = vmatmul.mubr.bf16.gmra.mrb[136].mxu0 %v1324_v39  ;;  %v1203_v24 = vmax.f32 %v866_v45, 0.0 }
 0x16e   : > { %v1212_v56 = vmax.f32 %v868_v48, 0.0  ;;  %3454 = vmatprep.subr.bf16.mxu1 %v3763_v43  ;;  %v1205_v1 = vmax.f32 %v979_v53, 0.0  ;;  %v983_v2 = vadd.f32 %v982_v60, %v4344_v61 }
 0x16f   : > { %v1213_v63 = vmax.f32 %v870_v52, 0.0  ;;  %v1214_v26 = vmax.f32 %v981_v59, 0.0 }
 0x170   : > { %v1332_v3 = vpack.c.bf16 %v1212_v56, %v1202_v55  ;;  %v1215_v5 = vmax.f32 %v983_v2, 0.0 }
 0x171   : > { %v1333_v4 = vpack.c.bf16 %v1213_v63, %v1203_v24  ;;  %v873_v6 = vpop.f32.mrb[48].mxu0  ;;  %3455 = vmatpush3.bf16.msra.mxu1 %v3764_v23  ;;  %v1334_v19 = vpack.c.bf16 %v1214_v26, %v1204_v58 }
 0x172   : > { %v874_v8 = vadd.f32 %v873_v6, %v4329_v41  ;;  %v875_v9 = vpop.f32.mrb[49].mxu0  ;;  %3456 = vmatprep.subr.bf16.mxu1 %v3765_v62  ;;  %v1335_v11 = vpack.c.bf16 %v1215_v5, %v1205_v1  ;;  %v986_v14 = vpop.f32.mrb[48].mxu1 }
 0x173   : > { %v876_v12 = vadd.f32 %v875_v9, %v4335_v46  ;;  %v877_v13 = vpop.f32.mrb[50].mxu0  ;;  %2275 = vmatprep.mubr.bf16.mxu1 %v1333_v4  ;;  %v987_v16 = vadd.f32 %v986_v14, %v4341_v57  ;;  %v988_v22 = vpop.f32.mrb[49].mxu1 }
 0x174   : > { %v878_v15 = vadd.f32 %v877_v13, %v4329_v41  ;;  %v879_v21 = vpop.f32.mrb[51].mxu0  ;;  %2276 = vmatmul.mubr.bf16.gmra.mrb[108].mxu1 %v1332_v3  ;;  %v989_v27 = vadd.f32 %v988_v22, %v4344_v61  ;;  %v990_v28 = vpop.f32.mrb[50].mxu1  ;;  %2372 = vmatprep.mubr.bf16.mxu0 %v1335_v11  ;;  %v1222_v30 = vmax.f32 %v874_v8, 0.0 }
 0x175   : > { %v880_v25 = vadd.f32 %v879_v21, %v4335_v46  ;;  %3457 = vmatpush3.bf16.msra.mxu1 %v3766_v7  ;;  %v1224_v32 = vmax.f32 %v987_v16, 0.0  ;;  %v991_v33 = vadd.f32 %v990_v28, %v4341_v57  ;;  %v992_v34 = vpop.f32.mrb[51].mxu1  ;;  %2373 = vmatmul.mubr.bf16.gmra.mrb[140].mxu0 %v1334_v19  ;;  %v1223_v35 = vmax.f32 %v876_v12, 0.0 }
 0x176   : > { %v1232_v31 = vmax.f32 %v878_v15, 0.0  ;;  %3458 = vmatprep.subr.bf16.mxu1 %v3767_v10  ;;  %v1225_v37 = vmax.f32 %v989_v27, 0.0  ;;  %v993_v38 = vadd.f32 %v992_v34, %v4344_v61 }
 0x177   : > { %v1233_v36 = vmax.f32 %v880_v25, 0.0  ;;  %v1234_v40 = vmax.f32 %v991_v33, 0.0 }
 0x178   : > { %v1342_v39 = vpack.c.bf16 %v1232_v31, %v1222_v30  ;;  %v1235_v43 = vmax.f32 %v993_v38, 0.0 }
 0x179   : > { %v1343_v42 = vpack.c.bf16 %v1233_v36, %v1223_v35  ;;  %v883_v44 = vpop.f32.mrb[52].mxu0  ;;  %3459 = vmatpush3.bf16.msra.mxu1 %v3768_v29  ;;  %v1344_v45 = vpack.c.bf16 %v1234_v40, %v1224_v32 }
 0x17a   : > { %v884_v0 = vadd.f32 %v883_v44, %v4329_v41  ;;  %v885_v47 = vpop.f32.mrb[53].mxu0  ;;  %v1345_v48 = vpack.c.bf16 %v1235_v43, %v1225_v37  ;;  %v996_v51 = vpop.f32.mrb[52].mxu1 }
 0x17b   : > { %v886_v49 = vadd.f32 %v885_v47, %v4335_v46  ;;  %v887_v50 = vpop.f32.mrb[54].mxu0  ;;  %2283 = vmatprep.mubr.bf16.mxu1 %v1343_v42  ;;  %v997_v53 = vadd.f32 %v996_v51, %v4341_v57  ;;  %v998_v23 = vpop.f32.mrb[53].mxu1  ;;  %v395_v47 = vld [vmem:[%s4699_s2 + $0x8] sm:$0x3] }
 0x17c   : > { %v888_v52 = vadd.f32 %v887_v50, %v4329_v41  ;;  %v889_v54 = vpop.f32.mrb[55].mxu0  ;;  %2284 = vmatmul.mubr.bf16.gmra.mrb[112].mxu1 %v1342_v39  ;;  %v999_v56 = vadd.f32 %v998_v23, %v4344_v61  ;;  %v1000_v58 = vpop.f32.mrb[54].mxu1  ;;  %2380 = vmatprep.mubr.bf16.mxu0 %v1345_v48  ;;  %v1242_v59 = vmax.f32 %v884_v0, 0.0 }
 0x17d   : > { %v890_v55 = vadd.f32 %v889_v54, %v4335_v46  ;;  %v1244_v62 = vmax.f32 %v997_v53, 0.0  ;;  %v1001_v24 = vadd.f32 %v1000_v58, %v4341_v57  ;;  %v1002_v63 = vpop.f32.mrb[55].mxu1  ;;  %2381 = vmatmul.mubr.bf16.gmra.mrb[144].mxu0 %v1344_v45  ;;  %v1243_v1 = vmax.f32 %v886_v49, 0.0 }
 0x17e   : > { %v1252_v60 = vmax.f32 %v888_v52, 0.0  ;;  %v1245_v3 = vmax.f32 %v999_v56, 0.0  ;;  %v1003_v26 = vadd.f32 %v1002_v63, %v4344_v61 }
 0x17f   : > { %v1253_v2 = vmax.f32 %v890_v55, 0.0  ;;  %v1254_v5 = vmax.f32 %v1001_v24, 0.0 }
 0x180   : > { %v1352_v4 = vpack.c.bf16 %v1252_v60, %v1242_v59  ;;  %v1255_v7 = vmax.f32 %v1003_v26, 0.0  ;;  %v4413_v59 = vrot.slane %v395_v47, %v400_v18  ;;  %v4417_v60 = vrot.slane %v395_v47, %v404_v20 }
 0x181   : > { %v1353_v6 = vpack.c.bf16 %v1253_v2, %v1243_v1  ;;  %v893_v19 = vpop.f32.mrb[56].mxu0  ;;  %v1354_v8 = vpack.c.bf16 %v1254_v5, %v1244_v62 }
 0x182   : > { %v894_v9 = vadd.f32 %v893_v19, %v4329_v41  ;;  %v895_v10 = vpop.f32.mrb[57].mxu0  ;;  %v1355_v11 = vpack.c.bf16 %v1255_v7, %v1245_v3  ;;  %v1006_v14 = vpop.f32.mrb[56].mxu1 }
 0x183   : > { %v896_v12 = vadd.f32 %v895_v10, %v4335_v46  ;;  %v897_v13 = vpop.f32.mrb[58].mxu0  ;;  %2291 = vmatprep.mubr.bf16.mxu1 %v1353_v6  ;;  %v1007_v16 = vadd.f32 %v1006_v14, %v4341_v57  ;;  %v1008_v22 = vpop.f32.mrb[57].mxu1 }
 0x184   : > { %v898_v15 = vadd.f32 %v897_v13, %v4329_v41  ;;  %v899_v21 = vpop.f32.mrb[59].mxu0  ;;  %2292 = vmatmul.mubr.bf16.gmra.mrb[116].mxu1 %v1352_v4  ;;  %v1009_v27 = vadd.f32 %v1008_v22, %v4344_v61  ;;  %v1010_v28 = vpop.f32.mrb[58].mxu1  ;;  %2388 = vmatprep.mubr.bf16.mxu0 %v1355_v11  ;;  %v1262_v29 = vmax.f32 %v894_v9, 0.0 }
 0x185   : > { %v900_v25 = vadd.f32 %v899_v21, %v4335_v46  ;;  %v1264_v31 = vmax.f32 %v1007_v16, 0.0  ;;  %v1011_v32 = vadd.f32 %v1010_v28, %v4341_v57  ;;  %v1012_v33 = vpop.f32.mrb[59].mxu1  ;;  %2389 = vmatmul.mubr.bf16.gmra.mrb[148].mxu0 %v1354_v8  ;;  %v1263_v34 = vmax.f32 %v896_v12, 0.0 }
 0x186   : > { %v1272_v30 = vmax.f32 %v898_v15, 0.0  ;;  %v1265_v36 = vmax.f32 %v1009_v27, 0.0  ;;  %v1013_v37 = vadd.f32 %v1012_v33, %v4344_v61 }
 0x187   : > { %v1273_v35 = vmax.f32 %v900_v25, 0.0  ;;  %v1274_v39 = vmax.f32 %v1011_v32, 0.0 }
 0x188   : > { %v1362_v38 = vpack.c.bf16 %v1272_v30, %v1262_v29  ;;  %v1275_v42 = vmax.f32 %v1013_v37, 0.0 }
 0x189   : > { %v1363_v40 = vpack.c.bf16 %v1273_v35, %v1263_v34  ;;  %v903_v43 = vpop.f32.mrb[60].mxu0  ;;  %v1364_v44 = vpack.c.bf16 %v1274_v39, %v1264_v31 }
 0x18a   : > { %v904_v45 = vadd.f32 %v903_v43, %v4329_v41  ;;  %v905_v0 = vpop.f32.mrb[61].mxu0  ;;  %v1365_v48 = vpack.c.bf16 %v1275_v42, %v1265_v36  ;;  %v1016_v51 = vpop.f32.mrb[60].mxu1 }
 0x18b   : > { %v906_v49 = vadd.f32 %v905_v0, %v4335_v46  ;;  %v907_v50 = vpop.f32.mrb[62].mxu0  ;;  %2299 = vmatprep.mubr.bf16.mxu1 %v1363_v40  ;;  %v1017_v53 = vadd.f32 %v1016_v51, %v4341_v57  ;;  %v1018_v23 = vpop.f32.mrb[61].mxu1 }
 0x18c   : > { %v908_v52 = vadd.f32 %v907_v50, %v4329_v41  ;;  %v909_v54 = vpop.f32.mrb[63].mxu0  ;;  %2300 = vmatmul.mubr.bf16.gmra.mrb[120].mxu1 %v1362_v38  ;;  %v1019_v56 = vadd.f32 %v1018_v23, %v4344_v61  ;;  %v1020_v58 = vpop.f32.mrb[62].mxu1  ;;  %2396 = vmatprep.mubr.bf16.mxu0 %v1365_v48  ;;  %v1282_v41 = vmax.f32 %v904_v45, 0.0 }
 0x18d   : > { %v910_v55 = vadd.f32 %v909_v54, %v4335_v46  ;;  %v1284_v24 = vmax.f32 %v1017_v53, 0.0  ;;  %v1021_v63 = vadd.f32 %v1020_v58, %v4341_v57  ;;  %v1022_v1 = vpop.f32.mrb[63].mxu1  ;;  %2397 = vmatmul.mubr.bf16.gmra.mrb[152].mxu0 %v1364_v44  ;;  %v1283_v46 = vmax.f32 %v906_v49, 0.0 }
 0x18e   : > { %v1292_v62 = vmax.f32 %v908_v52, 0.0  ;;  %v1285_v3 = vmax.f32 %v1019_v56, 0.0  ;;  %v1023_v26 = vadd.f32 %v1022_v1, %v4344_v61 }
 0x18f   : > { %v1293_v2 = vmax.f32 %v910_v55, 0.0  ;;  %v1294_v5 = vmax.f32 %v1021_v63, 0.0 }
 0x190   : > { %v1372_v4 = vpack.c.bf16 %v1292_v62, %v1282_v41  ;;  %v1295_v6 = vmax.f32 %v1023_v26, 0.0 }
 0x191   : > { %v1373_v18 = vpack.c.bf16 %v1293_v2, %v1283_v46  ;;  %v1059_v7 = vpop.f32.mrb[64].mxu0  ;;  %v1374_v17 = vpack.c.bf16 %v1294_v5, %v1284_v24 }
 0x192   : > { %v1060_v20 = vadd.f32 %v1059_v7, %v4413_v59  ;;  %v1061_v19 = vpop.f32.mrb[65].mxu0  ;;  %v1375_v8 = vpack.c.bf16 %v1295_v6, %v1285_v3 }
 0x193   : > { %v1062_v9 = vadd.f32 %v1061_v19, %v4417_v60  ;;  %v1063_v57 = vpop.f32.mrb[66].mxu0  ;;  %2307 = vmatprep.mubr.bf16.mxu1 %v1373_v18 }
 0x194   : > { %v1064_v10 = vadd.f32 %v1063_v57, %v4413_v59  ;;  %v1065_v11 = vpop.f32.mrb[67].mxu0  ;;  %2308 = vmatmul.mubr.bf16.gmra.mrb[124].mxu1 %v1372_v4  ;;  %2404 = vmatprep.mubr.bf16.mxu0 %v1375_v8  ;;  %v1146_v12 = vmax.f32 %v1060_v20, 0.0 }
 0x195   : > { %v1066_v61 = vadd.f32 %v1065_v11, %v4417_v60  ;;  %2405 = vmatmul.mubr.bf16.gmra.mrb[156].mxu0 %v1374_v17  ;;  %v1147_v14 = vmax.f32 %v1062_v9, 0.0 }
 0x196   : > { %v1156_v13 = vmax.f32 %v1064_v10, 0.0 }
 0x197   : > { %v1157_v15 = vmax.f32 %v1066_v61, 0.0 }
 0x198   : > { %v1306_v16 = vpack.c.bf16 %v1156_v13, %v1146_v12 }
 0x199   : > { %v1307_v21 = vpack.c.bf16 %v1157_v15, %v1147_v14  ;;  %v1069_v22 = vpop.f32.mrb[68].mxu0 }
 0x19a   : > { %v1070_v25 = vadd.f32 %v1069_v22, %v4413_v59  ;;  %v1071_v27 = vpop.f32.mrb[69].mxu0 }
 0x19b   : > { %v1072_v28 = vadd.f32 %v1071_v27, %v4417_v60  ;;  %v1073_v29 = vpop.f32.mrb[70].mxu0  ;;  %2445 = vmatprep.mubr.bf16.mxu1 %v1307_v21 }
 0x19c   : > { %v1074_v30 = vadd.f32 %v1073_v29, %v4413_v59  ;;  %v1075_v31 = vpop.f32.mrb[71].mxu0  ;;  %2446 = vmatmul.mubr.bf16.vlgmr.msra.gmra.mrb[128].mxu1 %v1306_v16  ;;  %v1166_v33 = vmax.f32 %v1070_v25, 0.0 }
 0x19d   : > { %v1076_v32 = vadd.f32 %v1075_v31, %v4417_v60  ;;  %v1167_v35 = vmax.f32 %v1072_v28, 0.0 }
 0x19e   : > { %v1176_v34 = vmax.f32 %v1074_v30, 0.0 }
 0x19f   : > { %v1177_v36 = vmax.f32 %v1076_v32, 0.0 }
 0x1a0   : > { %v1316_v37 = vpack.c.bf16 %v1176_v34, %v1166_v33 }
 0x1a1   : > { %v1317_v38 = vpack.c.bf16 %v1177_v36, %v1167_v35  ;;  %v1079_v39 = vpop.f32.mrb[72].mxu0 }
 0x1a2   : > { %v1080_v40 = vadd.f32 %v1079_v39, %v4413_v59  ;;  %v1081_v42 = vpop.f32.mrb[73].mxu0 }
 0x1a3   : > { %v1082_v43 = vadd.f32 %v1081_v42, %v4417_v60  ;;  %v1083_v44 = vpop.f32.mrb[74].mxu0  ;;  %2453 = vmatprep.mubr.bf16.mxu1 %v1317_v38 }
 0x1a4   : > { %v1084_v45 = vadd.f32 %v1083_v44, %v4413_v59  ;;  %v1085_v0 = vpop.f32.mrb[75].mxu0  ;;  %2454 = vmatmul.mubr.bf16.gmra.mrb[132].mxu1 %v1316_v37  ;;  %v1186_v48 = vmax.f32 %v1080_v40, 0.0 }
 0x1a5   : > { %v1086_v47 = vadd.f32 %v1085_v0, %v4417_v60  ;;  %v1187_v50 = vmax.f32 %v1082_v43, 0.0 }
 0x1a6   : > { %v1196_v49 = vmax.f32 %v1084_v45, 0.0 }
 0x1a7   : > { %v1197_v51 = vmax.f32 %v1086_v47, 0.0 }
 0x1a8   : > { %v1326_v52 = vpack.c.bf16 %v1196_v49, %v1186_v48 }
 0x1a9   : > { %v1327_v53 = vpack.c.bf16 %v1197_v51, %v1187_v50  ;;  %v1089_v54 = vpop.f32.mrb[76].mxu0 }
 0x1aa   : > { %v1090_v23 = vadd.f32 %v1089_v54, %v4413_v59  ;;  %v1091_v55 = vpop.f32.mrb[77].mxu0 }
 0x1ab   : > { %v1092_v56 = vadd.f32 %v1091_v55, %v4417_v60  ;;  %v1093_v58 = vpop.f32.mrb[78].mxu0  ;;  %2461 = vmatprep.mubr.bf16.mxu1 %v1327_v53 }
 0x1ac   : > { %v1094_v41 = vadd.f32 %v1093_v58, %v4413_v59  ;;  %v1095_v62 = vpop.f32.mrb[79].mxu0  ;;  %2462 = vmatmul.mubr.bf16.gmra.mrb[136].mxu1 %v1326_v52  ;;  %v1206_v63 = vmax.f32 %v1090_v23, 0.0 }
 0x1ad   : > { %v1096_v24 = vadd.f32 %v1095_v62, %v4417_v60  ;;  %v1207_v46 = vmax.f32 %v1092_v56, 0.0 }
 0x1ae   : > { %v1216_v1 = vmax.f32 %v1094_v41, 0.0 }
 0x1af   : > { %v1217_v2 = vmax.f32 %v1096_v24, 0.0 }
 0x1b0   : > { %v1336_v3 = vpack.c.bf16 %v1216_v1, %v1206_v63  ;;  %v3769_v63 = vld [vmem:[%s4702_s5] sm:$0xff]   ;;  %v3772_v1 = vld [vmem:[%s4702_s5 + $0x18] sm:$0xff]  }
 0x1b1   : > { %v1337_v26 = vpack.c.bf16 %v1217_v2, %v1207_v46  ;;  %v1099_v4 = vpop.f32.mrb[80].mxu0  ;;  %3540 = vmatprep.subr.bf16.mxu0 %v3769_v63  ;;  %v4468_v2 = vld [vmem:[%s4701_s4] ss:$0 sm:$0xff] }
 0x1b2   : > { %v1100_v5 = vadd.f32 %v1099_v4, %v4413_v59  ;;  %v1101_v18 = vpop.f32.mrb[81].mxu0  ;;  %3541 = vmatpush3.bf16.msra.mxu0 %v3769_v63 }
 0x1b3   : > { %v1102_v6 = vadd.f32 %v1101_v18, %v4417_v60  ;;  %v1103_v7 = vpop.f32.mrb[82].mxu0  ;;  %2469 = vmatprep.mubr.bf16.mxu1 %v1337_v26  ;;  %v3773_v18 = vld [vmem:[%s4702_s5 + $0x20] sm:$0xff]  }
 0x1b4   : > { %v1104_v17 = vadd.f32 %v1103_v7, %v4413_v59  ;;  %v1105_v20 = vpop.f32.mrb[83].mxu0  ;;  %2470 = vmatmul.mubr.bf16.gmra.mrb[140].mxu1 %v1336_v3  ;;  %v1226_v8 = vmax.f32 %v1100_v5, 0.0 }
 0x1b5   : > { %v1106_v19 = vadd.f32 %v1105_v20, %v4417_v60  ;;  %v1227_v57 = vmax.f32 %v1102_v6, 0.0 }
 0x1b6   : > { %v1236_v9 = vmax.f32 %v1104_v17, 0.0 }
 0x1b7   : > { %v1237_v10 = vmax.f32 %v1106_v19, 0.0 }
 0x1b8   : > { %v1346_v11 = vpack.c.bf16 %v1236_v9, %v1226_v8 }
 0x1b9   : > { %v1347_v61 = vpack.c.bf16 %v1237_v10, %v1227_v57  ;;  %v1109_v12 = vpop.f32.mrb[84].mxu0 }
 0x1ba   : > { %v1110_v13 = vadd.f32 %v1109_v12, %v4413_v59  ;;  %v1111_v14 = vpop.f32.mrb[85].mxu0 }
 0x1bb   : > { %v1112_v15 = vadd.f32 %v1111_v14, %v4417_v60  ;;  %v1113_v16 = vpop.f32.mrb[86].mxu0  ;;  %2477 = vmatprep.mubr.bf16.mxu1 %v1347_v61  ;;  %v3774_v61 = vld [vmem:[%s4702_s5 + $0x28] sm:$0xff]  }
 0x1bc   : > { %v1114_v21 = vadd.f32 %v1113_v16, %v4413_v59  ;;  %v1115_v22 = vpop.f32.mrb[87].mxu0  ;;  %2478 = vmatmul.mubr.bf16.gmra.mrb[144].mxu1 %v1346_v11  ;;  %v1246_v27 = vmax.f32 %v1110_v13, 0.0 }
 0x1bd   : > { %v1116_v25 = vadd.f32 %v1115_v22, %v4417_v60  ;;  %v1247_v29 = vmax.f32 %v1112_v15, 0.0  ;;  %v3775_v22 = vld [vmem:[%s4702_s5 + $0x30] sm:$0xff]  }
 0x1be   : > { %v1256_v28 = vmax.f32 %v1114_v21, 0.0 }
 0x1bf   : > { %v1257_v30 = vmax.f32 %v1116_v25, 0.0 }
 0x1c0   : > { %v1356_v31 = vpack.c.bf16 %v1256_v28, %v1246_v27 }
 0x1c1   : > { %v1357_v32 = vpack.c.bf16 %v1257_v30, %v1247_v29  ;;  %v1119_v33 = vpop.f32.mrb[88].mxu0 }
 0x1c2   : > { %v1120_v34 = vadd.f32 %v1119_v33, %v4413_v59  ;;  %v1121_v35 = vpop.f32.mrb[89].mxu0 }
 0x1c3   : > { %v1122_v36 = vadd.f32 %v1121_v35, %v4417_v60  ;;  %v1123_v37 = vpop.f32.mrb[90].mxu0  ;;  %2485 = vmatprep.mubr.bf16.mxu1 %v1357_v32 }
 0x1c4   : > { %v1124_v38 = vadd.f32 %v1123_v37, %v4413_v59  ;;  %v1125_v39 = vpop.f32.mrb[91].mxu0  ;;  %2486 = vmatmul.mubr.bf16.gmra.mrb[148].mxu1 %v1356_v31  ;;  %v1266_v42 = vmax.f32 %v1120_v34, 0.0 }
 0x1c5   : > { %v1126_v40 = vadd.f32 %v1125_v39, %v4417_v60  ;;  %v1267_v44 = vmax.f32 %v1122_v36, 0.0  ;;  %v3776_v36 = vld [vmem:[%s4702_s5 + $0x38] sm:$0xff]  }
 0x1c6   : > { %v1276_v43 = vmax.f32 %v1124_v38, 0.0 }
 0x1c7   : > { %v1277_v45 = vmax.f32 %v1126_v40, 0.0 }
 0x1c8   : > { %v1366_v0 = vpack.c.bf16 %v1276_v43, %v1266_v42 }
 0x1c9   : > { %v1367_v47 = vpack.c.bf16 %v1277_v45, %v1267_v44  ;;  %v1129_v48 = vpop.f32.mrb[92].mxu0 }
 0x1ca   : > { %v1130_v49 = vadd.f32 %v1129_v48, %v4413_v59  ;;  %v1131_v50 = vpop.f32.mrb[93].mxu0 }
 0x1cb   : > { %v1132_v51 = vadd.f32 %v1131_v50, %v4417_v60  ;;  %v1133_v52 = vpop.f32.mrb[94].mxu0  ;;  %2493 = vmatprep.mubr.bf16.mxu1 %v1367_v47 }
 0x1cc   : > { %v1134_v53 = vadd.f32 %v1133_v52, %v4413_v59  ;;  %v1135_v54 = vpop.f32.mrb[95].mxu0  ;;  %2494 = vmatmul.mubr.bf16.gmra.mrb[152].mxu1 %v1366_v0  ;;  %v1286_v55 = vmax.f32 %v1130_v49, 0.0  ;;  %v3770_v59 = vld [vmem:[%s4702_s5 + $0x8] sm:$0xff]  }
 0x1cd   : > { %v1136_v23 = vadd.f32 %v1135_v54, %v4417_v60  ;;  %v1287_v58 = vmax.f32 %v1132_v51, 0.0  ;;  %3542 = vmatprep.subr.bf16.mxu0 %v3770_v59  ;;  %v3771_v60 = vld [vmem:[%s4702_s5 + $0x10] sm:$0xff]  }
 0x1ce   : > { %v1296_v56 = vmax.f32 %v1134_v53, 0.0  ;;  %3543 = vmatpush3.bf16.msra.mxu0 %v3770_v59 }
 0x1cf   : > { %v1297_v41 = vmax.f32 %v1136_v23, 0.0  ;;  %3544 = vmatprep.subr.bf16.mxu0 %v3771_v60 }
 0x1d0   : > { %v1376_v62 = vpack.c.bf16 %v1296_v56, %v1286_v55 }
 0x1d1   : > { %v1377_v24 = vpack.c.bf16 %v1297_v41, %v1287_v58 }
 0x1d2   : > { %3545 = vmatpush3.bf16.msra.mxu0 %v3771_v60 }
 0x1d3   : > { %2501 = vmatprep.mubr.bf16.mxu1 %v1377_v24  ;;  %3546 = vmatprep.subr.bf16.mxu0 %v3772_v1 }
 0x1d4   : > { %2502 = vmatmul.mubr.bf16.gmra.mrb[156].mxu1 %v1376_v62 }
 0x1d6   : > { %3547 = vmatpush3.bf16.msra.mxu0 %v3772_v1 }
 0x1d7   : > { %3548 = vmatprep.subr.bf16.mxu0 %v3773_v18 }
 0x1da   : > { %3549 = vmatpush3.bf16.msra.mxu0 %v3773_v18 }
 0x1db   : > { %3550 = vmatprep.subr.bf16.mxu0 %v3774_v61 }
 0x1de   : > { %3551 = vmatpush3.bf16.msra.mxu0 %v3774_v61 }
 0x1df   : > { %3552 = vmatprep.subr.bf16.mxu0 %v3775_v22 }
 0x1e2   : > { %3553 = vmatpush3.bf16.msra.mxu0 %v3775_v22 }
 0x1e3   : > { %3554 = vmatprep.subr.bf16.mxu0 %v3776_v36 }
 0x1e6   : > { %3555 = vmatpush3.bf16.msra.mxu0 %v3776_v36 }
 0x1ef   : > { %v3204_v46 = vpop.f32.mrb[64].mxu1  ;;  %v3268_v5 = vpop.f32.mrb[96].mxu0 }
 0x1f0   : > { %v3205_v3 = vpop.f32.mrb[65].mxu1  ;;  %v3269_v7 = vpop.f32.mrb[97].mxu0 }
 0x1f1   : > { %v3206_v26 = vadd.f32 %v3205_v3, %v3204_v46  ;;  %v3207_v4 = vpop.f32.mrb[66].mxu1  ;;  %v3270_v19 = vadd.f32 %v3269_v7, %v3268_v5  ;;  %v3271_v8 = vpop.f32.mrb[98].mxu0 }
 0x1f2   : > { %v3208_v6 = vpop.f32.mrb[67].mxu1  ;;  %v3272_v9 = vpop.f32.mrb[99].mxu0 }
 0x1f3   : > { %v2060_v17 = vadd.f32 %v3206_v26, %v4468_v2  ;;  %v3209_v20 = vadd.f32 %v3208_v6, %v3207_v4  ;;  %v3273_v11 = vadd.f32 %v3272_v9, %v3271_v8 }
 0x1f5   : > { %v2063_v57 = vadd.f32 %v3209_v20, %v4468_v2  ;;  %v4475_v10 = vadd.f32 %v3270_v19, %v2060_v17 }
 0x1f7   : > { %v4480_v12 = vadd.f32 %v3273_v11, %v2063_v57  ;;  %v3210_v13 = vpop.f32.mrb[68].mxu1  ;;  %v3274_v21 = vpop.f32.mrb[100].mxu0 }
 0x1f8   : > { %v3211_v14 = vpop.f32.mrb[69].mxu1  ;;  %v3275_v27 = vpop.f32.mrb[101].mxu0 }
 0x1f9   : > { %v3212_v15 = vadd.f32 %v3211_v14, %v3210_v13  ;;  %v3213_v16 = vpop.f32.mrb[70].mxu1  ;;  %v3276_v30 = vadd.f32 %v3275_v27, %v3274_v21  ;;  %v3277_v31 = vpop.f32.mrb[102].mxu0 }
 0x1fa   : > { %v3214_v25 = vpop.f32.mrb[71].mxu1  ;;  %v3278_v32 = vpop.f32.mrb[103].mxu0 }
 0x1fb   : > { %v2068_v28 = vadd.f32 %v3212_v15, %v4468_v2  ;;  %v3215_v29 = vadd.f32 %v3214_v25, %v3213_v16  ;;  %v3279_v35 = vadd.f32 %v3278_v32, %v3277_v31 }
 0x1fd   : > { %v2071_v33 = vadd.f32 %v3215_v29, %v4468_v2  ;;  %v4487_v34 = vadd.f32 %v3276_v30, %v2068_v28 }
 0x1ff   : > { %v4492_v37 = vadd.f32 %v3279_v35, %v2071_v33  ;;  %v3216_v38 = vpop.f32.mrb[72].mxu1  ;;  %v3280_v43 = vpop.f32.mrb[104].mxu0 }
 0x200   : > { %v3217_v39 = vpop.f32.mrb[73].mxu1  ;;  %v3281_v45 = vpop.f32.mrb[105].mxu0 }
 0x201   : > { %v3218_v40 = vadd.f32 %v3217_v39, %v3216_v38  ;;  %v3219_v42 = vpop.f32.mrb[74].mxu1  ;;  %v3282_v48 = vadd.f32 %v3281_v45, %v3280_v43  ;;  %v3283_v49 = vpop.f32.mrb[106].mxu0 }
 0x202   : > { %v3220_v44 = vpop.f32.mrb[75].mxu1  ;;  %v3284_v50 = vpop.f32.mrb[107].mxu0 }
 0x203   : > { %v2076_v0 = vadd.f32 %v3218_v40, %v4468_v2  ;;  %v3221_v47 = vadd.f32 %v3220_v44, %v3219_v42  ;;  %v3285_v53 = vadd.f32 %v3284_v50, %v3283_v49 }
 0x205   : > { %v2079_v51 = vadd.f32 %v3221_v47, %v4468_v2  ;;  %v4496_v52 = vadd.f32 %v3282_v48, %v2076_v0 }
 0x207   : > { %v4498_v54 = vadd.f32 %v3285_v53, %v2079_v51  ;;  %v3222_v23 = vpop.f32.mrb[76].mxu1  ;;  %v3286_v41 = vpop.f32.mrb[108].mxu0 }
 0x208   : > { %v3223_v55 = vpop.f32.mrb[77].mxu1  ;;  %v3287_v24 = vpop.f32.mrb[109].mxu0 }
 0x209   : > { %v3224_v56 = vadd.f32 %v3223_v55, %v3222_v23  ;;  %v3225_v58 = vpop.f32.mrb[78].mxu1  ;;  %v3288_v60 = vadd.f32 %v3287_v24, %v3286_v41  ;;  %v3289_v1 = vpop.f32.mrb[110].mxu0 }
 0x20a   : > { %v3226_v62 = vpop.f32.mrb[79].mxu1  ;;  %v3290_v46 = vpop.f32.mrb[111].mxu0 }
 0x20b   : > { %v2084_v63 = vadd.f32 %v3224_v56, %v4468_v2  ;;  %v3227_v59 = vadd.f32 %v3226_v62, %v3225_v58  ;;  %v3291_v4 = vadd.f32 %v3290_v46, %v3289_v1 }
 0x20d   : > { %v2087_v3 = vadd.f32 %v3227_v59, %v4468_v2  ;;  %v4502_v26 = vadd.f32 %v3288_v60, %v2084_v63 }
 0x20f   : > { %v4504_v5 = vadd.f32 %v3291_v4, %v2087_v3  ;;  %v3228_v18 = vpop.f32.mrb[80].mxu1  ;;  %v3292_v20 = vpop.f32.mrb[112].mxu0 }
 0x210   : > { %v3229_v6 = vpop.f32.mrb[81].mxu1  ;;  %v3293_v8 = vpop.f32.mrb[113].mxu0 }
 0x211   : > { %v3230_v7 = vadd.f32 %v3229_v6, %v3228_v18  ;;  %v3231_v17 = vpop.f32.mrb[82].mxu1  ;;  %v3294_v11 = vadd.f32 %v3293_v8, %v3292_v20  ;;  %v3295_v61 = vpop.f32.mrb[114].mxu0 }
 0x212   : > { %v3232_v19 = vpop.f32.mrb[83].mxu1  ;;  %v3296_v13 = vpop.f32.mrb[115].mxu0 }
 0x213   : > { %v2092_v9 = vadd.f32 %v3230_v7, %v4468_v2  ;;  %v3233_v57 = vadd.f32 %v3232_v19, %v3231_v17  ;;  %v3297_v16 = vadd.f32 %v3296_v13, %v3295_v61 }
 0x215   : > { %v2095_v14 = vadd.f32 %v3233_v57, %v4468_v2  ;;  %v4508_v15 = vadd.f32 %v3294_v11, %v2092_v9 }
 0x217   : > { %v4510_v21 = vadd.f32 %v3297_v16, %v2095_v14  ;;  %v3234_v22 = vpop.f32.mrb[84].mxu1  ;;  %v3298_v29 = vpop.f32.mrb[116].mxu0 }
 0x218   : > { %v3235_v25 = vpop.f32.mrb[85].mxu1  ;;  %v3299_v31 = vpop.f32.mrb[117].mxu0 }
 0x219   : > { %v3236_v27 = vadd.f32 %v3235_v25, %v3234_v22  ;;  %v3237_v28 = vpop.f32.mrb[86].mxu1  ;;  %v3300_v35 = vadd.f32 %v3299_v31, %v3298_v29  ;;  %v3301_v36 = vpop.f32.mrb[118].mxu0  ;;  %v3778_v31 = vld [vmem:[%s4704_s7 + $0x8] sm:$0xff]  }
 0x21a   : > { %v3238_v30 = vpop.f32.mrb[87].mxu1  ;;  %v3302_v38 = vpop.f32.mrb[119].mxu0 }
 0x21b   : > { %v2100_v32 = vadd.f32 %v3236_v27, %v4468_v2  ;;  %v3239_v33 = vadd.f32 %v3238_v30, %v3237_v28  ;;  %v3303_v42 = vadd.f32 %v3302_v38, %v3301_v36 }
 0x21d   : > { %v2103_v39 = vadd.f32 %v3239_v33, %v4468_v2  ;;  %v4514_v40 = vadd.f32 %v3300_v35, %v2100_v32 }
 0x21f   : > { %v4516_v43 = vadd.f32 %v3303_v42, %v2103_v39  ;;  %v3240_v44 = vpop.f32.mrb[88].mxu1  ;;  %v3304_v48 = vpop.f32.mrb[120].mxu0  ;;  %v3779_v39 = vld [vmem:[%s4704_s7 + $0x10] sm:$0xff]  }
 0x220   : > { %v3241_v45 = vpop.f32.mrb[89].mxu1  ;;  %v3305_v50 = vpop.f32.mrb[121].mxu0 }
 0x221   : > { %v3242_v0 = vadd.f32 %v3241_v45, %v3240_v44  ;;  %v3243_v47 = vpop.f32.mrb[90].mxu1  ;;  %v3306_v23 = vadd.f32 %v3305_v50, %v3304_v48  ;;  %v3307_v55 = vpop.f32.mrb[122].mxu0 }
 0x222   : > { %v3244_v49 = vpop.f32.mrb[91].mxu1  ;;  %v3308_v56 = vpop.f32.mrb[123].mxu0 }
 0x223   : > { %v2108_v51 = vadd.f32 %v3242_v0, %v4468_v2  ;;  %v3245_v53 = vadd.f32 %v3244_v49, %v3243_v47  ;;  %v3309_v62 = vadd.f32 %v3308_v56, %v3307_v55 }
 0x225   : > { %v2111_v58 = vadd.f32 %v3245_v53, %v4468_v2  ;;  %v4520_v41 = vadd.f32 %v3306_v23, %v2108_v51  ;;  %v3780_v53 = vld [vmem:[%s4704_s7 + $0x18] sm:$0xff]  }
 0x227   : > { %v4522_v24 = vadd.f32 %v3309_v62, %v2111_v58  ;;  %v3246_v63 = vpop.f32.mrb[92].mxu1 }
 0x228   : > { %v3247_v59 = vpop.f32.mrb[93].mxu1  ;;  %v3310_v46 = vpop.f32.mrb[124].mxu0 }
 0x229   : > { %v3248_v60 = vadd.f32 %v3247_v59, %v3246_v63  ;;  %v3249_v1 = vpop.f32.mrb[94].mxu1  ;;  %v3311_v4 = vpop.f32.mrb[125].mxu0 }
 0x22a   : > { %v3250_v3 = vpop.f32.mrb[95].mxu1  ;;  %v3312_v7 = vadd.f32 %v3311_v4, %v3310_v46  ;;  %v3313_v17 = vpop.f32.mrb[126].mxu0 }
 0x22b   : > { %v2116_v18 = vadd.f32 %v3248_v60, %v4468_v2  ;;  %v3251_v6 = vadd.f32 %v3250_v3, %v3249_v1  ;;  %v3314_v20 = vpop.f32.mrb[127].mxu0 }
 0x22c   : > { %v3315_v9 = vadd.f32 %v3314_v20, %v3313_v17  ;;  %v3782_v17 = vld [vmem:[%s4704_s7 + $0x28] sm:$0xff]  }
 0x22d   : > { %v2119_v19 = vadd.f32 %v3251_v6, %v4468_v2  ;;  %v4526_v8 = vadd.f32 %v3312_v7, %v2116_v18  ;;  %v3777_v2 = vld [vmem:[%s4704_s7] sm:$0xff]  }
 0x22e   : > { %3572 = vmatprep.subr.bf16.mxu1 %v3777_v2 }
 0x22f   : > { %v4528_v57 = vadd.f32 %v3315_v9, %v2119_v19  ;;  %v3332_v11 = vpop.f32.mrb[96].mxu1  ;;  %3573 = vmatpush3.bf16.msra.mxu1 %v3777_v2 }
 0x230   : > { %v3333_v61 = vpop.f32.mrb[97].mxu1  ;;  %v3396_v16 = vpop.f32.mrb[128].mxu0  ;;  %3574 = vmatprep.subr.bf16.mxu1 %v3778_v31 }
 0x231   : > { %v3334_v13 = vadd.f32 %v3333_v61, %v3332_v11  ;;  %v3335_v14 = vpop.f32.mrb[98].mxu1  ;;  %v3397_v25 = vpop.f32.mrb[129].mxu0 }
 0x232   : > { %v3336_v22 = vpop.f32.mrb[99].mxu1  ;;  %v3398_v29 = vadd.f32 %v3397_v25, %v3396_v16  ;;  %v3399_v30 = vpop.f32.mrb[130].mxu0 }
 0x233   : > { %v2254_v27 = vadd.f32 %v3334_v13, %v4475_v10  ;;  %v3337_v28 = vadd.f32 %v3336_v22, %v3335_v14  ;;  %v3400_v32 = vpop.f32.mrb[131].mxu0  ;;  %3575 = vmatpush3.bf16.msra.mxu1 %v3778_v31 }
 0x234   : > { %v3401_v36 = vadd.f32 %v3400_v32, %v3399_v30  ;;  %3576 = vmatprep.subr.bf16.mxu1 %v3779_v39 }
 0x235   : > { %v2257_v33 = vadd.f32 %v3337_v28, %v4480_v12  ;;  %v4538_v35 = vadd.f32 %v3398_v29, %v2254_v27 }
 0x237   : > { %v4540_v10 = vadd.f32 %v3401_v36, %v2257_v33  ;;  %v3338_v38 = vpop.f32.mrb[100].mxu1  ;;  %3577 = vmatpush3.bf16.msra.mxu1 %v3779_v39 }
 0x238   : > { %v3339_v42 = vpop.f32.mrb[101].mxu1  ;;  %v3402_v0 = vpop.f32.mrb[132].mxu0  ;;  %3578 = vmatprep.subr.bf16.mxu1 %v3780_v53 }
 0x239   : > { %v3340_v44 = vadd.f32 %v3339_v42, %v3338_v38  ;;  %v3341_v45 = vpop.f32.mrb[102].mxu1  ;;  %v3403_v48 = vpop.f32.mrb[133].mxu0 }
 0x23a   : > { %v3342_v47 = vpop.f32.mrb[103].mxu1  ;;  %v3404_v50 = vadd.f32 %v3403_v48, %v3402_v0  ;;  %v3405_v51 = vpop.f32.mrb[134].mxu0 }
 0x23b   : > { %v2262_v12 = vadd.f32 %v3340_v44, %v4487_v34  ;;  %v3343_v49 = vadd.f32 %v3342_v47, %v3341_v45  ;;  %v3406_v23 = vpop.f32.mrb[135].mxu0  ;;  %v3781_v34 = vld [vmem:[%s4704_s7 + $0x20] sm:$0xff]   ;;  %3579 = vmatpush3.bf16.msra.mxu1 %v3780_v53 }
 0x23c   : > { %v3407_v58 = vadd.f32 %v3406_v23, %v3405_v51  ;;  %3580 = vmatprep.subr.bf16.mxu1 %v3781_v34 }
 0x23d   : > { %v2265_v55 = vadd.f32 %v3343_v49, %v4492_v37  ;;  %v4550_v56 = vadd.f32 %v3404_v50, %v2262_v12 }
 0x23f   : > { %v4552_v62 = vadd.f32 %v3407_v58, %v2265_v55  ;;  %v3344_v63 = vpop.f32.mrb[104].mxu1  ;;  %3581 = vmatpush3.bf16.msra.mxu1 %v3781_v34 }
 0x240   : > { %v3345_v59 = vpop.f32.mrb[105].mxu1  ;;  %v3408_v46 = vpop.f32.mrb[136].mxu0  ;;  %3582 = vmatprep.subr.bf16.mxu1 %v3782_v17 }
 0x241   : > { %v3346_v60 = vadd.f32 %v3345_v59, %v3344_v63  ;;  %v3347_v1 = vpop.f32.mrb[106].mxu1  ;;  %v3409_v4 = vpop.f32.mrb[137].mxu0 }
 0x242   : > { %v3348_v3 = vpop.f32.mrb[107].mxu1  ;;  %v3410_v6 = vadd.f32 %v3409_v4, %v3408_v46  ;;  %v3411_v7 = vpop.f32.mrb[138].mxu0 }
 0x243   : > { %v2270_v37 = vadd.f32 %v3346_v60, %v4496_v52  ;;  %v3349_v18 = vadd.f32 %v3348_v3, %v3347_v1  ;;  %v3412_v20 = vpop.f32.mrb[139].mxu0  ;;  %3583 = vmatpush3.bf16.msra.mxu1 %v3782_v17 }
 0x244   : > { %v3413_v11 = vadd.f32 %v3412_v20, %v3411_v7 }
 0x245   : > { %v2273_v19 = vadd.f32 %v3349_v18, %v4498_v54  ;;  %v4562_v9 = vadd.f32 %v3410_v6, %v2270_v37 }
 0x247   : > { %v4564_v61 = vadd.f32 %v3413_v11, %v2273_v19  ;;  %v3350_v13 = vpop.f32.mrb[108].mxu1 }
 0x248   : > { %v3351_v52 = vpop.f32.mrb[109].mxu1  ;;  %v3414_v22 = vpop.f32.mrb[140].mxu0 }
 0x249   : > { %v3352_v14 = vadd.f32 %v3351_v52, %v3350_v13  ;;  %v3353_v16 = vpop.f32.mrb[110].mxu1  ;;  %v3415_v27 = vpop.f32.mrb[141].mxu0 }
 0x24a   : > { %v3354_v25 = vpop.f32.mrb[111].mxu1  ;;  %v3416_v30 = vadd.f32 %v3415_v27, %v3414_v22  ;;  %v3417_v54 = vpop.f32.mrb[142].mxu0 }
 0x24b   : > { %v2278_v28 = vadd.f32 %v3352_v14, %v4502_v26  ;;  %v3355_v29 = vadd.f32 %v3354_v25, %v3353_v16  ;;  %v3418_v2 = vpop.f32.mrb[143].mxu0 }
 0x24c   : > { %v3419_v33 = vadd.f32 %v3418_v2, %v3417_v54 }
 0x24d   : > { %v2281_v31 = vadd.f32 %v3355_v29, %v4504_v5  ;;  %v4568_v32 = vadd.f32 %v3416_v30, %v2278_v28 }
 0x24f   : > { %v4570_v36 = vadd.f32 %v3419_v33, %v2281_v31  ;;  %v3356_v38 = vpop.f32.mrb[112].mxu1 }
 0x250   : > { %v3357_v39 = vpop.f32.mrb[113].mxu1  ;;  %v3420_v45 = vpop.f32.mrb[144].mxu0 }
 0x251   : > { %v3358_v42 = vadd.f32 %v3357_v39, %v3356_v38  ;;  %v3359_v44 = vpop.f32.mrb[114].mxu1  ;;  %v3421_v47 = vpop.f32.mrb[145].mxu0 }
 0x252   : > { %v3360_v0 = vpop.f32.mrb[115].mxu1  ;;  %v3422_v12 = vadd.f32 %v3421_v47, %v3420_v45  ;;  %v3423_v49 = vpop.f32.mrb[146].mxu0 }
 0x253   : > { %v2286_v26 = vadd.f32 %v3358_v42, %v4508_v15  ;;  %v3361_v48 = vadd.f32 %v3360_v0, %v3359_v44  ;;  %v3424_v50 = vpop.f32.mrb[147].mxu0 }
 0x254   : > { %v3425_v53 = vadd.f32 %v3424_v50, %v3423_v49 }
 0x255   : > { %v2289_v5 = vadd.f32 %v3361_v48, %v4510_v21  ;;  %v4574_v51 = vadd.f32 %v3422_v12, %v2286_v26 }
 0x257   : > { %v4576_v23 = vadd.f32 %v3425_v53, %v2289_v5  ;;  %v3362_v55 = vpop.f32.mrb[116].mxu1 }
 0x258   : > { %v3363_v58 = vpop.f32.mrb[117].mxu1  ;;  %v3426_v59 = vpop.f32.mrb[148].mxu0 }
 0x259   : > { %v3364_v63 = vadd.f32 %v3363_v58, %v3362_v55  ;;  %v3365_v34 = vpop.f32.mrb[118].mxu1  ;;  %v3427_v1 = vpop.f32.mrb[149].mxu0 }
 0x25a   : > { %v3366_v60 = vpop.f32.mrb[119].mxu1  ;;  %v3428_v3 = vadd.f32 %v3427_v1, %v3426_v59  ;;  %v3429_v4 = vpop.f32.mrb[150].mxu0 }
 0x25b   : > { %v2294_v15 = vadd.f32 %v3364_v63, %v4514_v40  ;;  %v3367_v46 = vadd.f32 %v3366_v60, %v3365_v34  ;;  %v3430_v37 = vpop.f32.mrb[151].mxu0 }
 0x25c   : > { %v3431_v6 = vadd.f32 %v3430_v37, %v3429_v4 }
 0x25d   : > { %v2297_v21 = vadd.f32 %v3367_v46, %v4516_v43  ;;  %v4580_v18 = vadd.f32 %v3428_v3, %v2294_v15 }
 0x25f   : > { %v4582_v7 = vadd.f32 %v3431_v6, %v2297_v21  ;;  %v3368_v17 = vpop.f32.mrb[120].mxu1 }
 0x260   : > { %v3369_v20 = vpop.f32.mrb[121].mxu1  ;;  %v3432_v13 = vpop.f32.mrb[152].mxu0 }
 0x261   : > { %v3370_v19 = vadd.f32 %v3369_v20, %v3368_v17  ;;  %v3371_v11 = vpop.f32.mrb[122].mxu1  ;;  %v3433_v14 = vpop.f32.mrb[153].mxu0 }
 0x262   : > { %v3372_v52 = vpop.f32.mrb[123].mxu1  ;;  %v3434_v22 = vadd.f32 %v3433_v14, %v3432_v13  ;;  %v3435_v25 = vpop.f32.mrb[154].mxu0 }
 0x263   : > { %v2302_v40 = vadd.f32 %v3370_v19, %v4520_v41  ;;  %v3373_v16 = vadd.f32 %v3372_v52, %v3371_v11  ;;  %v3436_v27 = vpop.f32.mrb[155].mxu0 }
 0x264   : > { %v3437_v29 = vadd.f32 %v3436_v27, %v3435_v25 }
 0x265   : > { %v2305_v43 = vadd.f32 %v3373_v16, %v4522_v24  ;;  %v4586_v28 = vadd.f32 %v3434_v22, %v2302_v40 }
 0x267   : > { %v4588_v30 = vadd.f32 %v3437_v29, %v2305_v43  ;;  %v3374_v54 = vpop.f32.mrb[124].mxu1 }
 0x268   : > { %v3375_v2 = vpop.f32.mrb[125].mxu1  ;;  %v3438_v38 = vpop.f32.mrb[156].mxu0 }
 0x269   : > { %v3376_v31 = vadd.f32 %v3375_v2, %v3374_v54  ;;  %v3377_v33 = vpop.f32.mrb[126].mxu1  ;;  %v3439_v42 = vpop.f32.mrb[157].mxu0 }
 0x26a   : > { %v3378_v39 = vpop.f32.mrb[127].mxu1  ;;  %v3440_v45 = vadd.f32 %v3439_v42, %v3438_v38  ;;  %v3441_v0 = vpop.f32.mrb[158].mxu0 }
 0x26b   : > { %v2310_v41 = vadd.f32 %v3376_v31, %v4526_v8  ;;  %v3379_v44 = vadd.f32 %v3378_v39, %v3377_v33  ;;  %v3442_v47 = vpop.f32.mrb[159].mxu0 }
 0x26c   : > { %v3443_v48 = vadd.f32 %v3442_v47, %v3441_v0 }
 0x26d   : > { %v2313_v24 = vadd.f32 %v3379_v44, %v4528_v57  ;;  %v4592_v26 = vadd.f32 %v3440_v45, %v2310_v41 }
 0x26f   : > { %v4594_v12 = vadd.f32 %v3443_v48, %v2313_v24  ;;  %v3460_v49 = vpop.f32.mrb[128].mxu1 }
 0x270   : > { %v3461_v50 = vpop.f32.mrb[129].mxu1 }
 0x271   : > { %v3462_v5 = vadd.f32 %v3461_v50, %v3460_v49  ;;  %v3463_v53 = vpop.f32.mrb[130].mxu1 }
 0x272   : > { %v3464_v55 = vpop.f32.mrb[131].mxu1 }
 0x273   : > { %v2448_v58 = vadd.f32 %v3462_v5, %v4538_v35  ;;  %v3465_v63 = vadd.f32 %v3464_v55, %v3463_v53 }
 0x275   : > { %v2451_v8 = vadd.f32 %v3465_v63, %v4540_v10  ;;  %v2510_v34 = vmax.f32 %v2448_v58, 0.0 }
 0x277   : > { %v2511_v59 = vmax.f32 %v2451_v8, 0.0  ;;  %v3466_v60 = vpop.f32.mrb[132].mxu1 }
 0x278   : > { %v3467_v1 = vpop.f32.mrb[133].mxu1 }
 0x279   : > { %v3468_v57 = vadd.f32 %v3467_v1, %v3466_v60  ;;  %v3469_v15 = vpop.f32.mrb[134].mxu1  ;;  %v2526_v46 = vpack.c.bf16 %v2511_v59, %v2510_v34 }
 0x27a   : > { %v3470_v3 = vpop.f32.mrb[135].mxu1 }
 0x27b   : > { %v2456_v4 = vadd.f32 %v3468_v57, %v4550_v56  ;;  %v3471_v37 = vadd.f32 %v3470_v3, %v3469_v15  ;;  %3556 = vmatprep.mubr.bf16.mxu0 %v2526_v46 }
 0x27d   : > { %v2459_v21 = vadd.f32 %v3471_v37, %v4552_v62  ;;  %v2512_v6 = vmax.f32 %v2456_v4, 0.0 }
 0x27f   : > { %v2513_v17 = vmax.f32 %v2459_v21, 0.0  ;;  %v3472_v35 = vpop.f32.mrb[136].mxu1 }
 0x280   : > { %v3473_v20 = vpop.f32.mrb[137].mxu1 }
 0x281   : > { %v2527_v19 = vpack.c.bf16 %v2513_v17, %v2512_v6  ;;  %v3474_v10 = vadd.f32 %v3473_v20, %v3472_v35  ;;  %v3475_v11 = vpop.f32.mrb[138].mxu1 }
 0x282   : > { %v3476_v13 = vpop.f32.mrb[139].mxu1 }
 0x283   : > { %v2464_v52 = vadd.f32 %v3474_v10, %v4562_v9  ;;  %v3477_v14 = vadd.f32 %v3476_v13, %v3475_v11  ;;  %3557 = vmatmul.mubr.bf16.vlgmr.msra.gmra.mrb[160].mxu0 %v2527_v19 }
 0x285   : > { %v2467_v40 = vadd.f32 %v3477_v14, %v4564_v61  ;;  %v2514_v16 = vmax.f32 %v2464_v52, 0.0  ;;  %v3784_v52 = vld [vmem:[%s4704_s7 + $0x38] sm:$0xff]  }
 0x287   : > { %v2515_v56 = vmax.f32 %v2467_v40, 0.0  ;;  %v3478_v22 = vpop.f32.mrb[140].mxu1 }
 0x288   : > { %v3479_v25 = vpop.f32.mrb[141].mxu1 }
 0x289   : > { %v3480_v27 = vadd.f32 %v3479_v25, %v3478_v22  ;;  %v3481_v62 = vpop.f32.mrb[142].mxu1  ;;  %v2528_v43 = vpack.c.bf16 %v2515_v56, %v2514_v16 }
 0x28a   : > { %v3482_v29 = vpop.f32.mrb[143].mxu1 }
 0x28b   : > { %v2472_v54 = vadd.f32 %v3480_v27, %v4568_v32  ;;  %v3483_v2 = vadd.f32 %v3482_v29, %v3481_v62  ;;  %3560 = vmatprep.mubr.bf16.mxu0 %v2528_v43 }
 0x28d   : > { %v2475_v31 = vadd.f32 %v3483_v2, %v4570_v36  ;;  %v2516_v33 = vmax.f32 %v2472_v54, 0.0 }
 0x28f   : > { %v2517_v9 = vmax.f32 %v2475_v31, 0.0  ;;  %v3484_v38 = vpop.f32.mrb[144].mxu1 }
 0x290   : > { %v3485_v39 = vpop.f32.mrb[145].mxu1 }
 0x291   : > { %v3486_v42 = vadd.f32 %v3485_v39, %v3484_v38  ;;  %v3487_v61 = vpop.f32.mrb[146].mxu1  ;;  %v2529_v41 = vpack.c.bf16 %v2517_v9, %v2516_v33 }
 0x292   : > { %v3488_v44 = vpop.f32.mrb[147].mxu1 }
 0x293   : > { %v2480_v45 = vadd.f32 %v3486_v42, %v4574_v51  ;;  %v3489_v0 = vadd.f32 %v3488_v44, %v3487_v61  ;;  %3561 = vmatmul.mubr.bf16.gmra.mrb[164].mxu0 %v2529_v41 }
 0x295   : > { %v2483_v47 = vadd.f32 %v3489_v0, %v4576_v23  ;;  %v2518_v24 = vmax.f32 %v2480_v45, 0.0 }
 0x297   : > { %v2519_v32 = vmax.f32 %v2483_v47, 0.0  ;;  %v3490_v48 = vpop.f32.mrb[148].mxu1 }
 0x298   : > { %v3491_v49 = vpop.f32.mrb[149].mxu1 }
 0x299   : > { %v3492_v50 = vadd.f32 %v3491_v49, %v3490_v48  ;;  %v3493_v36 = vpop.f32.mrb[150].mxu1  ;;  %v2530_v5 = vpack.c.bf16 %v2519_v32, %v2518_v24 }
 0x29a   : > { %v3494_v53 = vpop.f32.mrb[151].mxu1 }
 0x29b   : > { %v2488_v55 = vadd.f32 %v3492_v50, %v4580_v18  ;;  %v3495_v58 = vadd.f32 %v3494_v53, %v3493_v36  ;;  %3564 = vmatprep.mubr.bf16.mxu0 %v2530_v5 }
 0x29d   : > { %v2491_v63 = vadd.f32 %v3495_v58, %v4582_v7  ;;  %v2520_v8 = vmax.f32 %v2488_v55, 0.0 }
 0x29f   : > { %v2521_v51 = vmax.f32 %v2491_v63, 0.0  ;;  %v3496_v34 = vpop.f32.mrb[152].mxu1 }
 0x2a0   : > { %v3497_v59 = vpop.f32.mrb[153].mxu1 }
 0x2a1   : > { %v3498_v60 = vadd.f32 %v3497_v59, %v3496_v34  ;;  %v3499_v23 = vpop.f32.mrb[154].mxu1  ;;  %v2531_v1 = vpack.c.bf16 %v2521_v51, %v2520_v8 }
 0x2a2   : > { %v3500_v57 = vpop.f32.mrb[155].mxu1 }
 0x2a3   : > { %v2496_v15 = vadd.f32 %v3498_v60, %v4586_v28  ;;  %v3501_v46 = vadd.f32 %v3500_v57, %v3499_v23  ;;  %3565 = vmatmul.mubr.bf16.gmra.mrb[168].mxu0 %v2531_v1 }
 0x2a5   : > { %v2499_v3 = vadd.f32 %v3501_v46, %v4588_v30  ;;  %v2522_v4 = vmax.f32 %v2496_v15, 0.0  ;;  %v3783_v30 = vld [vmem:[%s4704_s7 + $0x30] sm:$0xff]  }
 0x2a6   : > { %3584 = vmatprep.subr.bf16.mxu1 %v3783_v30 }
 0x2a7   : > { %v2523_v18 = vmax.f32 %v2499_v3, 0.0  ;;  %v3502_v37 = vpop.f32.mrb[156].mxu1  ;;  %3585 = vmatpush3.bf16.msra.mxu1 %v3783_v30 }
 0x2a8   : > { %v3503_v21 = vpop.f32.mrb[157].mxu1  ;;  %3586 = vmatprep.subr.bf16.mxu1 %v3784_v52 }
 0x2a9   : > { %v3504_v6 = vadd.f32 %v3503_v21, %v3502_v37  ;;  %v3505_v7 = vpop.f32.mrb[158].mxu1  ;;  %v2532_v17 = vpack.c.bf16 %v2523_v18, %v2522_v4 }
 0x2aa   : > { %v3506_v35 = vpop.f32.mrb[159].mxu1 }
 0x2ab   : > { %v2504_v20 = vadd.f32 %v3504_v6, %v4592_v26  ;;  %v3507_v19 = vadd.f32 %v3506_v35, %v3505_v7  ;;  %3568 = vmatprep.mubr.bf16.mxu0 %v2532_v17  ;;  %3587 = vmatpush3.bf16.msra.mxu1 %v3784_v52  ;;  %v3164_v26 = vld [vmem:[%s4703_s6] ss:$0 sm:$0xff] }
 0x2ad   : > { %v2507_v10 = vadd.f32 %v3507_v19, %v4594_v12  ;;  %v2524_v11 = vmax.f32 %v2504_v20, 0.0  ;;  %v3173_v19 = vld [vmem:[%s4705_s8] ss:$0 sm:$0xff] }
 0x2af   : > { %v2525_v28 = vmax.f32 %v2507_v10, 0.0 }
 0x2b1   : > { %v2533_v13 = vpack.c.bf16 %v2525_v28, %v2524_v11 }
 0x2b3   : > { %3569 = vmatmul.mubr.bf16.gmra.mrb[172].mxu0 %v2533_v13 }
 0x356   : > { %v3558_v12 = vpop.f32.mrb[160].mxu0 }
 0x357   : > { %v2648_v14 = vadd.f32 %v3558_v12, %v3164_v26  ;;  %v2639_v40 = vpop.f32.mrb[161].mxu0 }
 0x358   : > { %v2640_v16 = vadd.f32 %v3164_v26, %v2639_v40  ;;  %v3559_v56 = vpop.f32.mrb[162].mxu0 }
 0x359   : > { %v2651_v22 = vadd.f32 %v3559_v56, %v3164_v26  ;;  %v2642_v25 = vpop.f32.mrb[163].mxu0  ;;  %v2704_v62 = vmax.f32 %v2648_v14, 0.0 }
 0x35a   : > { %v2643_v27 = vadd.f32 %v3164_v26, %v2642_v25  ;;  %v2702_v29 = vmax.f32 %v2640_v16, 0.0 }
 0x35b   : > { %v2705_v43 = vmax.f32 %v2651_v22, 0.0 }
 0x35c   : > { %v2703_v54 = vmax.f32 %v2643_v27, 0.0 }
 0x35d   : > { %v2719_v2 = vpack.c.bf16 %v2705_v43, %v2704_v62 }
 0x35e   : > { %v2718_v31 = vpack.c.bf16 %v2703_v54, %v2702_v29 }
 0x360   : > { %3588 = vmatprep.mubr.bf16.mxu1 %v2718_v31 }
 0x361   : > { %3589 = vmatmul.mubr.bf16.vlgmr.msra.gmra.mrb[160].mxu1 %v2719_v2 }
 0x366   : > { %v3562_v33 = vpop.f32.mrb[164].mxu0 }
 0x367   : > { %v2664_v9 = vadd.f32 %v3562_v33, %v3164_v26  ;;  %v2655_v38 = vpop.f32.mrb[165].mxu0 }
 0x368   : > { %v2656_v39 = vadd.f32 %v3164_v26, %v2655_v38  ;;  %v3563_v42 = vpop.f32.mrb[166].mxu0 }
 0x369   : > { %v2667_v61 = vadd.f32 %v3563_v42, %v3164_v26  ;;  %v2658_v41 = vpop.f32.mrb[167].mxu0  ;;  %v2708_v45 = vmax.f32 %v2664_v9, 0.0 }
 0x36a   : > { %v2659_v44 = vadd.f32 %v3164_v26, %v2658_v41  ;;  %v2706_v47 = vmax.f32 %v2656_v39, 0.0 }
 0x36b   : > { %v2709_v0 = vmax.f32 %v2667_v61, 0.0 }
 0x36c   : > { %v2707_v24 = vmax.f32 %v2659_v44, 0.0 }
 0x36d   : > { %v2721_v32 = vpack.c.bf16 %v2709_v0, %v2708_v45 }
 0x36e   : > { %v2720_v48 = vpack.c.bf16 %v2707_v24, %v2706_v47 }
 0x370   : > { %3592 = vmatprep.mubr.bf16.mxu1 %v2720_v48 }
 0x371   : > { %3593 = vmatmul.mubr.bf16.gmra.mrb[164].mxu1 %v2721_v32 }
 0x376   : > { %v3566_v49 = vpop.f32.mrb[168].mxu0 }
 0x377   : > { %v2680_v50 = vadd.f32 %v3566_v49, %v3164_v26  ;;  %v2671_v36 = vpop.f32.mrb[169].mxu0 }
 0x378   : > { %v2672_v5 = vadd.f32 %v3164_v26, %v2671_v36  ;;  %v3567_v53 = vpop.f32.mrb[170].mxu0 }
 0x379   : > { %v2683_v55 = vadd.f32 %v3567_v53, %v3164_v26  ;;  %v2674_v58 = vpop.f32.mrb[171].mxu0  ;;  %v2712_v8 = vmax.f32 %v2680_v50, 0.0 }
 0x37a   : > { %v2675_v63 = vadd.f32 %v3164_v26, %v2674_v58  ;;  %v2710_v34 = vmax.f32 %v2672_v5, 0.0 }
 0x37b   : > { %v2713_v51 = vmax.f32 %v2683_v55, 0.0 }
 0x37c   : > { %v2711_v59 = vmax.f32 %v2675_v63, 0.0 }
 0x37d   : > { %v2723_v60 = vpack.c.bf16 %v2713_v51, %v2712_v8 }
 0x37e   : > { %v2722_v23 = vpack.c.bf16 %v2711_v59, %v2710_v34 }
 0x380   : > { %3596 = vmatprep.mubr.bf16.mxu1 %v2722_v23 }
 0x381   : > { %3597 = vmatmul.mubr.bf16.gmra.mrb[168].mxu1 %v2723_v60 }
 0x386   : > { %v3570_v1 = vpop.f32.mrb[172].mxu0 }
 0x387   : > { %v2696_v57 = vadd.f32 %v3570_v1, %v3164_v26  ;;  %v2687_v15 = vpop.f32.mrb[173].mxu0 }
 0x388   : > { %v2688_v46 = vadd.f32 %v3164_v26, %v2687_v15  ;;  %v3571_v3 = vpop.f32.mrb[174].mxu0 }
 0x389   : > { %v2699_v4 = vadd.f32 %v3571_v3, %v3164_v26  ;;  %v2690_v18 = vpop.f32.mrb[175].mxu0  ;;  %v2716_v21 = vmax.f32 %v2696_v57, 0.0 }
 0x38a   : > { %v2691_v37 = vadd.f32 %v3164_v26, %v2690_v18  ;;  %v2714_v7 = vmax.f32 %v2688_v46, 0.0 }
 0x38b   : > { %v2717_v6 = vmax.f32 %v2699_v4, 0.0 }
 0x38c   : > { %v2715_v17 = vmax.f32 %v2691_v37, 0.0 }
 0x38d   : > { %v2725_v35 = vpack.c.bf16 %v2717_v6, %v2716_v21 }
 0x38e   : > { %v2724_v20 = vpack.c.bf16 %v2715_v17, %v2714_v7 }
 0x390   : > { %3600 = vmatprep.mubr.bf16.mxu1 %v2724_v20 }
 0x391   : > { %3601 = vmatmul.mubr.bf16.gmra.mrb[172].mxu1 %v2725_v35 }
 0x434   : > { %v3590_v10 = vpop.f32.mrb[160].mxu1 }
 0x435   : > { %v2840_v11 = vadd.f32 %v3590_v10, %v3173_v19  ;;  %v2831_v28 = vpop.f32.mrb[161].mxu1 }
 0x436   : > { %v2832_v13 = vadd.f32 %v3173_v19, %v2831_v28  ;;  %v3591_v30 = vpop.f32.mrb[162].mxu1 }
 0x437   : > { %v2896_v52 = vmax.f32 %v2840_v11, 0.0  ;;  %v2843_v26 = vadd.f32 %v3591_v30, %v3173_v19  ;;  %v2834_v12 = vpop.f32.mrb[163].mxu1 }
 0x438   : > { %v2894_v14 = vmax.f32 %v2832_v13, 0.0  ;;  %v2835_v40 = vadd.f32 %v3173_v19, %v2834_v12 }
 0x439   : > { %2912 = vst [vmem:[%s4627_s27 + $0x10] sm:$0xff] %v2896_v52  ;;  %v2897_v16 = vmax.f32 %v2843_v26, 0.0 }
 0x43a   : > { %2910 = vst [vmem:[%s4627_s27] sm:$0xff] %v2894_v14  ;;  %v2895_v56 = vmax.f32 %v2835_v40, 0.0 }
 0x43b   : > { %2913 = vst [vmem:[%s4627_s27 + $0x18] sm:$0xff] %v2897_v16 }
 0x43c   : > { %2911 = vst [vmem:[%s4627_s27 + $0x8] sm:$0xff] %v2895_v56 }
 0x444   : > { %v3594_v22 = vpop.f32.mrb[164].mxu1 }
 0x445   : > { %v2856_v25 = vadd.f32 %v3594_v22, %v3173_v19  ;;  %v2847_v27 = vpop.f32.mrb[165].mxu1 }
 0x446   : > { %v2848_v62 = vadd.f32 %v3173_v19, %v2847_v27  ;;  %v3595_v43 = vpop.f32.mrb[166].mxu1 }
 0x447   : > { %v2900_v29 = vmax.f32 %v2856_v25, 0.0  ;;  %v2859_v54 = vadd.f32 %v3595_v43, %v3173_v19  ;;  %v2850_v2 = vpop.f32.mrb[167].mxu1 }
 0x448   : > { %v2898_v31 = vmax.f32 %v2848_v62, 0.0  ;;  %v2851_v33 = vadd.f32 %v3173_v19, %v2850_v2 }
 0x449   : > { %2916 = vst [vmem:[%s4627_s27 + $0x30] sm:$0xff] %v2900_v29  ;;  %v2901_v9 = vmax.f32 %v2859_v54, 0.0 }
 0x44a   : > { %2914 = vst [vmem:[%s4627_s27 + $0x20] sm:$0xff] %v2898_v31  ;;  %v2899_v38 = vmax.f32 %v2851_v33, 0.0 }
 0x44b   : > { %2917 = vst [vmem:[%s4627_s27 + $0x38] sm:$0xff] %v2901_v9 }
 0x44c   : > { %2915 = vst [vmem:[%s4627_s27 + $0x28] sm:$0xff] %v2899_v38 }
 0x454   : > { %v3598_v39 = vpop.f32.mrb[168].mxu1 }
 0x455   : > { %v2872_v42 = vadd.f32 %v3598_v39, %v3173_v19  ;;  %v2863_v61 = vpop.f32.mrb[169].mxu1 }
 0x456   : > { %v2864_v41 = vadd.f32 %v3173_v19, %v2863_v61  ;;  %v3599_v44 = vpop.f32.mrb[170].mxu1 }
 0x457   : > { %v2904_v45 = vmax.f32 %v2872_v42, 0.0  ;;  %v2875_v0 = vadd.f32 %v3599_v44, %v3173_v19  ;;  %v2866_v47 = vpop.f32.mrb[171].mxu1 }
 0x458   : > { %v2902_v24 = vmax.f32 %v2864_v41, 0.0  ;;  %v2867_v32 = vadd.f32 %v3173_v19, %v2866_v47 }
 0x459   : > { %2920 = vst [vmem:[%s4627_s27 + $0x50] sm:$0xff] %v2904_v45  ;;  %v2905_v48 = vmax.f32 %v2875_v0, 0.0 }
 0x45a   : > { %2918 = vst [vmem:[%s4627_s27 + $0x40] sm:$0xff] %v2902_v24  ;;  %v2903_v49 = vmax.f32 %v2867_v32, 0.0 }
 0x45b   : > { %2921 = vst [vmem:[%s4627_s27 + $0x58] sm:$0xff] %v2905_v48 }
 0x45c   : > { %2919 = vst [vmem:[%s4627_s27 + $0x48] sm:$0xff] %v2903_v49 }
 0x464   : > { %v3602_v50 = vpop.f32.mrb[172].mxu1 }
 0x465   : > { %v2888_v36 = vadd.f32 %v3602_v50, %v3173_v19  ;;  %v2879_v5 = vpop.f32.mrb[173].mxu1 }
 0x466   : > { %v2880_v53 = vadd.f32 %v3173_v19, %v2879_v5  ;;  %v3603_v55 = vpop.f32.mrb[174].mxu1 }
 0x467   : > { %v2908_v58 = vmax.f32 %v2888_v36, 0.0  ;;  %v2891_v63 = vadd.f32 %v3603_v55, %v3173_v19  ;;  %v2882_v8 = vpop.f32.mrb[175].mxu1 }
 0x468   : > { %v2906_v51 = vmax.f32 %v2880_v53, 0.0  ;;  %v2883_v34 = vadd.f32 %v3173_v19, %v2882_v8 }
 0x469   : > { %2924 = vst [vmem:[%s4627_s27 + $0x70] sm:$0xff] %v2908_v58  ;;  %v2909_v59 = vmax.f32 %v2891_v63, 0.0 }
 0x46a   : > { %2922 = vst [vmem:[%s4627_s27 + $0x60] sm:$0xff] %v2906_v51  ;;  %v2907_v60 = vmax.f32 %v2883_v34, 0.0 }
 0x46b   : > { %2925 = vst [vmem:[%s4627_s27 + $0x78] sm:$0xff] %v2909_v59 }
 0x46c   : > { %2923 = vst [vmem:[%s4627_s27 + $0x68] sm:$0xff] %v2907_v60 }
 0x46d   : > { %3826 = shalt.err (!%p3823_p7)
}
 0x46e   : > { %s3827_s21 = scalar_lea.hbm %s4647_s28, 2048  ;;  %s3831_s24 = scalar_lea.hbm %s4706_s9, 4096 }
 0x46f   : > { %p3828_p8 = scmp.ne.s32.totalorder %s4647_s28, %s3827_s21  ;;  %p3832_p1 = scmp.lt.u32.totalorder %s4647_s28, %s4706_s9 }
 0x470   : > { %p3833_p0 = scmp.lt.u32.totalorder %s3831_s24, %s3827_s21  ;;  %p3835_p6 = scmp.lt.u32.totalorder %s3827_s21, %s4647_s28 }
 0x471   : > { %p3829_p11 = pnand %p3828_p8, %p4717_p9 }
 0x472   : > { %p3834_p5 = por %p3833_p0, %p3832_p1 }
 0x473   : > { %p3830_p13 = pneg %p3829_p11 }
 0x474   : > { %p3836_p10 = por %p3835_p6, %p3834_p5 }
 0x476   : > { %p3837_p12 = pnand %p3836_p10, %p3830_p13 }
 0x478   : > { %3840 = shalt.err (!%p3837_p12)
}
 0x479   : > { %s3886_s23 = smov 128   ;;  %s3887_s29 = smov 8  }
 0x47a   : > { %3608 = dma.vmem_to_hbm [thread:$0]  (%p4717_p9), %s4649_s22, 2048, %s4647_s28, %s4656_s13, %s3886_s23, %s3886_s23, %s3887_s29  }
 0x47b PF: > { %p3620_p2 = scmp.ge.s32.totalorder %s3879_s12, 2  ;;  %s2955_s14 = sand.u32 1, %s3867_s30  }
 0x47c   : > { %p4718_p3 = scmp.ne.s32.totalorder %s4711_s20, 0  ;;  %s2956_s16 = scalar_lea.sflag [#allocation4], %s2955_s14 }
 0x47e   : > { %p3615_p4 = pnand %p3620_p2, %p4718_p3 }
 0x480   : > { %3862 = dma.done.wait (!%p3615_p4), %s2956_s16, 2048  }
 0x481   : > { %3864 = vsyncadd (!%p3615_p4), %s2956_s16, 4294965248  ;;  %p20_p7 = scmp.ge.s32.totalorder %s3963_s15, 4   ;;  %s4719_s30 = smov %s3871_s10 }
 0x482   : > { %s4720_s10 = smov %s3875_s11  ;;  %s4721_s11 = smov %s3974_s18 }
 0x483   : > { %s4722_s12 = smov %s3963_s15  ;;  %22 = sbr.rel (!%p20_p7) target bundleno = 4 (0x4), region = 96 }
 0x48a   :  { %2961 = vsyncpa [#allocation3], 1 }
 0x48b   :  { %2963 = vsyncpa [#allocation3 + $0x1], 1 }
 0x48c   :  { %2964 = vsyncpa [#allocation4], 1 }
 0x48d   :  { %2966 = vsyncpa [#allocation4 + $0x1], 1 }

// kernel: tpu_custom_call.1
= control target key start
LH: loop header
LB: loop body
LE: loop exit
PB: predicated region body
PF: predicated region fallthrough
CT: control target
= control target key end

     0   :  { %14 = vsyncpa [#allocation3], 0  ;;  %s4697_s0 = inlined_call_operand.vmem [shape: f32[256,32], index: 0, kind: input, shape index: {}]   ;;  %s4698_s1 = inlined_call_operand.vmem [shape: bf16[32,1280], index: 1, kind: input, shape index: {}]   ;;  %s4699_s2 = inlined_call_operand.vmem [shape: f32[1,1280], index: 2, kind: input, shape index: {}]   ;;  %s4700_s3 = inlined_call_operand.hbm [shape: bf16[1280,128], index: 3, kind: input, shape index: {}]   ;;  %s4701_s4 = inlined_call_operand.vmem [shape: f32[1,128], index: 4, kind: input, shape index: {}]   ;;  %s4702_s5 = inlined_call_operand.vmem [shape: bf16[128,128], index: 5, kind: input, shape index: {}]   ;;  %s4703_s6 = inlined_call_operand.vmem [shape: f32[1,128], index: 6, kind: input, shape index: {}]   ;;  %s4704_s7 = inlined_call_operand.vmem [shape: bf16[128,128], index: 7, kind: input, shape index: {}]   ;;  %s4705_s8 = inlined_call_operand.vmem [shape: f32[1,128], index: 8, kind: input, shape index: {}]   ;;  %s4706_s9 = inlined_call_operand.hbm [shape: f32[256,128], index: 9, kind: output, shape index: {}]  }
   0x1   :  { %15 = vsyncpa [#allocation4], 0 }
   0x2   :  { %17 = vsyncpa [#allocation4 + $0x1], 0  ;;  %s3938_s30 = smov 0   ;;  %s3940_s10 = smov 0  }
   0x3   :  { %s3942_s11 = smov 0   ;;  %s3944_s12 = smov 0  }
   0x4 LB: > { %s3959_s13 = sadd.s32 4294967295, %s3879_s12   ;;  %s3014_s14 = sadd.s32 4294967294, %s3879_s12   ;;  %s3879_s12 = sphi %s3944_s12, %s4722_s12   ;;  %s3875_s11 = sphi %s3942_s11, %s4721_s11   ;;  %s3871_s10 = sphi %s3940_s10, %s4720_s10   ;;  %s3867_s30 = sphi %s3938_s30, %s4719_s30  }
   0x5   : > { %s3963_s15 = sadd.s32 1, %s3879_s12   ;;  %s224_s16 = sadd.s32 1, %s3875_s11 }
   0x6   : > { %s221_s17 = ssub.s32 %s3879_s12, %s3963_s15  ;;  %p234_p0 = scmp.ne.s32.totalorder %s3875_s11, %s3871_s10 }
   0x7   : > { %p222_p1 = scmp.eq.s32.totalorder %s221_s17, 0  ;;  %p235_p2 = scmp.eq.s32.totalorder %s3959_s13, 1 }
   0x8   : > { %p240_p3 = scmp.ne.s32.totalorder %s3871_s10, %s3867_s30  ;;  %p241_p4 = scmp.eq.s32.totalorder %s3014_s14, 1 }
   0x9   : > { %s3974_s18 = scalar_select %p222_p1, %s3875_s11, %s224_s16  }
   0xa   : > { %p3976_p5 = por %p235_p2, %p234_p0  ;;  %p3980_p6 = por %p241_p4, %p240_p3 }
   0xb   : > { %p3015_p7 = scmp.ge.s32.totalorder %s3879_s12, 1  ;;  %p248_p8 = scmp.lt.s32.totalorder %s3879_s12, 3 }
   0xc   : > { %s4710_s19 = scalar_select %p3976_p5, 1, 0 }
   0xd   : > { %s4711_s20 = scalar_select %p3980_p6, 1, 0 }
   0xe   : > { %p4707_p9 = scmp.eq.s32.totalorder %s3959_s13, 0  ;;  %p3987_p10 = pnand %p3015_p7, %p248_p8 }
   0xf   : > { %s3881_s22 = smov [#allocation2]   ;;  %s3785_s27 = scalar_lea.hbm %s4700_s3, 10240 }
  0x10   : > { %s4712_s21 = scalar_select %p3987_p10, 1, 0 }
  0x11   : > { %s266_s23 = sshll.u32 %s3881_s22, 4  ;;  %p3610_p11 = pneg %p3987_p10  ;;  %s267_s23 = int_to_ptr.vmem [resolvable:$true] %s266_s23 }
  0x12   : > { %p3786_p13 = scmp.ne.s32.totalorder %s4700_s3, %s3785_s27  ;;  %p3792_p3 = scmp.lt.u32.totalorder %s3785_s27, %s4700_s3 }
  0x13   : > { %p3995_p12 = pnand %p4707_p9, %p3610_p11 }
  0x15   : > { %p3787_p0 = pneg %p3995_p12 }
  0x17   : > { %p3788_p1 = pnand %p3787_p0, %p3786_p13 }
  0x19   : > { %p3789_p2 = pneg %p3788_p1 }
  0x1b   : > { %p3794_p4 = pnand %p3792_p3, %p3789_p2 }
  0x1d   : > { %3797 = shalt.err (!%p3794_p4)
}
  0x1e   : > { %s3798_s17 = scalar_lea.vmem %s267_s23, 10240  ;;  %p3806_p9 = scmp.lt.s32.totalorder %s267_s23, %s267_s23 }
  0x1f   : > { %p3799_p7 = scmp.ne.s32.totalorder %s267_s23, %s3798_s17  ;;  %p3807_p6 = scmp.lt.s32.totalorder %s3798_s17, %s3798_s17 }
  0x21   : > { %p3801_p8 = pnand %p3799_p7, %p3787_p0  ;;  %p3808_p5 = por %p3807_p6, %p3806_p9 }
  0x23   : > { %p3802_p11 = pneg %p3801_p8 }
  0x25   : > { %p3809_p10 = pnand %p3808_p5, %p3802_p11 }
  0x27   : > { %3812 = shalt.err (!%p3809_p10)
}
  0x28   : > { %s3882_s22 = smov 64   ;;  %s3883_s25 = smov 4  }
  0x29   : > { %3613 = dma.hbm_to_vmem [thread:$0]  (!%p3995_p12), %s4700_s3, 10240, %s267_s23, [#allocation3], %s3882_s22, %s3882_s22, %s3883_s25  }
  0x2a   : > { %p4714_p13 = scmp.ne.s32.totalorder %s4712_s21, 0 }
  0x2b   : > { %p4715_p1 = scmp.eq.s32.totalorder (!%p4714_p13), %s3959_s13, 0 }
  0x2c   : > { %306 = sbr.rel (%p4714_p13) target bundleno = 1147 (0x47b), region = 56 }
  0x33   : > { %3858 = dma.done.wait (%p4715_p1), [#allocation3], 10240   ;;  %p4716_p0 = pmov %p4715_p1 }
  0x34   : > { %s3021_s27 = sshll.u32 %s3959_s13, 4  ;;  %v3884_v0 = vmov 0   ;;  %v3659_v1 = vld [vmem:[%s4698_s1 + $0x4] ss:$40 sps:$4 sm:$0xff]   ;;  %v3661_v2 = vld [vmem:[%s4698_s1] ss:$40 sps:$4 sm:$0xff]  }
  0x35   : > { %3860 = vsyncadd (%p4716_p0), [#allocation3], 4294957056  ;;  %605 = vmatprep.mubr.bf16.mxu0 %v3884_v0  ;;  %p343_p5 = scmp.lt.s32.totalorder %s3021_s27, 31  ;;  %718 = vmatprep.mubr.bf16.mxu1 %v3884_v0  ;;  %v3662_v3 = vld [vmem:[%s4698_s1 + $0xc] ss:$40 sps:$4 sm:$0xff]   ;;  %vm548_vm0 = vcmask 261120  }
  0x36   : > { %573 = vmatprep.subr.bf16.mxu0 %v3659_v1  ;;  %v3664_v4 = vld [vmem:[%s4698_s1 + $0x8] ss:$40 sps:$4 sm:$0xff]   ;;  %v3665_v5 = vld [vmem:[%s4698_s1 + $0x54] ss:$40 sps:$4 sm:$0xff]   ;;  %686 = vmatprep.subr.bf16.mxu1 %v3662_v3  ;;  %v3670_v8 = vld [vmem:[%s4698_s1 + $0x58] ss:$40 sps:$4 sm:$0xff]  }
  0x37   : > { %s4724_s27 = smov (!%p343_p5, %s3021_s27), 31  ;;  %574 = vmatpush1.bf16.msra.mxu0 %v3661_v2  ;;  %v3667_v6 = vld [vmem:[%s4698_s1 + $0x50] ss:$40 sps:$4 sm:$0xff]   ;;  %v3668_v7 = vld [vmem:[%s4698_s1 + $0x5c] ss:$40 sps:$4 sm:$0xff]   ;;  %687 = vmatpush1.bf16.msra.mxu1 %v3664_v4  ;;  %v3691_v46 = vld [vmem:[#allocation2 + $0x48] sm:$0xff]  }
  0x38   : > { %s3022_s24 = sshll.u32 %s4724_s27, 3  ;;  %575 = vmatprep.subr.bf16.mxu0 %v3665_v5  ;;  %688 = vmatprep.subr.bf16.mxu1 %v3668_v7  ;;  %v3671_v12 = vld [vmem:[%s4698_s1 + $0x10] ss:$40 sps:$4 sm:$0xff]   ;;  %v3673_v13 = vld [vmem:[%s4698_s1 + $0x14] ss:$40 sps:$4 sm:$0xff]   ;;  %v3689_v31 = vld [vmem:[#allocation2 + $0x40] sm:$0xff]  }
  0x39   : > { %s4039_s27 = scalar_lea.vmem %s4697_s0, %s3022_s24  ;;  %v3674_v16 = vld [vmem:[%s4698_s1 + $0x60] ss:$40 sps:$4 sm:$0xff]   ;;  %v3676_v17 = vld [vmem:[%s4698_s1 + $0x64] ss:$40 sps:$4 sm:$0xff]   ;;  %v3688_v44 = vld [vmem:[%s4698_s1 + $0x74] ss:$40 sps:$4 sm:$0xff]  }
  0x3a   : > { %v350_v9 = vld [vmem:[%s4039_s27] sm:$0xff]  ;;  %v351_v10 = vld [vmem:[%s4039_s27 + $0x8] sm:$0xff]  ;;  %v352_v14 = vld [vmem:[%s4039_s27 + $0x10] sm:$0xff]  ;;  %s339_s21 = sand.u32 1, %s3871_s10   ;;  %s3187_s24 = sshll.u32 %s3959_s13, 11 }
  0x3b   : > { %v4055_v11 = vpack.c.bf16 %v351_v10, %v350_v9  ;;  %576 = vmatpush1.bf16.msra.mxu0 %v3667_v6  ;;  %689 = vmatpush1.bf16.msra.mxu1 %v3670_v8  ;;  %v353_v15 = vld [vmem:[%s4039_s27 + $0x18] sm:$0xff]  ;;  %v3682_v21 = vld [vmem:[%s4698_s1 + $0x6c] ss:$40 sps:$4 sm:$0xff]   ;;  %v3680_v22 = vld [vmem:[%s4698_s1 + $0x68] ss:$40 sps:$4 sm:$0xff]   ;;  %s3020_s17 = sshll.u32 %s339_s21, 7  ;;  %s4647_s28 = scalar_lea.hbm %s4706_s9, %s3187_s24 }
  0x3c   : > { %799 = vmatprep.subr.bf16.mxu0 %v3673_v13  ;;  %v4077_v18 = vpack.c.bf16 %v353_v15, %v352_v14  ;;  %v3677_v19 = vld [vmem:[%s4698_s1 + $0x18] ss:$40 sps:$4 sm:$0xff]   ;;  %v3679_v20 = vld [vmem:[%s4698_s1 + $0x1c] ss:$40 sps:$4 sm:$0xff]   ;;  %v355_v25 = vld [vmem:[%s4039_s27 + $0x28] sm:$0xff]  ;;  %s4656_s13 = scalar_lea.sflag [#allocation4], %s339_s21 }
  0x3d   : > { %912 = vmatprep.subr.bf16.mxu1 %v3679_v20  ;;  %v3685_v23 = vld [vmem:[%s4698_s1 + $0x24] ss:$40 sps:$4 sm:$0xff]   ;;  %v356_v27 = vld [vmem:[%s4039_s27 + $0x30] sm:$0xff]  ;;  %v357_v28 = vld [vmem:[%s4039_s27 + $0x38] sm:$0xff]  ;;  %p4717_p9 = scmp.ne.s32.totalorder %s4710_s19, 0  ;;  %s3885_s29 = smov [#allocation5]  }
  0x3e   : > { %3043 = vmatmul.mubr.msk.bf16.vlgmr.msra.gmra.mrb[0].mxu0 %vm548_vm0, %v4055_v11  ;;  %3051 = vmatmul.mubr.msk.bf16.vlgmr.msra.gmra.mrb[0].mxu1 %vm548_vm0, %v4055_v11  ;;  %v354_v24 = vld [vmem:[%s4039_s27 + $0x20] sm:$0xff]  ;;  %v4112_v29 = vpack.c.bf16 %v357_v28, %v356_v27  ;;  %v359_v32 = vld [vmem:[%s4039_s27 + $0x48] sm:$0xff]  ;;  %v360_v34 = vld [vmem:[%s4039_s27 + $0x50] sm:$0xff]  ;;  %s3817_s14 = sshll.u32 %s3885_s29, 4  ;;  %s3818_s14 = int_to_ptr.vmem [resolvable:$false] %s3817_s14 }
  0x3f   : > { %800 = vmatpush1.bf16.msra.mxu0 %v3671_v12  ;;  %615 = vmatprep.mubr.bf16.mxu0 %v3884_v0  ;;  %v4102_v26 = vpack.c.bf16 %v355_v25, %v354_v24  ;;  %v358_v30 = vld [vmem:[%s4039_s27 + $0x40] sm:$0xff]  ;;  %v361_v35 = vld [vmem:[%s4039_s27 + $0x58] sm:$0xff]  ;;  %v363_v38 = vld [vmem:[%s4039_s27 + $0x68] sm:$0xff]  ;;  %s3819_s16 = scalar_lea.vmem %s3818_s14, 4096 }
  0x40   : > { %728 = vmatprep.mubr.bf16.mxu1 %v3884_v0  ;;  %801 = vmatprep.subr.bf16.mxu0 %v3676_v17  ;;  %v4122_v33 = vpack.c.bf16 %v359_v32, %v358_v30  ;;  %v4132_v36 = vpack.c.bf16 %v361_v35, %v360_v34  ;;  %v362_v37 = vld [vmem:[%s4039_s27 + $0x60] sm:$0xff]  ;;  %v364_v40 = vld [vmem:[%s4039_s27 + $0x70] sm:$0xff]  ;;  %v365_v41 = vld [vmem:[%s4039_s27 + $0x78] sm:$0xff]  ;;  %s4627_s27 = scalar_lea.vmem [#allocation5], %s3020_s17 }
  0x41   : > { %913 = vmatpush1.bf16.msra.mxu1 %v3677_v19  ;;  %v4142_v39 = vpack.c.bf16 %v363_v38, %v362_v37  ;;  %v4152_v42 = vpack.c.bf16 %v365_v41, %v364_v40  ;;  %v3683_v43 = vld [vmem:[%s4698_s1 + $0x20] ss:$40 sps:$4 sm:$0xff]   ;;  %v3686_v47 = vld [vmem:[%s4698_s1 + $0x70] ss:$40 sps:$4 sm:$0xff]   ;;  %s2940_s22 = sshll.u32 %s4627_s27, 4  ;;  %s4649_s22 = int_to_ptr.vmem [resolvable:$true] %s2940_s22 }
  0x42   : > { %914 = vmatprep.subr.bf16.mxu1 %v3682_v21  ;;  %v3690_v45 = vld [vmem:[#allocation2] sm:$0xff]   ;;  %v3692_v49 = vld [vmem:[#allocation2 + $0x8] sm:$0xff]   ;;  %v3693_v50 = vld [vmem:[#allocation2 + $0x50] sm:$0xff]   ;;  %s3813_s23 = scalar_lea.vmem %s4649_s22, 2048  ;;  %p3820_p2 = scmp.lt.s32.totalorder %s4649_s22, %s3818_s14 }
  0x43   : > { %802 = vmatpush1.bf16.msra.mxu0 %v3674_v16  ;;  %v3699_v48 = vld [vmem:[#allocation2 + $0xc0] sm:$0xff]   ;;  %v3694_v51 = vld [vmem:[#allocation2 + $0x10] sm:$0xff]   ;;  %v3695_v52 = vld [vmem:[#allocation2 + $0x58] sm:$0xff]   ;;  %v398_v16 = vlaneseq  ;;  %p3814_p6 = scmp.ne.s32.totalorder %s4649_s22, %s3813_s23  ;;  %p3821_p3 = scmp.lt.s32.totalorder %s3819_s16, %s3813_s23 }
  0x44   : > { %1025 = vmatprep.subr.bf16.mxu0 %v3685_v23  ;;  %v3696_v53 = vld [vmem:[#allocation2 + $0x18] sm:$0xff]   ;;  %v3697_v54 = vld [vmem:[#allocation2 + $0x60] sm:$0xff]   ;;  %v3703_v56 = vld [vmem:[#allocation2 + $0x68] sm:$0xff]  }
  0x45   : > { %915 = vmatpush1.bf16.msra.mxu1 %v3680_v22  ;;  %v3698_v55 = vld [vmem:[#allocation2 + $0x20] sm:$0xff]   ;;  %v3704_v57 = vld [vmem:[#allocation2 + $0x28] sm:$0xff]   ;;  %v3709_v58 = vld [vmem:[#allocation2 + $0x70] sm:$0xff]   ;;  %v4239_v17 = vshrl.u32 %v398_v16, 7  ;;  %p3815_p10 = pnand %p3814_p6, %p4717_p9  ;;  %p3822_p4 = por %p3821_p3, %p3820_p2 }
  0x46   : > { %3044 = vmatmul.mubr.msk.bf16.gmra.mrb[4].mxu0 %vm548_vm0, %v4077_v18  ;;  %3052 = vmatmul.mubr.msk.bf16.gmra.mrb[4].mxu1 %vm548_vm0, %v4077_v18  ;;  %v3710_v59 = vld [vmem:[#allocation2 + $0x30] sm:$0xff]   ;;  %v3715_v60 = vld [vmem:[#allocation2 + $0x78] sm:$0xff]   ;;  %v3721_v62 = vld [vmem:[#allocation2 + $0x140] sm:$0xff]  }
  0x47   : > { %625 = vmatprep.mubr.bf16.mxu0 %v3884_v0  ;;  %738 = vmatprep.mubr.bf16.mxu1 %v3884_v0  ;;  %v3716_v61 = vld [vmem:[#allocation2 + $0x38] sm:$0xff]   ;;  %v3700_v63 = vld [vmem:[#allocation2 + $0x80] sm:$0xff]   ;;  %v3701_v1 = vld [vmem:[#allocation2 + $0xc8] sm:$0xff]   ;;  %v404_v20 = vsub.s32 1, %v4239_v17  ;;  %v408_v21 = vsub.s32 2, %v4239_v17  ;;  %v412_v22 = vsub.s32 3, %v4239_v17  ;;  %p3816_p12 = pneg %p3815_p10 }
  0x48   : > { %3188 = vmatprep.subr.bf16.mxu1 %v3689_v31  ;;  %v3702_v2 = vld [vmem:[#allocation2 + $0x88] sm:$0xff]   ;;  %v3705_v3 = vld [vmem:[#allocation2 + $0xd0] sm:$0xff]   ;;  %v3707_v5 = vld [vmem:[#allocation2 + $0xd8] sm:$0xff]  }
  0x49   : > { %v3706_v4 = vld [vmem:[#allocation2 + $0x90] sm:$0xff]   ;;  %v3708_v6 = vld [vmem:[#allocation2 + $0x98] sm:$0xff]   ;;  %v3711_v7 = vld [vmem:[#allocation2 + $0xe0] sm:$0xff]   ;;  %p3823_p7 = pnand %p3822_p4, %p3816_p12 }
  0x4a   : > { %v3712_v8 = vld [vmem:[#allocation2 + $0xa0] sm:$0xff]   ;;  %v3713_v9 = vld [vmem:[#allocation2 + $0xe8] sm:$0xff]   ;;  %v3718_v12 = vld [vmem:[#allocation2 + $0xb0] sm:$0xff]  }
  0x4b   : > { %v3714_v10 = vld [vmem:[#allocation2 + $0xa8] sm:$0xff]   ;;  %v3719_v13 = vld [vmem:[#allocation2 + $0xf8] sm:$0xff]   ;;  %v3731_v15 = vld [vmem:[#allocation2 + $0x1c0] sm:$0xff]  }
  0x4c   : > { %v3720_v14 = vld [vmem:[#allocation2 + $0xb8] sm:$0xff]   ;;  %v4245_v19 = vld [vmem:[%s4699_s2] sm:$0xff] }
  0x4d   : > { %v4258_v23 = vrot.slane %v4245_v19, %v404_v20  ;;  %v4261_v24 = vrot.slane %v4245_v19, %v408_v21 }
  0x4e   : > { %3045 = vmatmul.mubr.msk.bf16.gmra.mrb[8].mxu0 %vm548_vm0, %v4102_v26  ;;  %3053 = vmatmul.mubr.msk.bf16.gmra.mrb[8].mxu1 %vm548_vm0, %v4102_v26 }
  0x4f   : > { %635 = vmatprep.mubr.bf16.mxu0 %v3884_v0  ;;  %748 = vmatprep.mubr.bf16.mxu1 %v3884_v0 }
  0x56   : > { %3046 = vmatmul.mubr.msk.bf16.gmra.mrb[12].mxu0 %vm548_vm0, %v4112_v29  ;;  %3054 = vmatmul.mubr.msk.bf16.gmra.mrb[12].mxu1 %vm548_vm0, %v4112_v29 }
  0x57   : > { %645 = vmatprep.mubr.bf16.mxu0 %v3884_v0  ;;  %758 = vmatprep.mubr.bf16.mxu1 %v3884_v0 }
  0x5e   : > { %3047 = vmatmul.mubr.msk.bf16.gmra.mrb[16].mxu0 %vm548_vm0, %v4122_v33  ;;  %3055 = vmatmul.mubr.msk.bf16.gmra.mrb[16].mxu1 %vm548_vm0, %v4122_v33 }
  0x5f   : > { %655 = vmatprep.mubr.bf16.mxu0 %v3884_v0  ;;  %768 = vmatprep.mubr.bf16.mxu1 %v3884_v0 }
  0x66   : > { %3048 = vmatmul.mubr.msk.bf16.gmra.mrb[20].mxu0 %vm548_vm0, %v4132_v36  ;;  %3056 = vmatmul.mubr.msk.bf16.gmra.mrb[20].mxu1 %vm548_vm0, %v4132_v36 }
  0x67   : > { %665 = vmatprep.mubr.bf16.mxu0 %v3884_v0  ;;  %778 = vmatprep.mubr.bf16.mxu1 %v3884_v0 }
  0x6e   : > { %3049 = vmatmul.mubr.msk.bf16.gmra.mrb[24].mxu0 %vm548_vm0, %v4142_v39  ;;  %3057 = vmatmul.mubr.msk.bf16.gmra.mrb[24].mxu1 %vm548_vm0, %v4142_v39 }
  0x6f   : > { %675 = vmatprep.mubr.bf16.mxu0 %v3884_v0  ;;  %788 = vmatprep.mubr.bf16.mxu1 %v3884_v0 }
  0x76   : > { %3050 = vmatmul.mubr.msk.bf16.gmra.mrb[28].mxu0 %vm548_vm0, %v4152_v42  ;;  %3058 = vmatmul.mubr.msk.bf16.gmra.mrb[28].mxu1 %vm548_vm0, %v4152_v42 }
  0x77   : > { %831 = vmatprep.mubr.bf16.mxu0 %v3884_v0  ;;  %944 = vmatprep.mubr.bf16.mxu1 %v3884_v0 }
  0x7e   : > { %3059 = vmatmul.mubr.msk.bf16.vlgmr.msra.gmra.mrb[32].mxu0 %vm548_vm0, %v4055_v11  ;;  %3067 = vmatmul.mubr.msk.bf16.vlgmr.msra.gmra.mrb[32].mxu1 %vm548_vm0, %v4055_v11 }
  0x7f   : > { %1026 = vmatpush1.bf16.msra.mxu0 %v3683_v43  ;;  %841 = vmatprep.mubr.bf16.mxu0 %v3884_v0 }
  0x80   : > { %1027 = vmatprep.subr.bf16.mxu0 %v3688_v44  ;;  %954 = vmatprep.mubr.bf16.mxu1 %v3884_v0 }
  0x81   : > { %3189 = vmatpush3.bf16.msra.mxu1 %v3690_v45 }
  0x82   : > { %3190 = vmatprep.subr.bf16.mxu1 %v3691_v46 }
  0x83   : > { %1028 = vmatpush1.bf16.msra.mxu0 %v3686_v47 }
  0x84   : > { %3252 = vmatprep.subr.bf16.mxu0 %v3699_v48 }
  0x85   : > { %3191 = vmatpush3.bf16.msra.mxu1 %v3692_v49 }
  0x86   : > { %3060 = vmatmul.mubr.msk.bf16.gmra.mrb[36].mxu0 %vm548_vm0, %v4077_v18  ;;  %3192 = vmatprep.subr.bf16.mxu1 %v3693_v50 }
  0x87   : > { %851 = vmatprep.mubr.bf16.mxu0 %v3884_v0  ;;  %3068 = vmatmul.mubr.msk.bf16.gmra.mrb[36].mxu1 %vm548_vm0, %v4077_v18 }
  0x88   : > { %964 = vmatprep.mubr.bf16.mxu1 %v3884_v0 }
  0x89   : > { %3193 = vmatpush3.bf16.msra.mxu1 %v3694_v51 }
  0x8a   : > { %3194 = vmatprep.subr.bf16.mxu1 %v3695_v52 }
  0x8d   : > { %3195 = vmatpush3.bf16.msra.mxu1 %v3696_v53  ;;  %v3722_v53 = vld [vmem:[#allocation2 + $0x100] sm:$0xff]  }
  0x8e   : > { %3061 = vmatmul.mubr.msk.bf16.gmra.mrb[40].mxu0 %vm548_vm0, %v4102_v26  ;;  %3196 = vmatprep.subr.bf16.mxu1 %v3697_v54 }
  0x8f   : > { %861 = vmatprep.mubr.bf16.mxu0 %v3884_v0  ;;  %3069 = vmatmul.mubr.msk.bf16.gmra.mrb[40].mxu1 %vm548_vm0, %v4102_v26 }
  0x90   : > { %974 = vmatprep.mubr.bf16.mxu1 %v3884_v0 }
  0x91   : > { %3197 = vmatpush3.bf16.msra.mxu1 %v3698_v55 }
  0x92   : > { %3198 = vmatprep.subr.bf16.mxu1 %v3703_v56 }
  0x95   : > { %3199 = vmatpush3.bf16.msra.mxu1 %v3704_v57  ;;  %v3723_v57 = vld [vmem:[#allocation2 + $0x148] sm:$0xff]  }
  0x96   : > { %3062 = vmatmul.mubr.msk.bf16.gmra.mrb[44].mxu0 %vm548_vm0, %v4112_v29  ;;  %3200 = vmatprep.subr.bf16.mxu1 %v3709_v58 }
  0x97   : > { %871 = vmatprep.mubr.bf16.mxu0 %v3884_v0  ;;  %3070 = vmatmul.mubr.msk.bf16.gmra.mrb[44].mxu1 %vm548_vm0, %v4112_v29 }
  0x98   : > { %984 = vmatprep.mubr.bf16.mxu1 %v3884_v0 }
  0x99   : > { %3201 = vmatpush3.bf16.msra.mxu1 %v3710_v59 }
  0x9a   : > { %3202 = vmatprep.subr.bf16.mxu1 %v3715_v60 }
  0x9d   : > { %3203 = vmatpush3.bf16.msra.mxu1 %v3716_v61 }
  0x9e   : > { %3063 = vmatmul.mubr.msk.bf16.gmra.mrb[48].mxu0 %vm548_vm0, %v4122_v33  ;;  %3316 = vmatprep.subr.bf16.mxu1 %v3721_v62  ;;  %v3732_v62 = vld [vmem:[#allocation2 + $0x180] sm:$0xff]  }
  0x9f   : > { %881 = vmatprep.mubr.bf16.mxu0 %v3884_v0  ;;  %3071 = vmatmul.mubr.msk.bf16.gmra.mrb[48].mxu1 %vm548_vm0, %v4122_v33 }
  0xa0   : > { %994 = vmatprep.mubr.bf16.mxu1 %v3884_v0 }
  0xa6   : > { %3064 = vmatmul.mubr.msk.bf16.gmra.mrb[52].mxu0 %vm548_vm0, %v4132_v36 }
  0xa7   : > { %891 = vmatprep.mubr.bf16.mxu0 %v3884_v0  ;;  %3072 = vmatmul.mubr.msk.bf16.gmra.mrb[52].mxu1 %vm548_vm0, %v4132_v36 }
  0xa8   : > { %1004 = vmatprep.mubr.bf16.mxu1 %v3884_v0 }
  0xae   : > { %3065 = vmatmul.mubr.msk.bf16.gmra.mrb[56].mxu0 %vm548_vm0, %v4142_v39 }
  0xaf   : > { %901 = vmatprep.mubr.bf16.mxu0 %v3884_v0  ;;  %3073 = vmatmul.mubr.msk.bf16.gmra.mrb[56].mxu1 %vm548_vm0, %v4142_v39 }
  0xb0   : > { %1014 = vmatprep.mubr.bf16.mxu1 %v3884_v0 }
  0xb6   : > { %3066 = vmatmul.mubr.msk.bf16.gmra.mrb[60].mxu0 %vm548_vm0, %v4152_v42 }
  0xb7   : > { %1057 = vmatprep.mubr.bf16.mxu0 %v3884_v0  ;;  %3074 = vmatmul.mubr.msk.bf16.gmra.mrb[60].mxu1 %vm548_vm0, %v4152_v42 }
  0xbe   : > { %3075 = vmatmul.mubr.msk.bf16.vlgmr.msra.gmra.mrb[64].mxu0 %vm548_vm0, %v4055_v11  ;;  %v3717_v11 = vld [vmem:[#allocation2 + $0xf0] sm:$0xff]  }
  0xbf   : > { %1067 = vmatprep.mubr.bf16.mxu0 %v3884_v0  ;;  %3253 = vmatpush3.bf16.msra.mxu0 %v3700_v63 }
  0xc0   : > { %3254 = vmatprep.subr.bf16.mxu0 %v3701_v1 }
  0xc3   : > { %3255 = vmatpush3.bf16.msra.mxu0 %v3702_v2 }
  0xc4   : > { %3256 = vmatprep.subr.bf16.mxu0 %v3705_v3 }
  0xc6   : > { %3076 = vmatmul.mubr.msk.bf16.gmra.mrb[68].mxu0 %vm548_vm0, %v4077_v18  ;;  %v400_v18 = vsub.s32 0, %v4239_v17 }
  0xc7   : > { %1077 = vmatprep.mubr.bf16.mxu0 %v3884_v0  ;;  %3257 = vmatpush3.bf16.msra.mxu0 %v3706_v4  ;;  %v3733_v4 = vld [vmem:[#allocation2 + $0x1c8] sm:$0xff]  }
  0xc8   : > { %3258 = vmatprep.subr.bf16.mxu0 %v3707_v5 }
  0xcb   : > { %3259 = vmatpush3.bf16.msra.mxu0 %v3708_v6 }
  0xcc   : > { %3260 = vmatprep.subr.bf16.mxu0 %v3711_v7 }
  0xce   : > { %3077 = vmatmul.mubr.msk.bf16.gmra.mrb[72].mxu0 %vm548_vm0, %v4102_v26  ;;  %v4264_v26 = vrot.slane %v4245_v19, %v412_v22 }
  0xcf   : > { %1087 = vmatprep.mubr.bf16.mxu0 %v3884_v0  ;;  %3261 = vmatpush3.bf16.msra.mxu0 %v3712_v8  ;;  %v3724_v8 = vld [vmem:[#allocation2 + $0x108] sm:$0xff]  }
  0xd0   : > { %3262 = vmatprep.subr.bf16.mxu0 %v3713_v9 }
  0xd3   : > { %3263 = vmatpush3.bf16.msra.mxu0 %v3714_v10 }
  0xd4   : > { %3264 = vmatprep.subr.bf16.mxu0 %v3717_v11 }
  0xd6   : > { %3078 = vmatmul.mubr.msk.bf16.gmra.mrb[76].mxu0 %vm548_vm0, %v4112_v29 }
  0xd7   : > { %1097 = vmatprep.mubr.bf16.mxu0 %v3884_v0  ;;  %3265 = vmatpush3.bf16.msra.mxu0 %v3718_v12 }
  0xd8   : > { %3266 = vmatprep.subr.bf16.mxu0 %v3719_v13 }
  0xdb   : > { %3267 = vmatpush3.bf16.msra.mxu0 %v3720_v14  ;;  %v3725_v14 = vld [vmem:[#allocation2 + $0x150] sm:$0xff]  }
  0xdc   : > { %3380 = vmatprep.subr.bf16.mxu0 %v3731_v15 }
  0xde   : > { %3079 = vmatmul.mubr.msk.bf16.gmra.mrb[80].mxu0 %vm548_vm0, %v4122_v33 }
  0xdf   : > { %1107 = vmatprep.mubr.bf16.mxu0 %v3884_v0 }
  0xe6   : > { %3080 = vmatmul.mubr.msk.bf16.gmra.mrb[84].mxu0 %vm548_vm0, %v4132_v36 }
  0xe7   : > { %1117 = vmatprep.mubr.bf16.mxu0 %v3884_v0 }
  0xee   : > { %3081 = vmatmul.mubr.msk.bf16.gmra.mrb[88].mxu0 %vm548_vm0, %v4142_v39 }
  0xef   : > { %1127 = vmatprep.mubr.bf16.mxu0 %v3884_v0  ;;  %v4253_v0 = vrot.slane %v4245_v19, %v400_v18 }
  0xf6   : > { %3082 = vmatmul.mubr.msk.bf16.gmra.mrb[92].mxu0 %vm548_vm0, %v4152_v42 }
 0x111   : > { %v607_v25 = vpop.f32.mrb[0].mxu0  ;;  %v720_v31 = vpop.f32.mrb[0].mxu1 }
 0x112   : > { %v608_v27 = vadd.f32 %v607_v25, %v4253_v0  ;;  %v609_v28 = vpop.f32.mrb[1].mxu0  ;;  %v721_v33 = vadd.f32 %v720_v31, %v4261_v24  ;;  %v722_v35 = vpop.f32.mrb[1].mxu1  ;;  %v3734_v25 = vld [vmem:[#allocation2 + $0x188] sm:$0xff]  }
 0x113   : > { %v610_v29 = vadd.f32 %v609_v28, %v4258_v23  ;;  %v611_v30 = vpop.f32.mrb[2].mxu0  ;;  %v723_v37 = vadd.f32 %v722_v35, %v4264_v26  ;;  %v724_v38 = vpop.f32.mrb[2].mxu1 }
 0x114   : > { %v612_v32 = vadd.f32 %v611_v30, %v4253_v0  ;;  %v613_v34 = vpop.f32.mrb[3].mxu0  ;;  %v1138_v39 = vmax.f32 %v608_v27, 0.0  ;;  %v1140_v41 = vmax.f32 %v721_v33, 0.0  ;;  %v725_v42 = vadd.f32 %v724_v38, %v4261_v24  ;;  %v726_v43 = vpop.f32.mrb[3].mxu1  ;;  %v3726_v33 = vld [vmem:[#allocation2 + $0x110] sm:$0xff]  }
 0x115   : > { %v614_v36 = vadd.f32 %v613_v34, %v4258_v23  ;;  %v1139_v44 = vmax.f32 %v610_v29, 0.0  ;;  %v1141_v46 = vmax.f32 %v723_v37, 0.0  ;;  %v727_v47 = vadd.f32 %v726_v43, %v4264_v26  ;;  %v3737_v29 = vld [vmem:[#allocation2 + $0x1d0] sm:$0xff]   ;;  %v3727_v37 = vld [vmem:[#allocation2 + $0x158] sm:$0xff]  }
 0x116   : > { %v1148_v40 = vmax.f32 %v612_v32, 0.0  ;;  %v1150_v49 = vmax.f32 %v725_v42, 0.0  ;;  %v3738_v42 = vld [vmem:[#allocation2 + $0x190] sm:$0xff]  }
 0x117   : > { %v1149_v45 = vmax.f32 %v614_v36, 0.0  ;;  %v1151_v51 = vmax.f32 %v727_v47, 0.0  ;;  %v3739_v47 = vld [vmem:[#allocation2 + $0x1d8] sm:$0xff]  }
 0x118   : > { %v1298_v48 = vpack.c.bf16 %v1148_v40, %v1138_v39  ;;  %v1300_v54 = vpack.c.bf16 %v1150_v49, %v1140_v41 }
 0x119   : > { %v1299_v50 = vpack.c.bf16 %v1149_v45, %v1139_v44  ;;  %v617_v52 = vpop.f32.mrb[4].mxu0  ;;  %v1301_v58 = vpack.c.bf16 %v1151_v51, %v1141_v46  ;;  %v730_v61 = vpop.f32.mrb[4].mxu1  ;;  %v3728_v51 = vld [vmem:[#allocation2 + $0x118] sm:$0xff]  }
 0x11a   : > { %v618_v55 = vadd.f32 %v617_v52, %v4253_v0  ;;  %v619_v56 = vpop.f32.mrb[5].mxu0  ;;  %v731_v1 = vadd.f32 %v730_v61, %v4261_v24  ;;  %v732_v3 = vpop.f32.mrb[5].mxu1 }
 0x11b   : > { %v620_v59 = vadd.f32 %v619_v56, %v4258_v23  ;;  %v621_v60 = vpop.f32.mrb[6].mxu0  ;;  %2057 = vmatprep.mubr.bf16.mxu1 %v1299_v50  ;;  %v733_v6 = vadd.f32 %v732_v3, %v4264_v26  ;;  %v734_v7 = vpop.f32.mrb[6].mxu1  ;;  %2154 = vmatprep.mubr.bf16.mxu0 %v1301_v58 }
 0x11c   : > { %v622_v63 = vadd.f32 %v621_v60, %v4253_v0  ;;  %v623_v2 = vpop.f32.mrb[7].mxu0  ;;  %2058 = vmatmul.mubr.bf16.vlgmr.msra.gmra.mrb[64].mxu1 %v1298_v48  ;;  %v1158_v9 = vmax.f32 %v618_v55, 0.0  ;;  %v1160_v11 = vmax.f32 %v731_v1, 0.0  ;;  %v735_v12 = vadd.f32 %v734_v7, %v4261_v24  ;;  %v736_v13 = vpop.f32.mrb[7].mxu1  ;;  %2155 = vmatmul.mubr.bf16.vlgmr.msra.gmra.mrb[96].mxu0 %v1300_v54 }
 0x11d   : > { %v624_v5 = vadd.f32 %v623_v2, %v4258_v23  ;;  %3317 = vmatpush3.bf16.msra.mxu1 %v3722_v53  ;;  %v1159_v15 = vmax.f32 %v620_v59, 0.0  ;;  %v1161_v21 = vmax.f32 %v733_v6, 0.0  ;;  %v737_v22 = vadd.f32 %v736_v13, %v4264_v26  ;;  %3381 = vmatpush3.bf16.msra.mxu0 %v3732_v62  ;;  %v3740_v62 = vld [vmem:[#allocation2 + $0x198] sm:$0xff]   ;;  %v3743_v2 = vld [vmem:[#allocation2 + $0x1e0] sm:$0xff]  }
 0x11e   : > { %v1168_v10 = vmax.f32 %v622_v63, 0.0  ;;  %3318 = vmatprep.subr.bf16.mxu1 %v3723_v57  ;;  %v1170_v28 = vmax.f32 %v735_v12, 0.0  ;;  %3382 = vmatprep.subr.bf16.mxu0 %v3733_v4  ;;  %v3729_v57 = vld [vmem:[#allocation2 + $0x160] sm:$0xff]  }
 0x11f   : > { %v1169_v16 = vmax.f32 %v624_v5, 0.0  ;;  %v1171_v31 = vmax.f32 %v737_v22, 0.0  ;;  %v3730_v6 = vld [vmem:[#allocation2 + $0x120] sm:$0xff]  }
 0x120   : > { %v1308_v27 = vpack.c.bf16 %v1168_v10, %v1158_v9  ;;  %v1310_v34 = vpack.c.bf16 %v1170_v28, %v1160_v11  ;;  %v3735_v10 = vld [vmem:[#allocation2 + $0x168] sm:$0xff]  }
 0x121   : > { %v1309_v30 = vpack.c.bf16 %v1169_v16, %v1159_v15  ;;  %v627_v32 = vpop.f32.mrb[8].mxu0  ;;  %3319 = vmatpush3.bf16.msra.mxu1 %v3724_v8  ;;  %v1311_v38 = vpack.c.bf16 %v1171_v31, %v1161_v21  ;;  %v740_v41 = vpop.f32.mrb[8].mxu1  ;;  %3383 = vmatpush3.bf16.msra.mxu0 %v3734_v25  ;;  %v3744_v15 = vld [vmem:[#allocation2 + $0x1a0] sm:$0xff]   ;;  %v3736_v31 = vld [vmem:[#allocation2 + $0x128] sm:$0xff]  }
 0x122   : > { %v628_v35 = vadd.f32 %v627_v32, %v4253_v0  ;;  %v629_v36 = vpop.f32.mrb[9].mxu0  ;;  %3320 = vmatprep.subr.bf16.mxu1 %v3725_v14  ;;  %v741_v44 = vadd.f32 %v740_v41, %v4261_v24  ;;  %v742_v46 = vpop.f32.mrb[9].mxu1  ;;  %3384 = vmatprep.subr.bf16.mxu0 %v3737_v29 }
 0x123   : > { %v630_v39 = vadd.f32 %v629_v36, %v4258_v23  ;;  %v631_v40 = vpop.f32.mrb[10].mxu0  ;;  %2065 = vmatprep.mubr.bf16.mxu1 %v1309_v30  ;;  %v743_v49 = vadd.f32 %v742_v46, %v4264_v26  ;;  %v744_v50 = vpop.f32.mrb[10].mxu1  ;;  %2162 = vmatprep.mubr.bf16.mxu0 %v1311_v38 }
 0x124   : > { %v632_v43 = vadd.f32 %v631_v40, %v4253_v0  ;;  %v633_v45 = vpop.f32.mrb[11].mxu0  ;;  %2066 = vmatmul.mubr.bf16.gmra.mrb[68].mxu1 %v1308_v27  ;;  %v1178_v52 = vmax.f32 %v628_v35, 0.0  ;;  %v1180_v54 = vmax.f32 %v741_v44, 0.0  ;;  %v745_v55 = vadd.f32 %v744_v50, %v4261_v24  ;;  %v746_v56 = vpop.f32.mrb[11].mxu1  ;;  %2163 = vmatmul.mubr.bf16.gmra.mrb[100].mxu0 %v1310_v34  ;;  %v3745_v27 = vld [vmem:[#allocation2 + $0x1e8] sm:$0xff]  }
 0x125   : > { %v634_v48 = vadd.f32 %v633_v45, %v4258_v23  ;;  %3321 = vmatpush3.bf16.msra.mxu1 %v3726_v33  ;;  %v1179_v58 = vmax.f32 %v630_v39, 0.0  ;;  %v1181_v60 = vmax.f32 %v743_v49, 0.0  ;;  %v747_v61 = vadd.f32 %v746_v56, %v4264_v26  ;;  %3385 = vmatpush3.bf16.msra.mxu0 %v3738_v42  ;;  %v3746_v42 = vld [vmem:[#allocation2 + $0x1a8] sm:$0xff]   ;;  %v3749_v45 = vld [vmem:[#allocation2 + $0x1f0] sm:$0xff]  }
 0x126   : > { %v1188_v53 = vmax.f32 %v632_v43, 0.0  ;;  %3322 = vmatprep.subr.bf16.mxu1 %v3727_v37  ;;  %v1190_v1 = vmax.f32 %v745_v55, 0.0  ;;  %3386 = vmatprep.subr.bf16.mxu0 %v3739_v47  ;;  %v3741_v37 = vld [vmem:[#allocation2 + $0x170] sm:$0xff]  }
 0x127   : > { %v1189_v59 = vmax.f32 %v634_v48, 0.0  ;;  %v1191_v4 = vmax.f32 %v747_v61, 0.0  ;;  %v3742_v49 = vld [vmem:[#allocation2 + $0x130] sm:$0xff]  }
 0x128   : > { %v1318_v63 = vpack.c.bf16 %v1188_v53, %v1178_v52  ;;  %v1320_v7 = vpack.c.bf16 %v1190_v1, %v1180_v54  ;;  %v3747_v53 = vld [vmem:[#allocation2 + $0x178] sm:$0xff]  }
 0x129   : > { %v1319_v3 = vpack.c.bf16 %v1189_v59, %v1179_v58  ;;  %v637_v5 = vpop.f32.mrb[12].mxu0  ;;  %3323 = vmatpush3.bf16.msra.mxu1 %v3728_v51  ;;  %v1321_v11 = vpack.c.bf16 %v1191_v4, %v1181_v60  ;;  %v750_v14 = vpop.f32.mrb[12].mxu1  ;;  %3387 = vmatpush3.bf16.msra.mxu0 %v3740_v62  ;;  %v3750_v58 = vld [vmem:[#allocation2 + $0x1b0] sm:$0xff]   ;;  %v3748_v4 = vld [vmem:[#allocation2 + $0x138] sm:$0xff]  }
 0x12a   : > { %v638_v8 = vadd.f32 %v637_v5, %v4253_v0  ;;  %v639_v9 = vpop.f32.mrb[13].mxu0  ;;  %3324 = vmatprep.subr.bf16.mxu1 %v3729_v57  ;;  %v751_v21 = vadd.f32 %v750_v14, %v4261_v24  ;;  %v752_v25 = vpop.f32.mrb[13].mxu1  ;;  %3388 = vmatprep.subr.bf16.mxu0 %v3743_v2 }
 0x12b   : > { %v640_v12 = vadd.f32 %v639_v9, %v4258_v23  ;;  %v641_v13 = vpop.f32.mrb[14].mxu0  ;;  %2073 = vmatprep.mubr.bf16.mxu1 %v1319_v3  ;;  %v753_v29 = vadd.f32 %v752_v25, %v4264_v26  ;;  %v754_v30 = vpop.f32.mrb[14].mxu1  ;;  %2170 = vmatprep.mubr.bf16.mxu0 %v1321_v11 }
 0x12c   : > { %v642_v16 = vadd.f32 %v641_v13, %v4253_v0  ;;  %v643_v22 = vpop.f32.mrb[15].mxu0  ;;  %2074 = vmatmul.mubr.bf16.gmra.mrb[72].mxu1 %v1318_v63  ;;  %v1198_v32 = vmax.f32 %v638_v8, 0.0  ;;  %v1200_v34 = vmax.f32 %v751_v21, 0.0  ;;  %v755_v35 = vadd.f32 %v754_v30, %v4261_v24  ;;  %v756_v36 = vpop.f32.mrb[15].mxu1  ;;  %2171 = vmatmul.mubr.bf16.gmra.mrb[104].mxu0 %v1320_v7  ;;  %v3751_v63 = vld [vmem:[#allocation2 + $0x1f8] sm:$0xff]  }
 0x12d   : > { %v644_v28 = vadd.f32 %v643_v22, %v4258_v23  ;;  %3325 = vmatpush3.bf16.msra.mxu1 %v3730_v6  ;;  %v1199_v38 = vmax.f32 %v640_v12, 0.0  ;;  %v1201_v40 = vmax.f32 %v753_v29, 0.0  ;;  %v757_v41 = vadd.f32 %v756_v36, %v4264_v26  ;;  %3389 = vmatpush3.bf16.msra.mxu0 %v3744_v15  ;;  %v3752_v15 = vld [vmem:[#allocation2 + $0x1b8] sm:$0xff]  }
 0x12e   : > { %v1208_v33 = vmax.f32 %v642_v16, 0.0  ;;  %3326 = vmatprep.subr.bf16.mxu1 %v3735_v10  ;;  %v1210_v44 = vmax.f32 %v755_v35, 0.0  ;;  %3390 = vmatprep.subr.bf16.mxu0 %v3745_v27  ;;  %v3753_v10 = vld [vmem:[#allocation2 + $0x240] sm:$0xff]  }
 0x12f   : > { %v1209_v39 = vmax.f32 %v644_v28, 0.0  ;;  %v1211_v47 = vmax.f32 %v757_v41, 0.0 }
 0x130   : > { %v1328_v43 = vpack.c.bf16 %v1208_v33, %v1198_v32  ;;  %v1330_v50 = vpack.c.bf16 %v1210_v44, %v1200_v34 }
 0x131   : > { %v1329_v46 = vpack.c.bf16 %v1209_v39, %v1199_v38  ;;  %v647_v48 = vpop.f32.mrb[16].mxu0  ;;  %3327 = vmatpush3.bf16.msra.mxu1 %v3736_v31  ;;  %v1331_v54 = vpack.c.bf16 %v1211_v47, %v1201_v40  ;;  %v760_v57 = vpop.f32.mrb[16].mxu1  ;;  %3391 = vmatpush3.bf16.msra.mxu0 %v3746_v42 }
 0x132   : > { %v648_v51 = vadd.f32 %v647_v48, %v4253_v0  ;;  %v649_v52 = vpop.f32.mrb[17].mxu0  ;;  %3328 = vmatprep.subr.bf16.mxu1 %v3741_v37  ;;  %v761_v60 = vadd.f32 %v760_v57, %v4261_v24  ;;  %v762_v62 = vpop.f32.mrb[17].mxu1  ;;  %3392 = vmatprep.subr.bf16.mxu0 %v3749_v45 }
 0x133   : > { %v650_v55 = vadd.f32 %v649_v52, %v4258_v23  ;;  %v651_v56 = vpop.f32.mrb[18].mxu0  ;;  %2081 = vmatprep.mubr.bf16.mxu1 %v1329_v46  ;;  %v763_v2 = vadd.f32 %v762_v62, %v4264_v26  ;;  %v764_v3 = vpop.f32.mrb[18].mxu1  ;;  %2178 = vmatprep.mubr.bf16.mxu0 %v1331_v54 }
 0x134   : > { %v652_v59 = vadd.f32 %v651_v56, %v4253_v0  ;;  %v653_v61 = vpop.f32.mrb[19].mxu0  ;;  %2082 = vmatmul.mubr.bf16.gmra.mrb[76].mxu1 %v1328_v43  ;;  %v1218_v5 = vmax.f32 %v648_v51, 0.0  ;;  %v1220_v7 = vmax.f32 %v761_v60, 0.0  ;;  %v765_v8 = vadd.f32 %v764_v3, %v4261_v24  ;;  %v766_v9 = vpop.f32.mrb[19].mxu1  ;;  %2179 = vmatmul.mubr.bf16.gmra.mrb[108].mxu0 %v1330_v50 }
 0x135   : > { %v654_v1 = vadd.f32 %v653_v61, %v4258_v23  ;;  %3329 = vmatpush3.bf16.msra.mxu1 %v3742_v49  ;;  %v1219_v11 = vmax.f32 %v650_v55, 0.0  ;;  %v1221_v13 = vmax.f32 %v763_v2, 0.0  ;;  %v767_v14 = vadd.f32 %v766_v9, %v4264_v26  ;;  %3393 = vmatpush3.bf16.msra.mxu0 %v3750_v58 }
 0x136   : > { %v1228_v6 = vmax.f32 %v652_v59, 0.0  ;;  %3330 = vmatprep.subr.bf16.mxu1 %v3747_v53  ;;  %v1230_v21 = vmax.f32 %v765_v8, 0.0  ;;  %3394 = vmatprep.subr.bf16.mxu0 %v3751_v63 }
 0x137   : > { %v1229_v12 = vmax.f32 %v654_v1, 0.0  ;;  %v1231_v25 = vmax.f32 %v767_v14, 0.0 }
 0x138   : > { %v1338_v16 = vpack.c.bf16 %v1228_v6, %v1218_v5  ;;  %v1340_v28 = vpack.c.bf16 %v1230_v21, %v1220_v7 }
 0x139   : > { %v1339_v22 = vpack.c.bf16 %v1229_v12, %v1219_v11  ;;  %v657_v27 = vpop.f32.mrb[20].mxu0  ;;  %3331 = vmatpush3.bf16.msra.mxu1 %v3748_v4  ;;  %v1341_v31 = vpack.c.bf16 %v1231_v25, %v1221_v13  ;;  %v770_v34 = vpop.f32.mrb[20].mxu1  ;;  %3395 = vmatpush3.bf16.msra.mxu0 %v3752_v15 }
 0x13a   : > { %v658_v29 = vadd.f32 %v657_v27, %v4253_v0  ;;  %v659_v30 = vpop.f32.mrb[21].mxu0  ;;  %3444 = vmatprep.subr.bf16.mxu1 %v3753_v10  ;;  %v771_v36 = vadd.f32 %v770_v34, %v4261_v24  ;;  %v772_v38 = vpop.f32.mrb[21].mxu1 }
 0x13b   : > { %v660_v32 = vadd.f32 %v659_v30, %v4258_v23  ;;  %v661_v33 = vpop.f32.mrb[22].mxu0  ;;  %2089 = vmatprep.mubr.bf16.mxu1 %v1339_v22  ;;  %v773_v40 = vadd.f32 %v772_v38, %v4264_v26  ;;  %v774_v41 = vpop.f32.mrb[22].mxu1  ;;  %2186 = vmatprep.mubr.bf16.mxu0 %v1341_v31  ;;  %v416_v22 = vsub.s32 4, %v4239_v17 }
 0x13c   : > { %v662_v35 = vadd.f32 %v661_v33, %v4253_v0  ;;  %v663_v37 = vpop.f32.mrb[23].mxu0  ;;  %2090 = vmatmul.mubr.bf16.gmra.mrb[80].mxu1 %v1338_v16  ;;  %v1238_v42 = vmax.f32 %v658_v29, 0.0  ;;  %v1240_v44 = vmax.f32 %v771_v36, 0.0  ;;  %v775_v45 = vadd.f32 %v774_v41, %v4261_v24  ;;  %v776_v46 = vpop.f32.mrb[23].mxu1  ;;  %2187 = vmatmul.mubr.bf16.gmra.mrb[112].mxu0 %v1340_v28 }
 0x13d   : > { %v664_v39 = vadd.f32 %v663_v37, %v4258_v23  ;;  %v1239_v47 = vmax.f32 %v660_v32, 0.0  ;;  %v1241_v49 = vmax.f32 %v773_v40, 0.0  ;;  %v777_v50 = vadd.f32 %v776_v46, %v4264_v26 }
 0x13e   : > { %v1248_v43 = vmax.f32 %v662_v35, 0.0  ;;  %v1250_v52 = vmax.f32 %v775_v45, 0.0  ;;  %v420_v29 = vsub.s32 5, %v4239_v17  ;;  %v4329_v41 = vrot.slane %v4245_v19, %v416_v22 }
 0x13f   : > { %v1249_v48 = vmax.f32 %v664_v39, 0.0  ;;  %v1251_v54 = vmax.f32 %v777_v50, 0.0 }
 0x140   : > { %v1348_v51 = vpack.c.bf16 %v1248_v43, %v1238_v42  ;;  %v1350_v56 = vpack.c.bf16 %v1250_v52, %v1240_v44  ;;  %v424_v42 = vsub.s32 6, %v4239_v17  ;;  %v4335_v46 = vrot.slane %v4245_v19, %v420_v29 }
 0x141   : > { %v1349_v53 = vpack.c.bf16 %v1249_v48, %v1239_v47  ;;  %v667_v55 = vpop.f32.mrb[24].mxu0  ;;  %v1351_v59 = vpack.c.bf16 %v1251_v54, %v1241_v49  ;;  %v780_v62 = vpop.f32.mrb[24].mxu1 }
 0x142   : > { %v668_v57 = vadd.f32 %v667_v55, %v4253_v0  ;;  %v669_v58 = vpop.f32.mrb[25].mxu0  ;;  %v781_v1 = vadd.f32 %v780_v62, %v4261_v24  ;;  %v782_v3 = vpop.f32.mrb[25].mxu1 }
 0x143   : > { %v670_v60 = vadd.f32 %v669_v58, %v4258_v23  ;;  %v671_v61 = vpop.f32.mrb[26].mxu0  ;;  %2097 = vmatprep.mubr.bf16.mxu1 %v1349_v53  ;;  %v783_v5 = vadd.f32 %v782_v3, %v4264_v26  ;;  %v784_v6 = vpop.f32.mrb[26].mxu1  ;;  %2194 = vmatprep.mubr.bf16.mxu0 %v1351_v59 }
 0x144   : > { %v672_v63 = vadd.f32 %v671_v61, %v4253_v0  ;;  %v673_v2 = vpop.f32.mrb[27].mxu0  ;;  %2098 = vmatmul.mubr.bf16.gmra.mrb[84].mxu1 %v1348_v51  ;;  %v1258_v7 = vmax.f32 %v668_v57, 0.0  ;;  %v1260_v9 = vmax.f32 %v781_v1, 0.0  ;;  %v785_v10 = vadd.f32 %v784_v6, %v4261_v24  ;;  %v786_v11 = vpop.f32.mrb[27].mxu1  ;;  %2195 = vmatmul.mubr.bf16.gmra.mrb[116].mxu0 %v1350_v56 }
 0x145   : > { %v674_v4 = vadd.f32 %v673_v2, %v4258_v23  ;;  %v1259_v12 = vmax.f32 %v670_v60, 0.0  ;;  %v1261_v14 = vmax.f32 %v783_v5, 0.0  ;;  %v787_v15 = vadd.f32 %v786_v11, %v4264_v26 }
 0x146   : > { %v1268_v8 = vmax.f32 %v672_v63, 0.0  ;;  %v1270_v21 = vmax.f32 %v785_v10, 0.0  ;;  %v4341_v57 = vrot.slane %v4245_v19, %v424_v42 }
 0x147   : > { %v1269_v13 = vmax.f32 %v674_v4, 0.0  ;;  %v1271_v27 = vmax.f32 %v787_v15, 0.0 }
 0x148   : > { %v1358_v16 = vpack.c.bf16 %v1268_v8, %v1258_v7  ;;  %v1360_v30 = vpack.c.bf16 %v1270_v21, %v1260_v9 }
 0x149   : > { %v1359_v25 = vpack.c.bf16 %v1269_v13, %v1259_v12  ;;  %v677_v28 = vpop.f32.mrb[28].mxu0  ;;  %v1361_v33 = vpack.c.bf16 %v1271_v27, %v1261_v14  ;;  %v790_v36 = vpop.f32.mrb[28].mxu1 }
 0x14a   : > { %v678_v31 = vadd.f32 %v677_v28, %v4253_v0  ;;  %v679_v32 = vpop.f32.mrb[29].mxu0  ;;  %v791_v38 = vadd.f32 %v790_v36, %v4261_v24  ;;  %v792_v40 = vpop.f32.mrb[29].mxu1 }
 0x14b   : > { %v680_v34 = vadd.f32 %v679_v32, %v4258_v23  ;;  %v681_v35 = vpop.f32.mrb[30].mxu0  ;;  %2105 = vmatprep.mubr.bf16.mxu1 %v1359_v25  ;;  %v793_v44 = vadd.f32 %v792_v40, %v4264_v26  ;;  %v794_v45 = vpop.f32.mrb[30].mxu1  ;;  %2202 = vmatprep.mubr.bf16.mxu0 %v1361_v33 }
 0x14c   : > { %v682_v37 = vadd.f32 %v681_v35, %v4253_v0  ;;  %v683_v39 = vpop.f32.mrb[31].mxu0  ;;  %2106 = vmatmul.mubr.bf16.gmra.mrb[88].mxu1 %v1358_v16  ;;  %v428_v0 = vsub.s32 7, %v4239_v17  ;;  %v1278_v47 = vmax.f32 %v678_v31, 0.0  ;;  %v1280_v49 = vmax.f32 %v791_v38, 0.0  ;;  %v796_v51 = vpop.f32.mrb[31].mxu1  ;;  %2203 = vmatmul.mubr.bf16.gmra.mrb[120].mxu0 %v1360_v30  ;;  %v3754_v31 = vld [vmem:[#allocation2 + $0x200] sm:$0xff]  }
 0x14d   : > { %v684_v43 = vadd.f32 %v683_v39, %v4258_v23  ;;  %v795_v50 = vadd.f32 %v794_v45, %v4261_v24  ;;  %v1279_v52 = vmax.f32 %v680_v34, 0.0  ;;  %v1281_v54 = vmax.f32 %v793_v44, 0.0  ;;  %v3755_v35 = vld [vmem:[#allocation2 + $0x248] sm:$0xff]  }
 0x14e   : > { %v1288_v48 = vmax.f32 %v682_v37, 0.0  ;;  %v797_v23 = vadd.f32 %v796_v51, %v4264_v26  ;;  %v4344_v61 = vrot.slane %v4245_v19, %v428_v0 }
 0x14f   : > { %v1289_v53 = vmax.f32 %v684_v43, 0.0  ;;  %v1290_v56 = vmax.f32 %v795_v50, 0.0 }
 0x150   : > { %v1368_v55 = vpack.c.bf16 %v1288_v48, %v1278_v47  ;;  %v1291_v59 = vmax.f32 %v797_v23, 0.0  ;;  %v3756_v48 = vld [vmem:[#allocation2 + $0x208] sm:$0xff]  }
 0x151   : > { %v1369_v58 = vpack.c.bf16 %v1289_v53, %v1279_v52  ;;  %v833_v60 = vpop.f32.mrb[32].mxu0  ;;  %v1370_v62 = vpack.c.bf16 %v1290_v56, %v1280_v49  ;;  %v946_v26 = vpop.f32.mrb[32].mxu1 }
 0x152   : > { %v834_v24 = vadd.f32 %v833_v60, %v4329_v41  ;;  %v835_v63 = vpop.f32.mrb[33].mxu0  ;;  %v1371_v1 = vpack.c.bf16 %v1291_v59, %v1281_v54  ;;  %v947_v5 = vadd.f32 %v946_v26, %v4341_v57  ;;  %v948_v7 = vpop.f32.mrb[33].mxu1  ;;  %v3757_v54 = vld [vmem:[#allocation2 + $0x250] sm:$0xff]  }
 0x153   : > { %v836_v2 = vadd.f32 %v835_v63, %v4335_v46  ;;  %v837_v3 = vpop.f32.mrb[34].mxu0  ;;  %2113 = vmatprep.mubr.bf16.mxu1 %v1369_v58  ;;  %v949_v8 = vadd.f32 %v948_v7, %v4344_v61  ;;  %v950_v9 = vpop.f32.mrb[34].mxu1 }
 0x154   : > { %v838_v4 = vadd.f32 %v837_v3, %v4329_v41  ;;  %v839_v6 = vpop.f32.mrb[35].mxu0  ;;  %2114 = vmatmul.mubr.bf16.gmra.mrb[92].mxu1 %v1368_v55  ;;  %2210 = vmatprep.mubr.bf16.mxu0 %v1371_v1  ;;  %v1142_v10 = vmax.f32 %v834_v24, 0.0  ;;  %v1144_v12 = vmax.f32 %v947_v5, 0.0  ;;  %v951_v13 = vadd.f32 %v950_v9, %v4341_v57  ;;  %v952_v14 = vpop.f32.mrb[35].mxu1  ;;  %v3758_v1 = vld [vmem:[#allocation2 + $0x210] sm:$0xff]  }
 0x155   : > { %v840_v19 = vadd.f32 %v839_v6, %v4335_v46  ;;  %2211 = vmatmul.mubr.bf16.gmra.mrb[124].mxu0 %v1370_v62  ;;  %v1143_v15 = vmax.f32 %v836_v2, 0.0  ;;  %v1145_v21 = vmax.f32 %v949_v8, 0.0  ;;  %v953_v22 = vadd.f32 %v952_v14, %v4344_v61 }
 0x156   : > { %v1152_v11 = vmax.f32 %v838_v4, 0.0  ;;  %v1154_v27 = vmax.f32 %v951_v13, 0.0  ;;  %v3759_v4 = vld [vmem:[#allocation2 + $0x258] sm:$0xff]  }
 0x157   : > { %v1153_v16 = vmax.f32 %v840_v19, 0.0  ;;  %v1155_v29 = vmax.f32 %v953_v22, 0.0 }
 0x158   : > { %v1302_v25 = vpack.c.bf16 %v1152_v11, %v1142_v10  ;;  %v1304_v32 = vpack.c.bf16 %v1154_v27, %v1144_v12 }
 0x159   : > { %v1303_v28 = vpack.c.bf16 %v1153_v16, %v1143_v15  ;;  %v843_v30 = vpop.f32.mrb[36].mxu0  ;;  %v1305_v36 = vpack.c.bf16 %v1155_v29, %v1145_v21  ;;  %v3760_v15 = vld [vmem:[#allocation2 + $0x218] sm:$0xff]  }
 0x15a   : > { %v844_v33 = vadd.f32 %v843_v30, %v4329_v41  ;;  %v845_v34 = vpop.f32.mrb[37].mxu0  ;;  %v956_v39 = vpop.f32.mrb[36].mxu1 }
 0x15b   : > { %v846_v37 = vadd.f32 %v845_v34, %v4335_v46  ;;  %v847_v38 = vpop.f32.mrb[38].mxu0  ;;  %2251 = vmatprep.mubr.bf16.mxu1 %v1303_v28  ;;  %v957_v42 = vadd.f32 %v956_v39, %v4341_v57  ;;  %v958_v44 = vpop.f32.mrb[37].mxu1  ;;  %2348 = vmatprep.mubr.bf16.mxu0 %v1305_v36  ;;  %v3761_v28 = vld [vmem:[#allocation2 + $0x260] sm:$0xff]  }
 0x15c   : > { %v848_v40 = vadd.f32 %v847_v38, %v4329_v41  ;;  %v849_v43 = vpop.f32.mrb[39].mxu0  ;;  %2252 = vmatmul.mubr.bf16.vlgmr.msra.gmra.mrb[96].mxu1 %v1302_v25  ;;  %v959_v0 = vadd.f32 %v958_v44, %v4344_v61  ;;  %v960_v47 = vpop.f32.mrb[38].mxu1  ;;  %v1162_v49 = vmax.f32 %v844_v33, 0.0  ;;  %v3762_v38 = vld [vmem:[#allocation2 + $0x220] sm:$0xff]  }
 0x15d   : > { %v850_v45 = vadd.f32 %v849_v43, %v4335_v46  ;;  %3445 = vmatpush3.bf16.msra.mxu1 %v3754_v31  ;;  %v1164_v51 = vmax.f32 %v957_v42, 0.0  ;;  %v961_v52 = vadd.f32 %v960_v47, %v4341_v57  ;;  %v962_v53 = vpop.f32.mrb[39].mxu1  ;;  %2349 = vmatmul.mubr.bf16.vlgmr.msra.gmra.mrb[128].mxu0 %v1304_v32  ;;  %v1163_v23 = vmax.f32 %v846_v37, 0.0  ;;  %v3763_v43 = vld [vmem:[#allocation2 + $0x268] sm:$0xff]  }
 0x15e   : > { %v1172_v50 = vmax.f32 %v848_v40, 0.0  ;;  %3446 = vmatprep.subr.bf16.mxu1 %v3755_v35  ;;  %v1165_v56 = vmax.f32 %v959_v0, 0.0  ;;  %v963_v58 = vadd.f32 %v962_v53, %v4344_v61 }
 0x15f   : > { %v1173_v55 = vmax.f32 %v850_v45, 0.0  ;;  %v1174_v60 = vmax.f32 %v961_v52, 0.0 }
 0x160   : > { %v1312_v59 = vpack.c.bf16 %v1172_v50, %v1162_v49  ;;  %v1175_v24 = vmax.f32 %v963_v58, 0.0 }
 0x161   : > { %v1313_v62 = vpack.c.bf16 %v1173_v55, %v1163_v23  ;;  %v853_v63 = vpop.f32.mrb[40].mxu0  ;;  %3447 = vmatpush3.bf16.msra.mxu1 %v3756_v48  ;;  %v1314_v2 = vpack.c.bf16 %v1174_v60, %v1164_v51  ;;  %v3764_v23 = vld [vmem:[#allocation2 + $0x228] sm:$0xff]  }
 0x162   : > { %v854_v3 = vadd.f32 %v853_v63, %v4329_v41  ;;  %v855_v26 = vpop.f32.mrb[41].mxu0  ;;  %3448 = vmatprep.subr.bf16.mxu1 %v3757_v54  ;;  %v1315_v5 = vpack.c.bf16 %v1175_v24, %v1165_v56  ;;  %v966_v19 = vpop.f32.mrb[40].mxu1 }
 0x163   : > { %v856_v6 = vadd.f32 %v855_v26, %v4335_v46  ;;  %v857_v7 = vpop.f32.mrb[42].mxu0  ;;  %2259 = vmatprep.mubr.bf16.mxu1 %v1313_v62  ;;  %v967_v9 = vadd.f32 %v966_v19, %v4341_v57  ;;  %v968_v11 = vpop.f32.mrb[41].mxu1  ;;  %v3765_v62 = vld [vmem:[#allocation2 + $0x270] sm:$0xff]  }
 0x164   : > { %v858_v8 = vadd.f32 %v857_v7, %v4329_v41  ;;  %v859_v10 = vpop.f32.mrb[43].mxu0  ;;  %2260 = vmatmul.mubr.bf16.gmra.mrb[100].mxu1 %v1312_v59  ;;  %v969_v13 = vadd.f32 %v968_v11, %v4344_v61  ;;  %v970_v14 = vpop.f32.mrb[42].mxu1  ;;  %2356 = vmatprep.mubr.bf16.mxu0 %v1315_v5  ;;  %v1182_v16 = vmax.f32 %v854_v3, 0.0  ;;  %v3766_v7 = vld [vmem:[#allocation2 + $0x230] sm:$0xff]  }
 0x165   : > { %v860_v12 = vadd.f32 %v859_v10, %v4335_v46  ;;  %3449 = vmatpush3.bf16.msra.mxu1 %v3758_v1  ;;  %v1184_v22 = vmax.f32 %v967_v9, 0.0  ;;  %v971_v25 = vadd.f32 %v970_v14, %v4341_v57  ;;  %v972_v27 = vpop.f32.mrb[43].mxu1  ;;  %2357 = vmatmul.mubr.bf16.gmra.mrb[132].mxu0 %v1314_v2  ;;  %v1183_v29 = vmax.f32 %v856_v6, 0.0  ;;  %v3767_v10 = vld [vmem:[#allocation2 + $0x278] sm:$0xff]  }
 0x166   : > { %v1192_v21 = vmax.f32 %v858_v8, 0.0  ;;  %3450 = vmatprep.subr.bf16.mxu1 %v3759_v4  ;;  %v1185_v31 = vmax.f32 %v969_v13, 0.0  ;;  %v973_v32 = vadd.f32 %v972_v27, %v4344_v61 }
 0x167   : > { %v1193_v30 = vmax.f32 %v860_v12, 0.0  ;;  %v1194_v34 = vmax.f32 %v971_v25, 0.0 }
 0x168   : > { %v1322_v33 = vpack.c.bf16 %v1192_v21, %v1182_v16  ;;  %v1195_v36 = vmax.f32 %v973_v32, 0.0 }
 0x169   : > { %v1323_v35 = vpack.c.bf16 %v1193_v30, %v1183_v29  ;;  %v863_v37 = vpop.f32.mrb[44].mxu0  ;;  %3451 = vmatpush3.bf16.msra.mxu1 %v3760_v15  ;;  %v1324_v39 = vpack.c.bf16 %v1194_v34, %v1184_v22  ;;  %v3768_v29 = vld [vmem:[#allocation2 + $0x238] sm:$0xff]  }
 0x16a   : > { %v864_v40 = vadd.f32 %v863_v37, %v4329_v41  ;;  %v865_v42 = vpop.f32.mrb[45].mxu0  ;;  %3452 = vmatprep.subr.bf16.mxu1 %v3761_v28  ;;  %v1325_v44 = vpack.c.bf16 %v1195_v36, %v1185_v31  ;;  %v976_v47 = vpop.f32.mrb[44].mxu1 }
 0x16b   : > { %v866_v45 = vadd.f32 %v865_v42, %v4335_v46  ;;  %v867_v0 = vpop.f32.mrb[46].mxu0  ;;  %2267 = vmatprep.mubr.bf16.mxu1 %v1323_v35  ;;  %v977_v49 = vadd.f32 %v976_v47, %v4341_v57  ;;  %v978_v51 = vpop.f32.mrb[45].mxu1 }
 0x16c   : > { %v868_v48 = vadd.f32 %v867_v0, %v4329_v41  ;;  %v869_v50 = vpop.f32.mrb[47].mxu0  ;;  %2268 = vmatmul.mubr.bf16.gmra.mrb[104].mxu1 %v1322_v33  ;;  %v979_v53 = vadd.f32 %v978_v51, %v4344_v61  ;;  %v980_v54 = vpop.f32.mrb[46].mxu1  ;;  %2364 = vmatprep.mubr.bf16.mxu0 %v1325_v44  ;;  %v1202_v55 = vmax.f32 %v864_v40, 0.0 }
 0x16d   : > { %v870_v52 = vadd.f32 %v869_v50, %v4335_v46  ;;  %3453 = vmatpush3.bf16.msra.mxu1 %v3762_v38  ;;  %v1204_v58 = vmax.f32 %v977_v49, 0.0  ;;  %v981_v59 = vadd.f32 %v980_v54, %v4341_v57  ;;  %v982_v60 = vpop.f32.mrb[47].mxu1  ;;  %2365 = vmatmul.mubr.bf16.gmra.mrb[136].mxu0 %v1324_v39  ;;  %v1203_v24 = vmax.f32 %v866_v45, 0.0 }
 0x16e   : > { %v1212_v56 = vmax.f32 %v868_v48, 0.0  ;;  %3454 = vmatprep.subr.bf16.mxu1 %v3763_v43  ;;  %v1205_v1 = vmax.f32 %v979_v53, 0.0  ;;  %v983_v2 = vadd.f32 %v982_v60, %v4344_v61 }
 0x16f   : > { %v1213_v63 = vmax.f32 %v870_v52, 0.0  ;;  %v1214_v26 = vmax.f32 %v981_v59, 0.0 }
 0x170   : > { %v1332_v3 = vpack.c.bf16 %v1212_v56, %v1202_v55  ;;  %v1215_v5 = vmax.f32 %v983_v2, 0.0 }
 0x171   : > { %v1333_v4 = vpack.c.bf16 %v1213_v63, %v1203_v24  ;;  %v873_v6 = vpop.f32.mrb[48].mxu0  ;;  %3455 = vmatpush3.bf16.msra.mxu1 %v3764_v23  ;;  %v1334_v19 = vpack.c.bf16 %v1214_v26, %v1204_v58 }
 0x172   : > { %v874_v8 = vadd.f32 %v873_v6, %v4329_v41  ;;  %v875_v9 = vpop.f32.mrb[49].mxu0  ;;  %3456 = vmatprep.subr.bf16.mxu1 %v3765_v62  ;;  %v1335_v11 = vpack.c.bf16 %v1215_v5, %v1205_v1  ;;  %v986_v14 = vpop.f32.mrb[48].mxu1 }
 0x173   : > { %v876_v12 = vadd.f32 %v875_v9, %v4335_v46  ;;  %v877_v13 = vpop.f32.mrb[50].mxu0  ;;  %2275 = vmatprep.mubr.bf16.mxu1 %v1333_v4  ;;  %v987_v16 = vadd.f32 %v986_v14, %v4341_v57  ;;  %v988_v22 = vpop.f32.mrb[49].mxu1 }
 0x174   : > { %v878_v15 = vadd.f32 %v877_v13, %v4329_v41  ;;  %v879_v21 = vpop.f32.mrb[51].mxu0  ;;  %2276 = vmatmul.mubr.bf16.gmra.mrb[108].mxu1 %v1332_v3  ;;  %v989_v27 = vadd.f32 %v988_v22, %v4344_v61  ;;  %v990_v28 = vpop.f32.mrb[50].mxu1  ;;  %2372 = vmatprep.mubr.bf16.mxu0 %v1335_v11  ;;  %v1222_v30 = vmax.f32 %v874_v8, 0.0 }
 0x175   : > { %v880_v25 = vadd.f32 %v879_v21, %v4335_v46  ;;  %3457 = vmatpush3.bf16.msra.mxu1 %v3766_v7  ;;  %v1224_v32 = vmax.f32 %v987_v16, 0.0  ;;  %v991_v33 = vadd.f32 %v990_v28, %v4341_v57  ;;  %v992_v34 = vpop.f32.mrb[51].mxu1  ;;  %2373 = vmatmul.mubr.bf16.gmra.mrb[140].mxu0 %v1334_v19  ;;  %v1223_v35 = vmax.f32 %v876_v12, 0.0 }
 0x176   : > { %v1232_v31 = vmax.f32 %v878_v15, 0.0  ;;  %3458 = vmatprep.subr.bf16.mxu1 %v3767_v10  ;;  %v1225_v37 = vmax.f32 %v989_v27, 0.0  ;;  %v993_v38 = vadd.f32 %v992_v34, %v4344_v61 }
 0x177   : > { %v1233_v36 = vmax.f32 %v880_v25, 0.0  ;;  %v1234_v40 = vmax.f32 %v991_v33, 0.0 }
 0x178   : > { %v1342_v39 = vpack.c.bf16 %v1232_v31, %v1222_v30  ;;  %v1235_v43 = vmax.f32 %v993_v38, 0.0 }
 0x179   : > { %v1343_v42 = vpack.c.bf16 %v1233_v36, %v1223_v35  ;;  %v883_v44 = vpop.f32.mrb[52].mxu0  ;;  %3459 = vmatpush3.bf16.msra.mxu1 %v3768_v29  ;;  %v1344_v45 = vpack.c.bf16 %v1234_v40, %v1224_v32 }
 0x17a   : > { %v884_v0 = vadd.f32 %v883_v44, %v4329_v41  ;;  %v885_v47 = vpop.f32.mrb[53].mxu0  ;;  %v1345_v48 = vpack.c.bf16 %v1235_v43, %v1225_v37  ;;  %v996_v51 = vpop.f32.mrb[52].mxu1 }
 0x17b   : > { %v886_v49 = vadd.f32 %v885_v47, %v4335_v46  ;;  %v887_v50 = vpop.f32.mrb[54].mxu0  ;;  %2283 = vmatprep.mubr.bf16.mxu1 %v1343_v42  ;;  %v997_v53 = vadd.f32 %v996_v51, %v4341_v57  ;;  %v998_v23 = vpop.f32.mrb[53].mxu1  ;;  %v395_v47 = vld [vmem:[%s4699_s2 + $0x8] sm:$0x3] }
 0x17c   : > { %v888_v52 = vadd.f32 %v887_v50, %v4329_v41  ;;  %v889_v54 = vpop.f32.mrb[55].mxu0  ;;  %2284 = vmatmul.mubr.bf16.gmra.mrb[112].mxu1 %v1342_v39  ;;  %v999_v56 = vadd.f32 %v998_v23, %v4344_v61  ;;  %v1000_v58 = vpop.f32.mrb[54].mxu1  ;;  %2380 = vmatprep.mubr.bf16.mxu0 %v1345_v48  ;;  %v1242_v59 = vmax.f32 %v884_v0, 0.0 }
 0x17d   : > { %v890_v55 = vadd.f32 %v889_v54, %v4335_v46  ;;  %v1244_v62 = vmax.f32 %v997_v53, 0.0  ;;  %v1001_v24 = vadd.f32 %v1000_v58, %v4341_v57  ;;  %v1002_v63 = vpop.f32.mrb[55].mxu1  ;;  %2381 = vmatmul.mubr.bf16.gmra.mrb[144].mxu0 %v1344_v45  ;;  %v1243_v1 = vmax.f32 %v886_v49, 0.0 }
 0x17e   : > { %v1252_v60 = vmax.f32 %v888_v52, 0.0  ;;  %v1245_v3 = vmax.f32 %v999_v56, 0.0  ;;  %v1003_v26 = vadd.f32 %v1002_v63, %v4344_v61 }
 0x17f   : > { %v1253_v2 = vmax.f32 %v890_v55, 0.0  ;;  %v1254_v5 = vmax.f32 %v1001_v24, 0.0 }
 0x180   : > { %v1352_v4 = vpack.c.bf16 %v1252_v60, %v1242_v59  ;;  %v1255_v7 = vmax.f32 %v1003_v26, 0.0  ;;  %v4413_v59 = vrot.slane %v395_v47, %v400_v18  ;;  %v4417_v60 = vrot.slane %v395_v47, %v404_v20 }
 0x181   : > { %v1353_v6 = vpack.c.bf16 %v1253_v2, %v1243_v1  ;;  %v893_v19 = vpop.f32.mrb[56].mxu0  ;;  %v1354_v8 = vpack.c.bf16 %v1254_v5, %v1244_v62 }
 0x182   : > { %v894_v9 = vadd.f32 %v893_v19, %v4329_v41  ;;  %v895_v10 = vpop.f32.mrb[57].mxu0  ;;  %v1355_v11 = vpack.c.bf16 %v1255_v7, %v1245_v3  ;;  %v1006_v14 = vpop.f32.mrb[56].mxu1 }
 0x183   : > { %v896_v12 = vadd.f32 %v895_v10, %v4335_v46  ;;  %v897_v13 = vpop.f32.mrb[58].mxu0  ;;  %2291 = vmatprep.mubr.bf16.mxu1 %v1353_v6  ;;  %v1007_v16 = vadd.f32 %v1006_v14, %v4341_v57  ;;  %v1008_v22 = vpop.f32.mrb[57].mxu1 }
 0x184   : > { %v898_v15 = vadd.f32 %v897_v13, %v4329_v41  ;;  %v899_v21 = vpop.f32.mrb[59].mxu0  ;;  %2292 = vmatmul.mubr.bf16.gmra.mrb[116].mxu1 %v1352_v4  ;;  %v1009_v27 = vadd.f32 %v1008_v22, %v4344_v61  ;;  %v1010_v28 = vpop.f32.mrb[58].mxu1  ;;  %2388 = vmatprep.mubr.bf16.mxu0 %v1355_v11  ;;  %v1262_v29 = vmax.f32 %v894_v9, 0.0 }
 0x185   : > { %v900_v25 = vadd.f32 %v899_v21, %v4335_v46  ;;  %v1264_v31 = vmax.f32 %v1007_v16, 0.0  ;;  %v1011_v32 = vadd.f32 %v1010_v28, %v4341_v57  ;;  %v1012_v33 = vpop.f32.mrb[59].mxu1  ;;  %2389 = vmatmul.mubr.bf16.gmra.mrb[148].mxu0 %v1354_v8  ;;  %v1263_v34 = vmax.f32 %v896_v12, 0.0 }
 0x186   : > { %v1272_v30 = vmax.f32 %v898_v15, 0.0  ;;  %v1265_v36 = vmax.f32 %v1009_v27, 0.0  ;;  %v1013_v37 = vadd.f32 %v1012_v33, %v4344_v61 }
 0x187   : > { %v1273_v35 = vmax.f32 %v900_v25, 0.0  ;;  %v1274_v39 = vmax.f32 %v1011_v32, 0.0 }
 0x188   : > { %v1362_v38 = vpack.c.bf16 %v1272_v30, %v1262_v29  ;;  %v1275_v42 = vmax.f32 %v1013_v37, 0.0 }
 0x189   : > { %v1363_v40 = vpack.c.bf16 %v1273_v35, %v1263_v34  ;;  %v903_v43 = vpop.f32.mrb[60].mxu0  ;;  %v1364_v44 = vpack.c.bf16 %v1274_v39, %v1264_v31 }
 0x18a   : > { %v904_v45 = vadd.f32 %v903_v43, %v4329_v41  ;;  %v905_v0 = vpop.f32.mrb[61].mxu0  ;;  %v1365_v48 = vpack.c.bf16 %v1275_v42, %v1265_v36  ;;  %v1016_v51 = vpop.f32.mrb[60].mxu1 }
 0x18b   : > { %v906_v49 = vadd.f32 %v905_v0, %v4335_v46  ;;  %v907_v50 = vpop.f32.mrb[62].mxu0  ;;  %2299 = vmatprep.mubr.bf16.mxu1 %v1363_v40  ;;  %v1017_v53 = vadd.f32 %v1016_v51, %v4341_v57  ;;  %v1018_v23 = vpop.f32.mrb[61].mxu1 }
 0x18c   : > { %v908_v52 = vadd.f32 %v907_v50, %v4329_v41  ;;  %v909_v54 = vpop.f32.mrb[63].mxu0  ;;  %2300 = vmatmul.mubr.bf16.gmra.mrb[120].mxu1 %v1362_v38  ;;  %v1019_v56 = vadd.f32 %v1018_v23, %v4344_v61  ;;  %v1020_v58 = vpop.f32.mrb[62].mxu1  ;;  %2396 = vmatprep.mubr.bf16.mxu0 %v1365_v48  ;;  %v1282_v41 = vmax.f32 %v904_v45, 0.0 }
 0x18d   : > { %v910_v55 = vadd.f32 %v909_v54, %v4335_v46  ;;  %v1284_v24 = vmax.f32 %v1017_v53, 0.0  ;;  %v1021_v63 = vadd.f32 %v1020_v58, %v4341_v57  ;;  %v1022_v1 = vpop.f32.mrb[63].mxu1  ;;  %2397 = vmatmul.mubr.bf16.gmra.mrb[152].mxu0 %v1364_v44  ;;  %v1283_v46 = vmax.f32 %v906_v49, 0.0 }
 0x18e   : > { %v1292_v62 = vmax.f32 %v908_v52, 0.0  ;;  %v1285_v3 = vmax.f32 %v1019_v56, 0.0  ;;  %v1023_v26 = vadd.f32 %v1022_v1, %v4344_v61 }
 0x18f   : > { %v1293_v2 = vmax.f32 %v910_v55, 0.0  ;;  %v1294_v5 = vmax.f32 %v1021_v63, 0.0 }
 0x190   : > { %v1372_v4 = vpack.c.bf16 %v1292_v62, %v1282_v41  ;;  %v1295_v6 = vmax.f32 %v1023_v26, 0.0 }
 0x191   : > { %v1373_v18 = vpack.c.bf16 %v1293_v2, %v1283_v46  ;;  %v1059_v7 = vpop.f32.mrb[64].mxu0  ;;  %v1374_v17 = vpack.c.bf16 %v1294_v5, %v1284_v24 }
 0x192   : > { %v1060_v20 = vadd.f32 %v1059_v7, %v4413_v59  ;;  %v1061_v19 = vpop.f32.mrb[65].mxu0  ;;  %v1375_v8 = vpack.c.bf16 %v1295_v6, %v1285_v3 }
 0x193   : > { %v1062_v9 = vadd.f32 %v1061_v19, %v4417_v60  ;;  %v1063_v57 = vpop.f32.mrb[66].mxu0  ;;  %2307 = vmatprep.mubr.bf16.mxu1 %v1373_v18 }
 0x194   : > { %v1064_v10 = vadd.f32 %v1063_v57, %v4413_v59  ;;  %v1065_v11 = vpop.f32.mrb[67].mxu0  ;;  %2308 = vmatmul.mubr.bf16.gmra.mrb[124].mxu1 %v1372_v4  ;;  %2404 = vmatprep.mubr.bf16.mxu0 %v1375_v8  ;;  %v1146_v12 = vmax.f32 %v1060_v20, 0.0 }
 0x195   : > { %v1066_v61 = vadd.f32 %v1065_v11, %v4417_v60  ;;  %2405 = vmatmul.mubr.bf16.gmra.mrb[156].mxu0 %v1374_v17  ;;  %v1147_v14 = vmax.f32 %v1062_v9, 0.0 }
 0x196   : > { %v1156_v13 = vmax.f32 %v1064_v10, 0.0 }
 0x197   : > { %v1157_v15 = vmax.f32 %v1066_v61, 0.0 }
 0x198   : > { %v1306_v16 = vpack.c.bf16 %v1156_v13, %v1146_v12 }
 0x199   : > { %v1307_v21 = vpack.c.bf16 %v1157_v15, %v1147_v14  ;;  %v1069_v22 = vpop.f32.mrb[68].mxu0 }
 0x19a   : > { %v1070_v25 = vadd.f32 %v1069_v22, %v4413_v59  ;;  %v1071_v27 = vpop.f32.mrb[69].mxu0 }
 0x19b   : > { %v1072_v28 = vadd.f32 %v1071_v27, %v4417_v60  ;;  %v1073_v29 = vpop.f32.mrb[70].mxu0  ;;  %2445 = vmatprep.mubr.bf16.mxu1 %v1307_v21 }
 0x19c   : > { %v1074_v30 = vadd.f32 %v1073_v29, %v4413_v59  ;;  %v1075_v31 = vpop.f32.mrb[71].mxu0  ;;  %2446 = vmatmul.mubr.bf16.vlgmr.msra.gmra.mrb[128].mxu1 %v1306_v16  ;;  %v1166_v33 = vmax.f32 %v1070_v25, 0.0 }
 0x19d   : > { %v1076_v32 = vadd.f32 %v1075_v31, %v4417_v60  ;;  %v1167_v35 = vmax.f32 %v1072_v28, 0.0 }
 0x19e   : > { %v1176_v34 = vmax.f32 %v1074_v30, 0.0 }
 0x19f   : > { %v1177_v36 = vmax.f32 %v1076_v32, 0.0 }
 0x1a0   : > { %v1316_v37 = vpack.c.bf16 %v1176_v34, %v1166_v33 }
 0x1a1   : > { %v1317_v38 = vpack.c.bf16 %v1177_v36, %v1167_v35  ;;  %v1079_v39 = vpop.f32.mrb[72].mxu0 }
 0x1a2   : > { %v1080_v40 = vadd.f32 %v1079_v39, %v4413_v59  ;;  %v1081_v42 = vpop.f32.mrb[73].mxu0 }
 0x1a3   : > { %v1082_v43 = vadd.f32 %v1081_v42, %v4417_v60  ;;  %v1083_v44 = vpop.f32.mrb[74].mxu0  ;;  %2453 = vmatprep.mubr.bf16.mxu1 %v1317_v38 }
 0x1a4   : > { %v1084_v45 = vadd.f32 %v1083_v44, %v4413_v59  ;;  %v1085_v0 = vpop.f32.mrb[75].mxu0  ;;  %2454 = vmatmul.mubr.bf16.gmra.mrb[132].mxu1 %v1316_v37  ;;  %v1186_v48 = vmax.f32 %v1080_v40, 0.0 }
 0x1a5   : > { %v1086_v47 = vadd.f32 %v1085_v0, %v4417_v60  ;;  %v1187_v50 = vmax.f32 %v1082_v43, 0.0 }
 0x1a6   : > { %v1196_v49 = vmax.f32 %v1084_v45, 0.0 }
 0x1a7   : > { %v1197_v51 = vmax.f32 %v1086_v47, 0.0 }
 0x1a8   : > { %v1326_v52 = vpack.c.bf16 %v1196_v49, %v1186_v48 }
 0x1a9   : > { %v1327_v53 = vpack.c.bf16 %v1197_v51, %v1187_v50  ;;  %v1089_v54 = vpop.f32.mrb[76].mxu0 }
 0x1aa   : > { %v1090_v23 = vadd.f32 %v1089_v54, %v4413_v59  ;;  %v1091_v55 = vpop.f32.mrb[77].mxu0 }
 0x1ab   : > { %v1092_v56 = vadd.f32 %v1091_v55, %v4417_v60  ;;  %v1093_v58 = vpop.f32.mrb[78].mxu0  ;;  %2461 = vmatprep.mubr.bf16.mxu1 %v1327_v53 }
 0x1ac   : > { %v1094_v41 = vadd.f32 %v1093_v58, %v4413_v59  ;;  %v1095_v62 = vpop.f32.mrb[79].mxu0  ;;  %2462 = vmatmul.mubr.bf16.gmra.mrb[136].mxu1 %v1326_v52  ;;  %v1206_v63 = vmax.f32 %v1090_v23, 0.0 }
 0x1ad   : > { %v1096_v24 = vadd.f32 %v1095_v62, %v4417_v60  ;;  %v1207_v46 = vmax.f32 %v1092_v56, 0.0 }
 0x1ae   : > { %v1216_v1 = vmax.f32 %v1094_v41, 0.0 }
 0x1af   : > { %v1217_v2 = vmax.f32 %v1096_v24, 0.0 }
 0x1b0   : > { %v1336_v3 = vpack.c.bf16 %v1216_v1, %v1206_v63  ;;  %v3769_v63 = vld [vmem:[%s4702_s5] sm:$0xff]   ;;  %v3772_v1 = vld [vmem:[%s4702_s5 + $0x18] sm:$0xff]  }
 0x1b1   : > { %v1337_v26 = vpack.c.bf16 %v1217_v2, %v1207_v46  ;;  %v1099_v4 = vpop.f32.mrb[80].mxu0  ;;  %3540 = vmatprep.subr.bf16.mxu0 %v3769_v63  ;;  %v4468_v2 = vld [vmem:[%s4701_s4] ss:$0 sm:$0xff] }
 0x1b2   : > { %v1100_v5 = vadd.f32 %v1099_v4, %v4413_v59  ;;  %v1101_v18 = vpop.f32.mrb[81].mxu0  ;;  %3541 = vmatpush3.bf16.msra.mxu0 %v3769_v63 }
 0x1b3   : > { %v1102_v6 = vadd.f32 %v1101_v18, %v4417_v60  ;;  %v1103_v7 = vpop.f32.mrb[82].mxu0  ;;  %2469 = vmatprep.mubr.bf16.mxu1 %v1337_v26  ;;  %v3773_v18 = vld [vmem:[%s4702_s5 + $0x20] sm:$0xff]  }
 0x1b4   : > { %v1104_v17 = vadd.f32 %v1103_v7, %v4413_v59  ;;  %v1105_v20 = vpop.f32.mrb[83].mxu0  ;;  %2470 = vmatmul.mubr.bf16.gmra.mrb[140].mxu1 %v1336_v3  ;;  %v1226_v8 = vmax.f32 %v1100_v5, 0.0 }
 0x1b5   : > { %v1106_v19 = vadd.f32 %v1105_v20, %v4417_v60  ;;  %v1227_v57 = vmax.f32 %v1102_v6, 0.0 }
 0x1b6   : > { %v1236_v9 = vmax.f32 %v1104_v17, 0.0 }
 0x1b7   : > { %v1237_v10 = vmax.f32 %v1106_v19, 0.0 }
 0x1b8   : > { %v1346_v11 = vpack.c.bf16 %v1236_v9, %v1226_v8 }
 0x1b9   : > { %v1347_v61 = vpack.c.bf16 %v1237_v10, %v1227_v57  ;;  %v1109_v12 = vpop.f32.mrb[84].mxu0 }
 0x1ba   : > { %v1110_v13 = vadd.f32 %v1109_v12, %v4413_v59  ;;  %v1111_v14 = vpop.f32.mrb[85].mxu0 }
 0x1bb   : > { %v1112_v15 = vadd.f32 %v1111_v14, %v4417_v60  ;;  %v1113_v16 = vpop.f32.mrb[86].mxu0  ;;  %2477 = vmatprep.mubr.bf16.mxu1 %v1347_v61  ;;  %v3774_v61 = vld [vmem:[%s4702_s5 + $0x28] sm:$0xff]  }
 0x1bc   : > { %v1114_v21 = vadd.f32 %v1113_v16, %v4413_v59  ;;  %v1115_v22 = vpop.f32.mrb[87].mxu0  ;;  %2478 = vmatmul.mubr.bf16.gmra.mrb[144].mxu1 %v1346_v11  ;;  %v1246_v27 = vmax.f32 %v1110_v13, 0.0 }
 0x1bd   : > { %v1116_v25 = vadd.f32 %v1115_v22, %v4417_v60  ;;  %v1247_v29 = vmax.f32 %v1112_v15, 0.0  ;;  %v3775_v22 = vld [vmem:[%s4702_s5 + $0x30] sm:$0xff]  }
 0x1be   : > { %v1256_v28 = vmax.f32 %v1114_v21, 0.0 }
 0x1bf   : > { %v1257_v30 = vmax.f32 %v1116_v25, 0.0 }
 0x1c0   : > { %v1356_v31 = vpack.c.bf16 %v1256_v28, %v1246_v27 }
 0x1c1   : > { %v1357_v32 = vpack.c.bf16 %v1257_v30, %v1247_v29  ;;  %v1119_v33 = vpop.f32.mrb[88].mxu0 }
 0x1c2   : > { %v1120_v34 = vadd.f32 %v1119_v33, %v4413_v59  ;;  %v1121_v35 = vpop.f32.mrb[89].mxu0 }
 0x1c3   : > { %v1122_v36 = vadd.f32 %v1121_v35, %v4417_v60  ;;  %v1123_v37 = vpop.f32.mrb[90].mxu0  ;;  %2485 = vmatprep.mubr.bf16.mxu1 %v1357_v32 }
 0x1c4   : > { %v1124_v38 = vadd.f32 %v1123_v37, %v4413_v59  ;;  %v1125_v39 = vpop.f32.mrb[91].mxu0  ;;  %2486 = vmatmul.mubr.bf16.gmra.mrb[148].mxu1 %v1356_v31  ;;  %v1266_v42 = vmax.f32 %v1120_v34, 0.0 }
 0x1c5   : > { %v1126_v40 = vadd.f32 %v1125_v39, %v4417_v60  ;;  %v1267_v44 = vmax.f32 %v1122_v36, 0.0  ;;  %v3776_v36 = vld [vmem:[%s4702_s5 + $0x38] sm:$0xff]  }
 0x1c6   : > { %v1276_v43 = vmax.f32 %v1124_v38, 0.0 }
 0x1c7   : > { %v1277_v45 = vmax.f32 %v1126_v40, 0.0 }
 0x1c8   : > { %v1366_v0 = vpack.c.bf16 %v1276_v43, %v1266_v42 }
 0x1c9   : > { %v1367_v47 = vpack.c.bf16 %v1277_v45, %v1267_v44  ;;  %v1129_v48 = vpop.f32.mrb[92].mxu0 }
 0x1ca   : > { %v1130_v49 = vadd.f32 %v1129_v48, %v4413_v59  ;;  %v1131_v50 = vpop.f32.mrb[93].mxu0 }
 0x1cb   : > { %v1132_v51 = vadd.f32 %v1131_v50, %v4417_v60  ;;  %v1133_v52 = vpop.f32.mrb[94].mxu0  ;;  %2493 = vmatprep.mubr.bf16.mxu1 %v1367_v47 }
 0x1cc   : > { %v1134_v53 = vadd.f32 %v1133_v52, %v4413_v59  ;;  %v1135_v54 = vpop.f32.mrb[95].mxu0  ;;  %2494 = vmatmul.mubr.bf16.gmra.mrb[152].mxu1 %v1366_v0  ;;  %v1286_v55 = vmax.f32 %v1130_v49, 0.0  ;;  %v3770_v59 = vld [vmem:[%s4702_s5 + $0x8] sm:$0xff]  }
 0x1cd   : > { %v1136_v23 = vadd.f32 %v1135_v54, %v4417_v60  ;;  %v1287_v58 = vmax.f32 %v1132_v51, 0.0  ;;  %3542 = vmatprep.subr.bf16.mxu0 %v3770_v59  ;;  %v3771_v60 = vld [vmem:[%s4702_s5 + $0x10] sm:$0xff]  }
 0x1ce   : > { %v1296_v56 = vmax.f32 %v1134_v53, 0.0  ;;  %3543 = vmatpush3.bf16.msra.mxu0 %v3770_v59 }
 0x1cf   : > { %v1297_v41 = vmax.f32 %v1136_v23, 0.0  ;;  %3544 = vmatprep.subr.bf16.mxu0 %v3771_v60 }
 0x1d0   : > { %v1376_v62 = vpack.c.bf16 %v1296_v56, %v1286_v55 }
 0x1d1   : > { %v1377_v24 = vpack.c.bf16 %v1297_v41, %v1287_v58 }
 0x1d2   : > { %3545 = vmatpush3.bf16.msra.mxu0 %v3771_v60 }
 0x1d3   : > { %2501 = vmatprep.mubr.bf16.mxu1 %v1377_v24  ;;  %3546 = vmatprep.subr.bf16.mxu0 %v3772_v1 }
 0x1d4   : > { %2502 = vmatmul.mubr.bf16.gmra.mrb[156].mxu1 %v1376_v62 }
 0x1d6   : > { %3547 = vmatpush3.bf16.msra.mxu0 %v3772_v1 }
 0x1d7   : > { %3548 = vmatprep.subr.bf16.mxu0 %v3773_v18 }
 0x1da   : > { %3549 = vmatpush3.bf16.msra.mxu0 %v3773_v18 }
 0x1db   : > { %3550 = vmatprep.subr.bf16.mxu0 %v3774_v61 }
 0x1de   : > { %3551 = vmatpush3.bf16.msra.mxu0 %v3774_v61 }
 0x1df   : > { %3552 = vmatprep.subr.bf16.mxu0 %v3775_v22 }
 0x1e2   : > { %3553 = vmatpush3.bf16.msra.mxu0 %v3775_v22 }
 0x1e3   : > { %3554 = vmatprep.subr.bf16.mxu0 %v3776_v36 }
 0x1e6   : > { %3555 = vmatpush3.bf16.msra.mxu0 %v3776_v36 }
 0x1ef   : > { %v3204_v46 = vpop.f32.mrb[64].mxu1  ;;  %v3268_v5 = vpop.f32.mrb[96].mxu0 }
 0x1f0   : > { %v3205_v3 = vpop.f32.mrb[65].mxu1  ;;  %v3269_v7 = vpop.f32.mrb[97].mxu0 }
 0x1f1   : > { %v3206_v26 = vadd.f32 %v3205_v3, %v3204_v46  ;;  %v3207_v4 = vpop.f32.mrb[66].mxu1  ;;  %v3270_v19 = vadd.f32 %v3269_v7, %v3268_v5  ;;  %v3271_v8 = vpop.f32.mrb[98].mxu0 }
 0x1f2   : > { %v3208_v6 = vpop.f32.mrb[67].mxu1  ;;  %v3272_v9 = vpop.f32.mrb[99].mxu0 }
 0x1f3   : > { %v2060_v17 = vadd.f32 %v3206_v26, %v4468_v2  ;;  %v3209_v20 = vadd.f32 %v3208_v6, %v3207_v4  ;;  %v3273_v11 = vadd.f32 %v3272_v9, %v3271_v8 }
 0x1f5   : > { %v2063_v57 = vadd.f32 %v3209_v20, %v4468_v2  ;;  %v4475_v10 = vadd.f32 %v3270_v19, %v2060_v17 }
 0x1f7   : > { %v4480_v12 = vadd.f32 %v3273_v11, %v2063_v57  ;;  %v3210_v13 = vpop.f32.mrb[68].mxu1  ;;  %v3274_v21 = vpop.f32.mrb[100].mxu0 }
 0x1f8   : > { %v3211_v14 = vpop.f32.mrb[69].mxu1  ;;  %v3275_v27 = vpop.f32.mrb[101].mxu0 }
 0x1f9   : > { %v3212_v15 = vadd.f32 %v3211_v14, %v3210_v13  ;;  %v3213_v16 = vpop.f32.mrb[70].mxu1  ;;  %v3276_v30 = vadd.f32 %v3275_v27, %v3274_v21  ;;  %v3277_v31 = vpop.f32.mrb[102].mxu0 }
 0x1fa   : > { %v3214_v25 = vpop.f32.mrb[71].mxu1  ;;  %v3278_v32 = vpop.f32.mrb[103].mxu0 }
 0x1fb   : > { %v2068_v28 = vadd.f32 %v3212_v15, %v4468_v2  ;;  %v3215_v29 = vadd.f32 %v3214_v25, %v3213_v16  ;;  %v3279_v35 = vadd.f32 %v3278_v32, %v3277_v31 }
 0x1fd   : > { %v2071_v33 = vadd.f32 %v3215_v29, %v4468_v2  ;;  %v4487_v34 = vadd.f32 %v3276_v30, %v2068_v28 }
 0x1ff   : > { %v4492_v37 = vadd.f32 %v3279_v35, %v2071_v33  ;;  %v3216_v38 = vpop.f32.mrb[72].mxu1  ;;  %v3280_v43 = vpop.f32.mrb[104].mxu0 }
 0x200   : > { %v3217_v39 = vpop.f32.mrb[73].mxu1  ;;  %v3281_v45 = vpop.f32.mrb[105].mxu0 }
 0x201   : > { %v3218_v40 = vadd.f32 %v3217_v39, %v3216_v38  ;;  %v3219_v42 = vpop.f32.mrb[74].mxu1  ;;  %v3282_v48 = vadd.f32 %v3281_v45, %v3280_v43  ;;  %v3283_v49 = vpop.f32.mrb[106].mxu0 }
 0x202   : > { %v3220_v44 = vpop.f32.mrb[75].mxu1  ;;  %v3284_v50 = vpop.f32.mrb[107].mxu0 }
 0x203   : > { %v2076_v0 = vadd.f32 %v3218_v40, %v4468_v2  ;;  %v3221_v47 = vadd.f32 %v3220_v44, %v3219_v42  ;;  %v3285_v53 = vadd.f32 %v3284_v50, %v3283_v49 }
 0x205   : > { %v2079_v51 = vadd.f32 %v3221_v47, %v4468_v2  ;;  %v4496_v52 = vadd.f32 %v3282_v48, %v2076_v0 }
 0x207   : > { %v4498_v54 = vadd.f32 %v3285_v53, %v2079_v51  ;;  %v3222_v23 = vpop.f32.mrb[76].mxu1  ;;  %v3286_v41 = vpop.f32.mrb[108].mxu0 }
 0x208   : > { %v3223_v55 = vpop.f32.mrb[77].mxu1  ;;  %v3287_v24 = vpop.f32.mrb[109].mxu0 }
 0x209   : > { %v3224_v56 = vadd.f32 %v3223_v55, %v3222_v23  ;;  %v3225_v58 = vpop.f32.mrb[78].mxu1  ;;  %v3288_v60 = vadd.f32 %v3287_v24, %v3286_v41  ;;  %v3289_v1 = vpop.f32.mrb[110].mxu0 }
 0x20a   : > { %v3226_v62 = vpop.f32.mrb[79].mxu1  ;;  %v3290_v46 = vpop.f32.mrb[111].mxu0 }
 0x20b   : > { %v2084_v63 = vadd.f32 %v3224_v56, %v4468_v2  ;;  %v3227_v59 = vadd.f32 %v3226_v62, %v3225_v58  ;;  %v3291_v4 = vadd.f32 %v3290_v46, %v3289_v1 }
 0x20d   : > { %v2087_v3 = vadd.f32 %v3227_v59, %v4468_v2  ;;  %v4502_v26 = vadd.f32 %v3288_v60, %v2084_v63 }
 0x20f   : > { %v4504_v5 = vadd.f32 %v3291_v4, %v2087_v3  ;;  %v3228_v18 = vpop.f32.mrb[80].mxu1  ;;  %v3292_v20 = vpop.f32.mrb[112].mxu0 }
 0x210   : > { %v3229_v6 = vpop.f32.mrb[81].mxu1  ;;  %v3293_v8 = vpop.f32.mrb[113].mxu0 }
 0x211   : > { %v3230_v7 = vadd.f32 %v3229_v6, %v3228_v18  ;;  %v3231_v17 = vpop.f32.mrb[82].mxu1  ;;  %v3294_v11 = vadd.f32 %v3293_v8, %v3292_v20  ;;  %v3295_v61 = vpop.f32.mrb[114].mxu0 }
 0x212   : > { %v3232_v19 = vpop.f32.mrb[83].mxu1  ;;  %v3296_v13 = vpop.f32.mrb[115].mxu0 }
 0x213   : > { %v2092_v9 = vadd.f32 %v3230_v7, %v4468_v2  ;;  %v3233_v57 = vadd.f32 %v3232_v19, %v3231_v17  ;;  %v3297_v16 = vadd.f32 %v3296_v13, %v3295_v61 }
 0x215   : > { %v2095_v14 = vadd.f32 %v3233_v57, %v4468_v2  ;;  %v4508_v15 = vadd.f32 %v3294_v11, %v2092_v9 }
 0x217   : > { %v4510_v21 = vadd.f32 %v3297_v16, %v2095_v14  ;;  %v3234_v22 = vpop.f32.mrb[84].mxu1  ;;  %v3298_v29 = vpop.f32.mrb[116].mxu0 }
 0x218   : > { %v3235_v25 = vpop.f32.mrb[85].mxu1  ;;  %v3299_v31 = vpop.f32.mrb[117].mxu0 }
 0x219   : > { %v3236_v27 = vadd.f32 %v3235_v25, %v3234_v22  ;;  %v3237_v28 = vpop.f32.mrb[86].mxu1  ;;  %v3300_v35 = vadd.f32 %v3299_v31, %v3298_v29  ;;  %v3301_v36 = vpop.f32.mrb[118].mxu0  ;;  %v3778_v31 = vld [vmem:[%s4704_s7 + $0x8] sm:$0xff]  }
 0x21a   : > { %v3238_v30 = vpop.f32.mrb[87].mxu1  ;;  %v3302_v38 = vpop.f32.mrb[119].mxu0 }
 0x21b   : > { %v2100_v32 = vadd.f32 %v3236_v27, %v4468_v2  ;;  %v3239_v33 = vadd.f32 %v3238_v30, %v3237_v28  ;;  %v3303_v42 = vadd.f32 %v3302_v38, %v3301_v36 }
 0x21d   : > { %v2103_v39 = vadd.f32 %v3239_v33, %v4468_v2  ;;  %v4514_v40 = vadd.f32 %v3300_v35, %v2100_v32 }
 0x21f   : > { %v4516_v43 = vadd.f32 %v3303_v42, %v2103_v39  ;;  %v3240_v44 = vpop.f32.mrb[88].mxu1  ;;  %v3304_v48 = vpop.f32.mrb[120].mxu0  ;;  %v3779_v39 = vld [vmem:[%s4704_s7 + $0x10] sm:$0xff]  }
 0x220   : > { %v3241_v45 = vpop.f32.mrb[89].mxu1  ;;  %v3305_v50 = vpop.f32.mrb[121].mxu0 }
 0x221   : > { %v3242_v0 = vadd.f32 %v3241_v45, %v3240_v44  ;;  %v3243_v47 = vpop.f32.mrb[90].mxu1  ;;  %v3306_v23 = vadd.f32 %v3305_v50, %v3304_v48  ;;  %v3307_v55 = vpop.f32.mrb[122].mxu0 }
 0x222   : > { %v3244_v49 = vpop.f32.mrb[91].mxu1  ;;  %v3308_v56 = vpop.f32.mrb[123].mxu0 }
 0x223   : > { %v2108_v51 = vadd.f32 %v3242_v0, %v4468_v2  ;;  %v3245_v53 = vadd.f32 %v3244_v49, %v3243_v47  ;;  %v3309_v62 = vadd.f32 %v3308_v56, %v3307_v55 }
 0x225   : > { %v2111_v58 = vadd.f32 %v3245_v53, %v4468_v2  ;;  %v4520_v41 = vadd.f32 %v3306_v23, %v2108_v51  ;;  %v3780_v53 = vld [vmem:[%s4704_s7 + $0x18] sm:$0xff]  }
 0x227   : > { %v4522_v24 = vadd.f32 %v3309_v62, %v2111_v58  ;;  %v3246_v63 = vpop.f32.mrb[92].mxu1 }
 0x228   : > { %v3247_v59 = vpop.f32.mrb[93].mxu1  ;;  %v3310_v46 = vpop.f32.mrb[124].mxu0 }
 0x229   : > { %v3248_v60 = vadd.f32 %v3247_v59, %v3246_v63  ;;  %v3249_v1 = vpop.f32.mrb[94].mxu1  ;;  %v3311_v4 = vpop.f32.mrb[125].mxu0 }
 0x22a   : > { %v3250_v3 = vpop.f32.mrb[95].mxu1  ;;  %v3312_v7 = vadd.f32 %v3311_v4, %v3310_v46  ;;  %v3313_v17 = vpop.f32.mrb[126].mxu0 }
 0x22b   : > { %v2116_v18 = vadd.f32 %v3248_v60, %v4468_v2  ;;  %v3251_v6 = vadd.f32 %v3250_v3, %v3249_v1  ;;  %v3314_v20 = vpop.f32.mrb[127].mxu0 }
 0x22c   : > { %v3315_v9 = vadd.f32 %v3314_v20, %v3313_v17  ;;  %v3782_v17 = vld [vmem:[%s4704_s7 + $0x28] sm:$0xff]  }
 0x22d   : > { %v2119_v19 = vadd.f32 %v3251_v6, %v4468_v2  ;;  %v4526_v8 = vadd.f32 %v3312_v7, %v2116_v18  ;;  %v3777_v2 = vld [vmem:[%s4704_s7] sm:$0xff]  }
 0x22e   : > { %3572 = vmatprep.subr.bf16.mxu1 %v3777_v2 }
 0x22f   : > { %v4528_v57 = vadd.f32 %v3315_v9, %v2119_v19  ;;  %v3332_v11 = vpop.f32.mrb[96].mxu1  ;;  %3573 = vmatpush3.bf16.msra.mxu1 %v3777_v2 }
 0x230   : > { %v3333_v61 = vpop.f32.mrb[97].mxu1  ;;  %v3396_v16 = vpop.f32.mrb[128].mxu0  ;;  %3574 = vmatprep.subr.bf16.mxu1 %v3778_v31 }
 0x231   : > { %v3334_v13 = vadd.f32 %v3333_v61, %v3332_v11  ;;  %v3335_v14 = vpop.f32.mrb[98].mxu1  ;;  %v3397_v25 = vpop.f32.mrb[129].mxu0 }
 0x232   : > { %v3336_v22 = vpop.f32.mrb[99].mxu1  ;;  %v3398_v29 = vadd.f32 %v3397_v25, %v3396_v16  ;;  %v3399_v30 = vpop.f32.mrb[130].mxu0 }
 0x233   : > { %v2254_v27 = vadd.f32 %v3334_v13, %v4475_v10  ;;  %v3337_v28 = vadd.f32 %v3336_v22, %v3335_v14  ;;  %v3400_v32 = vpop.f32.mrb[131].mxu0  ;;  %3575 = vmatpush3.bf16.msra.mxu1 %v3778_v31 }
 0x234   : > { %v3401_v36 = vadd.f32 %v3400_v32, %v3399_v30  ;;  %3576 = vmatprep.subr.bf16.mxu1 %v3779_v39 }
 0x235   : > { %v2257_v33 = vadd.f32 %v3337_v28, %v4480_v12  ;;  %v4538_v35 = vadd.f32 %v3398_v29, %v2254_v27 }
 0x237   : > { %v4540_v10 = vadd.f32 %v3401_v36, %v2257_v33  ;;  %v3338_v38 = vpop.f32.mrb[100].mxu1  ;;  %3577 = vmatpush3.bf16.msra.mxu1 %v3779_v39 }
 0x238   : > { %v3339_v42 = vpop.f32.mrb[101].mxu1  ;;  %v3402_v0 = vpop.f32.mrb[132].mxu0  ;;  %3578 = vmatprep.subr.bf16.mxu1 %v3780_v53 }
 0x239   : > { %v3340_v44 = vadd.f32 %v3339_v42, %v3338_v38  ;;  %v3341_v45 = vpop.f32.mrb[102].mxu1  ;;  %v3403_v48 = vpop.f32.mrb[133].mxu0 }
 0x23a   : > { %v3342_v47 = vpop.f32.mrb[103].mxu1  ;;  %v3404_v50 = vadd.f32 %v3403_v48, %v3402_v0  ;;  %v3405_v51 = vpop.f32.mrb[134].mxu0 }
 0x23b   : > { %v2262_v12 = vadd.f32 %v3340_v44, %v4487_v34  ;;  %v3343_v49 = vadd.f32 %v3342_v47, %v3341_v45  ;;  %v3406_v23 = vpop.f32.mrb[135].mxu0  ;;  %v3781_v34 = vld [vmem:[%s4704_s7 + $0x20] sm:$0xff]   ;;  %3579 = vmatpush3.bf16.msra.mxu1 %v3780_v53 }
 0x23c   : > { %v3407_v58 = vadd.f32 %v3406_v23, %v3405_v51  ;;  %3580 = vmatprep.subr.bf16.mxu1 %v3781_v34 }
 0x23d   : > { %v2265_v55 = vadd.f32 %v3343_v49, %v4492_v37  ;;  %v4550_v56 = vadd.f32 %v3404_v50, %v2262_v12 }
 0x23f   : > { %v4552_v62 = vadd.f32 %v3407_v58, %v2265_v55  ;;  %v3344_v63 = vpop.f32.mrb[104].mxu1  ;;  %3581 = vmatpush3.bf16.msra.mxu1 %v3781_v34 }
 0x240   : > { %v3345_v59 = vpop.f32.mrb[105].mxu1  ;;  %v3408_v46 = vpop.f32.mrb[136].mxu0  ;;  %3582 = vmatprep.subr.bf16.mxu1 %v3782_v17 }
 0x241   : > { %v3346_v60 = vadd.f32 %v3345_v59, %v3344_v63  ;;  %v3347_v1 = vpop.f32.mrb[106].mxu1  ;;  %v3409_v4 = vpop.f32.mrb[137].mxu0 }
 0x242   : > { %v3348_v3 = vpop.f32.mrb[107].mxu1  ;;  %v3410_v6 = vadd.f32 %v3409_v4, %v3408_v46  ;;  %v3411_v7 = vpop.f32.mrb[138].mxu0 }
 0x243   : > { %v2270_v37 = vadd.f32 %v3346_v60, %v4496_v52  ;;  %v3349_v18 = vadd.f32 %v3348_v3, %v3347_v1  ;;  %v3412_v20 = vpop.f32.mrb[139].mxu0  ;;  %3583 = vmatpush3.bf16.msra.mxu1 %v3782_v17 }
 0x244   : > { %v3413_v11 = vadd.f32 %v3412_v20, %v3411_v7 }
 0x245   : > { %v2273_v19 = vadd.f32 %v3349_v18, %v4498_v54  ;;  %v4562_v9 = vadd.f32 %v3410_v6, %v2270_v37 }
 0x247   : > { %v4564_v61 = vadd.f32 %v3413_v11, %v2273_v19  ;;  %v3350_v13 = vpop.f32.mrb[108].mxu1 }
 0x248   : > { %v3351_v52 = vpop.f32.mrb[109].mxu1  ;;  %v3414_v22 = vpop.f32.mrb[140].mxu0 }
 0x249   : > { %v3352_v14 = vadd.f32 %v3351_v52, %v3350_v13  ;;  %v3353_v16 = vpop.f32.mrb[110].mxu1  ;;  %v3415_v27 = vpop.f32.mrb[141].mxu0 }
 0x24a   : > { %v3354_v25 = vpop.f32.mrb[111].mxu1  ;;  %v3416_v30 = vadd.f32 %v3415_v27, %v3414_v22  ;;  %v3417_v54 = vpop.f32.mrb[142].mxu0 }
 0x24b   : > { %v2278_v28 = vadd.f32 %v3352_v14, %v4502_v26  ;;  %v3355_v29 = vadd.f32 %v3354_v25, %v3353_v16  ;;  %v3418_v2 = vpop.f32.mrb[143].mxu0 }
 0x24c   : > { %v3419_v33 = vadd.f32 %v3418_v2, %v3417_v54 }
 0x24d   : > { %v2281_v31 = vadd.f32 %v3355_v29, %v4504_v5  ;;  %v4568_v32 = vadd.f32 %v3416_v30, %v2278_v28 }
 0x24f   : > { %v4570_v36 = vadd.f32 %v3419_v33, %v2281_v31  ;;  %v3356_v38 = vpop.f32.mrb[112].mxu1 }
 0x250   : > { %v3357_v39 = vpop.f32.mrb[113].mxu1  ;;  %v3420_v45 = vpop.f32.mrb[144].mxu0 }
 0x251   : > { %v3358_v42 = vadd.f32 %v3357_v39, %v3356_v38  ;;  %v3359_v44 = vpop.f32.mrb[114].mxu1  ;;  %v3421_v47 = vpop.f32.mrb[145].mxu0 }
 0x252   : > { %v3360_v0 = vpop.f32.mrb[115].mxu1  ;;  %v3422_v12 = vadd.f32 %v3421_v47, %v3420_v45  ;;  %v3423_v49 = vpop.f32.mrb[146].mxu0 }
 0x253   : > { %v2286_v26 = vadd.f32 %v3358_v42, %v4508_v15  ;;  %v3361_v48 = vadd.f32 %v3360_v0, %v3359_v44  ;;  %v3424_v50 = vpop.f32.mrb[147].mxu0 }
 0x254   : > { %v3425_v53 = vadd.f32 %v3424_v50, %v3423_v49 }
 0x255   : > { %v2289_v5 = vadd.f32 %v3361_v48, %v4510_v21  ;;  %v4574_v51 = vadd.f32 %v3422_v12, %v2286_v26 }
 0x257   : > { %v4576_v23 = vadd.f32 %v3425_v53, %v2289_v5  ;;  %v3362_v55 = vpop.f32.mrb[116].mxu1 }
 0x258   : > { %v3363_v58 = vpop.f32.mrb[117].mxu1  ;;  %v3426_v59 = vpop.f32.mrb[148].mxu0 }
 0x259   : > { %v3364_v63 = vadd.f32 %v3363_v58, %v3362_v55  ;;  %v3365_v34 = vpop.f32.mrb[118].mxu1  ;;  %v3427_v1 = vpop.f32.mrb[149].mxu0 }
 0x25a   : > { %v3366_v60 = vpop.f32.mrb[119].mxu1  ;;  %v3428_v3 = vadd.f32 %v3427_v1, %v3426_v59  ;;  %v3429_v4 = vpop.f32.mrb[150].mxu0 }
 0x25b   : > { %v2294_v15 = vadd.f32 %v3364_v63, %v4514_v40  ;;  %v3367_v46 = vadd.f32 %v3366_v60, %v3365_v34  ;;  %v3430_v37 = vpop.f32.mrb[151].mxu0 }
 0x25c   : > { %v3431_v6 = vadd.f32 %v3430_v37, %v3429_v4 }
 0x25d   : > { %v2297_v21 = vadd.f32 %v3367_v46, %v4516_v43  ;;  %v4580_v18 = vadd.f32 %v3428_v3, %v2294_v15 }
 0x25f   : > { %v4582_v7 = vadd.f32 %v3431_v6, %v2297_v21  ;;  %v3368_v17 = vpop.f32.mrb[120].mxu1 }
 0x260   : > { %v3369_v20 = vpop.f32.mrb[121].mxu1  ;;  %v3432_v13 = vpop.f32.mrb[152].mxu0 }
 0x261   : > { %v3370_v19 = vadd.f32 %v3369_v20, %v3368_v17  ;;  %v3371_v11 = vpop.f32.mrb[122].mxu1  ;;  %v3433_v14 = vpop.f32.mrb[153].mxu0 }
 0x262   : > { %v3372_v52 = vpop.f32.mrb[123].mxu1  ;;  %v3434_v22 = vadd.f32 %v3433_v14, %v3432_v13  ;;  %v3435_v25 = vpop.f32.mrb[154].mxu0 }
 0x263   : > { %v2302_v40 = vadd.f32 %v3370_v19, %v4520_v41  ;;  %v3373_v16 = vadd.f32 %v3372_v52, %v3371_v11  ;;  %v3436_v27 = vpop.f32.mrb[155].mxu0 }
 0x264   : > { %v3437_v29 = vadd.f32 %v3436_v27, %v3435_v25 }
 0x265   : > { %v2305_v43 = vadd.f32 %v3373_v16, %v4522_v24  ;;  %v4586_v28 = vadd.f32 %v3434_v22, %v2302_v40 }
 0x267   : > { %v4588_v30 = vadd.f32 %v3437_v29, %v2305_v43  ;;  %v3374_v54 = vpop.f32.mrb[124].mxu1 }
 0x268   : > { %v3375_v2 = vpop.f32.mrb[125].mxu1  ;;  %v3438_v38 = vpop.f32.mrb[156].mxu0 }
 0x269   : > { %v3376_v31 = vadd.f32 %v3375_v2, %v3374_v54  ;;  %v3377_v33 = vpop.f32.mrb[126].mxu1  ;;  %v3439_v42 = vpop.f32.mrb[157].mxu0 }
 0x26a   : > { %v3378_v39 = vpop.f32.mrb[127].mxu1  ;;  %v3440_v45 = vadd.f32 %v3439_v42, %v3438_v38  ;;  %v3441_v0 = vpop.f32.mrb[158].mxu0 }
 0x26b   : > { %v2310_v41 = vadd.f32 %v3376_v31, %v4526_v8  ;;  %v3379_v44 = vadd.f32 %v3378_v39, %v3377_v33  ;;  %v3442_v47 = vpop.f32.mrb[159].mxu0 }
 0x26c   : > { %v3443_v48 = vadd.f32 %v3442_v47, %v3441_v0 }
 0x26d   : > { %v2313_v24 = vadd.f32 %v3379_v44, %v4528_v57  ;;  %v4592_v26 = vadd.f32 %v3440_v45, %v2310_v41 }
 0x26f   : > { %v4594_v12 = vadd.f32 %v3443_v48, %v2313_v24  ;;  %v3460_v49 = vpop.f32.mrb[128].mxu1 }
 0x270   : > { %v3461_v50 = vpop.f32.mrb[129].mxu1 }
 0x271   : > { %v3462_v5 = vadd.f32 %v3461_v50, %v3460_v49  ;;  %v3463_v53 = vpop.f32.mrb[130].mxu1 }
 0x272   : > { %v3464_v55 = vpop.f32.mrb[131].mxu1 }
 0x273   : > { %v2448_v58 = vadd.f32 %v3462_v5, %v4538_v35  ;;  %v3465_v63 = vadd.f32 %v3464_v55, %v3463_v53 }
 0x275   : > { %v2451_v8 = vadd.f32 %v3465_v63, %v4540_v10  ;;  %v2510_v34 = vmax.f32 %v2448_v58, 0.0 }
 0x277   : > { %v2511_v59 = vmax.f32 %v2451_v8, 0.0  ;;  %v3466_v60 = vpop.f32.mrb[132].mxu1 }
 0x278   : > { %v3467_v1 = vpop.f32.mrb[133].mxu1 }
 0x279   : > { %v3468_v57 = vadd.f32 %v3467_v1, %v3466_v60  ;;  %v3469_v15 = vpop.f32.mrb[134].mxu1  ;;  %v2526_v46 = vpack.c.bf16 %v2511_v59, %v2510_v34 }
 0x27a   : > { %v3470_v3 = vpop.f32.mrb[135].mxu1 }
 0x27b   : > { %v2456_v4 = vadd.f32 %v3468_v57, %v4550_v56  ;;  %v3471_v37 = vadd.f32 %v3470_v3, %v3469_v15  ;;  %3556 = vmatprep.mubr.bf16.mxu0 %v2526_v46 }
 0x27d   : > { %v2459_v21 = vadd.f32 %v3471_v37, %v4552_v62  ;;  %v2512_v6 = vmax.f32 %v2456_v4, 0.0 }
 0x27f   : > { %v2513_v17 = vmax.f32 %v2459_v21, 0.0  ;;  %v3472_v35 = vpop.f32.mrb[136].mxu1 }
 0x280   : > { %v3473_v20 = vpop.f32.mrb[137].mxu1 }
 0x281   : > { %v2527_v19 = vpack.c.bf16 %v2513_v17, %v2512_v6  ;;  %v3474_v10 = vadd.f32 %v3473_v20, %v3472_v35  ;;  %v3475_v11 = vpop.f32.mrb[138].mxu1 }
 0x282   : > { %v3476_v13 = vpop.f32.mrb[139].mxu1 }
 0x283   : > { %v2464_v52 = vadd.f32 %v3474_v10, %v4562_v9  ;;  %v3477_v14 = vadd.f32 %v3476_v13, %v3475_v11  ;;  %3557 = vmatmul.mubr.bf16.vlgmr.msra.gmra.mrb[160].mxu0 %v2527_v19 }
 0x285   : > { %v2467_v40 = vadd.f32 %v3477_v14, %v4564_v61  ;;  %v2514_v16 = vmax.f32 %v2464_v52, 0.0  ;;  %v3784_v52 = vld [vmem:[%s4704_s7 + $0x38] sm:$0xff]  }
 0x287   : > { %v2515_v56 = vmax.f32 %v2467_v40, 0.0  ;;  %v3478_v22 = vpop.f32.mrb[140].mxu1 }
 0x288   : > { %v3479_v25 = vpop.f32.mrb[141].mxu1 }
 0x289   : > { %v3480_v27 = vadd.f32 %v3479_v25, %v3478_v22  ;;  %v3481_v62 = vpop.f32.mrb[142].mxu1  ;;  %v2528_v43 = vpack.c.bf16 %v2515_v56, %v2514_v16 }
 0x28a   : > { %v3482_v29 = vpop.f32.mrb[143].mxu1 }
 0x28b   : > { %v2472_v54 = vadd.f32 %v3480_v27, %v4568_v32  ;;  %v3483_v2 = vadd.f32 %v3482_v29, %v3481_v62  ;;  %3560 = vmatprep.mubr.bf16.mxu0 %v2528_v43 }
 0x28d   : > { %v2475_v31 = vadd.f32 %v3483_v2, %v4570_v36  ;;  %v2516_v33 = vmax.f32 %v2472_v54, 0.0 }
 0x28f   : > { %v2517_v9 = vmax.f32 %v2475_v31, 0.0  ;;  %v3484_v38 = vpop.f32.mrb[144].mxu1 }
 0x290   : > { %v3485_v39 = vpop.f32.mrb[145].mxu1 }
 0x291   : > { %v3486_v42 = vadd.f32 %v3485_v39, %v3484_v38  ;;  %v3487_v61 = vpop.f32.mrb[146].mxu1  ;;  %v2529_v41 = vpack.c.bf16 %v2517_v9, %v2516_v33 }
 0x292   : > { %v3488_v44 = vpop.f32.mrb[147].mxu1 }
 0x293   : > { %v2480_v45 = vadd.f32 %v3486_v42, %v4574_v51  ;;  %v3489_v0 = vadd.f32 %v3488_v44, %v3487_v61  ;;  %3561 = vmatmul.mubr.bf16.gmra.mrb[164].mxu0 %v2529_v41 }
 0x295   : > { %v2483_v47 = vadd.f32 %v3489_v0, %v4576_v23  ;;  %v2518_v24 = vmax.f32 %v2480_v45, 0.0 }
 0x297   : > { %v2519_v32 = vmax.f32 %v2483_v47, 0.0  ;;  %v3490_v48 = vpop.f32.mrb[148].mxu1 }
 0x298   : > { %v3491_v49 = vpop.f32.mrb[149].mxu1 }
 0x299   : > { %v3492_v50 = vadd.f32 %v3491_v49, %v3490_v48  ;;  %v3493_v36 = vpop.f32.mrb[150].mxu1  ;;  %v2530_v5 = vpack.c.bf16 %v2519_v32, %v2518_v24 }
 0x29a   : > { %v3494_v53 = vpop.f32.mrb[151].mxu1 }
 0x29b   : > { %v2488_v55 = vadd.f32 %v3492_v50, %v4580_v18  ;;  %v3495_v58 = vadd.f32 %v3494_v53, %v3493_v36  ;;  %3564 = vmatprep.mubr.bf16.mxu0 %v2530_v5 }
 0x29d   : > { %v2491_v63 = vadd.f32 %v3495_v58, %v4582_v7  ;;  %v2520_v8 = vmax.f32 %v2488_v55, 0.0 }
 0x29f   : > { %v2521_v51 = vmax.f32 %v2491_v63, 0.0  ;;  %v3496_v34 = vpop.f32.mrb[152].mxu1 }
 0x2a0   : > { %v3497_v59 = vpop.f32.mrb[153].mxu1 }
 0x2a1   : > { %v3498_v60 = vadd.f32 %v3497_v59, %v3496_v34  ;;  %v3499_v23 = vpop.f32.mrb[154].mxu1  ;;  %v2531_v1 = vpack.c.bf16 %v2521_v51, %v2520_v8 }
 0x2a2   : > { %v3500_v57 = vpop.f32.mrb[155].mxu1 }
 0x2a3   : > { %v2496_v15 = vadd.f32 %v3498_v60, %v4586_v28  ;;  %v3501_v46 = vadd.f32 %v3500_v57, %v3499_v23  ;;  %3565 = vmatmul.mubr.bf16.gmra.mrb[168].mxu0 %v2531_v1 }
 0x2a5   : > { %v2499_v3 = vadd.f32 %v3501_v46, %v4588_v30  ;;  %v2522_v4 = vmax.f32 %v2496_v15, 0.0  ;;  %v3783_v30 = vld [vmem:[%s4704_s7 + $0x30] sm:$0xff]  }
 0x2a6   : > { %3584 = vmatprep.subr.bf16.mxu1 %v3783_v30 }
 0x2a7   : > { %v2523_v18 = vmax.f32 %v2499_v3, 0.0  ;;  %v3502_v37 = vpop.f32.mrb[156].mxu1  ;;  %3585 = vmatpush3.bf16.msra.mxu1 %v3783_v30 }
 0x2a8   : > { %v3503_v21 = vpop.f32.mrb[157].mxu1  ;;  %3586 = vmatprep.subr.bf16.mxu1 %v3784_v52 }
 0x2a9   : > { %v3504_v6 = vadd.f32 %v3503_v21, %v3502_v37  ;;  %v3505_v7 = vpop.f32.mrb[158].mxu1  ;;  %v2532_v17 = vpack.c.bf16 %v2523_v18, %v2522_v4 }
 0x2aa   : > { %v3506_v35 = vpop.f32.mrb[159].mxu1 }
 0x2ab   : > { %v2504_v20 = vadd.f32 %v3504_v6, %v4592_v26  ;;  %v3507_v19 = vadd.f32 %v3506_v35, %v3505_v7  ;;  %3568 = vmatprep.mubr.bf16.mxu0 %v2532_v17  ;;  %3587 = vmatpush3.bf16.msra.mxu1 %v3784_v52  ;;  %v3164_v26 = vld [vmem:[%s4703_s6] ss:$0 sm:$0xff] }
 0x2ad   : > { %v2507_v10 = vadd.f32 %v3507_v19, %v4594_v12  ;;  %v2524_v11 = vmax.f32 %v2504_v20, 0.0  ;;  %v3173_v19 = vld [vmem:[%s4705_s8] ss:$0 sm:$0xff] }
 0x2af   : > { %v2525_v28 = vmax.f32 %v2507_v10, 0.0 }
 0x2b1   : > { %v2533_v13 = vpack.c.bf16 %v2525_v28, %v2524_v11 }
 0x2b3   : > { %3569 = vmatmul.mubr.bf16.gmra.mrb[172].mxu0 %v2533_v13 }
 0x356   : > { %v3558_v12 = vpop.f32.mrb[160].mxu0 }
 0x357   : > { %v2648_v14 = vadd.f32 %v3558_v12, %v3164_v26  ;;  %v2639_v40 = vpop.f32.mrb[161].mxu0 }
 0x358   : > { %v2640_v16 = vadd.f32 %v3164_v26, %v2639_v40  ;;  %v3559_v56 = vpop.f32.mrb[162].mxu0 }
 0x359   : > { %v2651_v22 = vadd.f32 %v3559_v56, %v3164_v26  ;;  %v2642_v25 = vpop.f32.mrb[163].mxu0  ;;  %v2704_v62 = vmax.f32 %v2648_v14, 0.0 }
 0x35a   : > { %v2643_v27 = vadd.f32 %v3164_v26, %v2642_v25  ;;  %v2702_v29 = vmax.f32 %v2640_v16, 0.0 }
 0x35b   : > { %v2705_v43 = vmax.f32 %v2651_v22, 0.0 }
 0x35c   : > { %v2703_v54 = vmax.f32 %v2643_v27, 0.0 }
 0x35d   : > { %v2719_v2 = vpack.c.bf16 %v2705_v43, %v2704_v62 }
 0x35e   : > { %v2718_v31 = vpack.c.bf16 %v2703_v54, %v2702_v29 }
 0x360   : > { %3588 = vmatprep.mubr.bf16.mxu1 %v2718_v31 }
 0x361   : > { %3589 = vmatmul.mubr.bf16.vlgmr.msra.gmra.mrb[160].mxu1 %v2719_v2 }
 0x366   : > { %v3562_v33 = vpop.f32.mrb[164].mxu0 }
 0x367   : > { %v2664_v9 = vadd.f32 %v3562_v33, %v3164_v26  ;;  %v2655_v38 = vpop.f32.mrb[165].mxu0 }
 0x368   : > { %v2656_v39 = vadd.f32 %v3164_v26, %v2655_v38  ;;  %v3563_v42 = vpop.f32.mrb[166].mxu0 }
 0x369   : > { %v2667_v61 = vadd.f32 %v3563_v42, %v3164_v26  ;;  %v2658_v41 = vpop.f32.mrb[167].mxu0  ;;  %v2708_v45 = vmax.f32 %v2664_v9, 0.0 }
 0x36a   : > { %v2659_v44 = vadd.f32 %v3164_v26, %v2658_v41  ;;  %v2706_v47 = vmax.f32 %v2656_v39, 0.0 }
 0x36b   : > { %v2709_v0 = vmax.f32 %v2667_v61, 0.0 }
 0x36c   : > { %v2707_v24 = vmax.f32 %v2659_v44, 0.0 }
 0x36d   : > { %v2721_v32 = vpack.c.bf16 %v2709_v0, %v2708_v45 }
 0x36e   : > { %v2720_v48 = vpack.c.bf16 %v2707_v24, %v2706_v47 }
 0x370   : > { %3592 = vmatprep.mubr.bf16.mxu1 %v2720_v48 }
 0x371   : > { %3593 = vmatmul.mubr.bf16.gmra.mrb[164].mxu1 %v2721_v32 }
 0x376   : > { %v3566_v49 = vpop.f32.mrb[168].mxu0 }
 0x377   : > { %v2680_v50 = vadd.f32 %v3566_v49, %v3164_v26  ;;  %v2671_v36 = vpop.f32.mrb[169].mxu0 }
 0x378   : > { %v2672_v5 = vadd.f32 %v3164_v26, %v2671_v36  ;;  %v3567_v53 = vpop.f32.mrb[170].mxu0 }
 0x379   : > { %v2683_v55 = vadd.f32 %v3567_v53, %v3164_v26  ;;  %v2674_v58 = vpop.f32.mrb[171].mxu0  ;;  %v2712_v8 = vmax.f32 %v2680_v50, 0.0 }
 0x37a   : > { %v2675_v63 = vadd.f32 %v3164_v26, %v2674_v58  ;;  %v2710_v34 = vmax.f32 %v2672_v5, 0.0 }
 0x37b   : > { %v2713_v51 = vmax.f32 %v2683_v55, 0.0 }
 0x37c   : > { %v2711_v59 = vmax.f32 %v2675_v63, 0.0 }
 0x37d   : > { %v2723_v60 = vpack.c.bf16 %v2713_v51, %v2712_v8 }
 0x37e   : > { %v2722_v23 = vpack.c.bf16 %v2711_v59, %v2710_v34 }
 0x380   : > { %3596 = vmatprep.mubr.bf16.mxu1 %v2722_v23 }
 0x381   : > { %3597 = vmatmul.mubr.bf16.gmra.mrb[168].mxu1 %v2723_v60 }
 0x386   : > { %v3570_v1 = vpop.f32.mrb[172].mxu0 }
 0x387   : > { %v2696_v57 = vadd.f32 %v3570_v1, %v3164_v26  ;;  %v2687_v15 = vpop.f32.mrb[173].mxu0 }
 0x388   : > { %v2688_v46 = vadd.f32 %v3164_v26, %v2687_v15  ;;  %v3571_v3 = vpop.f32.mrb[174].mxu0 }
 0x389   : > { %v2699_v4 = vadd.f32 %v3571_v3, %v3164_v26  ;;  %v2690_v18 = vpop.f32.mrb[175].mxu0  ;;  %v2716_v21 = vmax.f32 %v2696_v57, 0.0 }
 0x38a   : > { %v2691_v37 = vadd.f32 %v3164_v26, %v2690_v18  ;;  %v2714_v7 = vmax.f32 %v2688_v46, 0.0 }
 0x38b   : > { %v2717_v6 = vmax.f32 %v2699_v4, 0.0 }
 0x38c   : > { %v2715_v17 = vmax.f32 %v2691_v37, 0.0 }
 0x38d   : > { %v2725_v35 = vpack.c.bf16 %v2717_v6, %v2716_v21 }
 0x38e   : > { %v2724_v20 = vpack.c.bf16 %v2715_v17, %v2714_v7 }
 0x390   : > { %3600 = vmatprep.mubr.bf16.mxu1 %v2724_v20 }
 0x391   : > { %3601 = vmatmul.mubr.bf16.gmra.mrb[172].mxu1 %v2725_v35 }
 0x434   : > { %v3590_v10 = vpop.f32.mrb[160].mxu1 }
 0x435   : > { %v2840_v11 = vadd.f32 %v3590_v10, %v3173_v19  ;;  %v2831_v28 = vpop.f32.mrb[161].mxu1 }
 0x436   : > { %v2832_v13 = vadd.f32 %v3173_v19, %v2831_v28  ;;  %v3591_v30 = vpop.f32.mrb[162].mxu1 }
 0x437   : > { %v2896_v52 = vmax.f32 %v2840_v11, 0.0  ;;  %v2843_v26 = vadd.f32 %v3591_v30, %v3173_v19  ;;  %v2834_v12 = vpop.f32.mrb[163].mxu1 }
 0x438   : > { %v2894_v14 = vmax.f32 %v2832_v13, 0.0  ;;  %v2835_v40 = vadd.f32 %v3173_v19, %v2834_v12 }
 0x439   : > { %2912 = vst [vmem:[%s4627_s27 + $0x10] sm:$0xff] %v2896_v52  ;;  %v2897_v16 = vmax.f32 %v2843_v26, 0.0 }
 0x43a   : > { %2910 = vst [vmem:[%s4627_s27] sm:$0xff] %v2894_v14  ;;  %v2895_v56 = vmax.f32 %v2835_v40, 0.0 }
 0x43b   : > { %2913 = vst [vmem:[%s4627_s27 + $0x18] sm:$0xff] %v2897_v16 }
 0x43c   : > { %2911 = vst [vmem:[%s4627_s27 + $0x8] sm:$0xff] %v2895_v56 }
 0x444   : > { %v3594_v22 = vpop.f32.mrb[164].mxu1 }
 0x445   : > { %v2856_v25 = vadd.f32 %v3594_v22, %v3173_v19  ;;  %v2847_v27 = vpop.f32.mrb[165].mxu1 }
 0x446   : > { %v2848_v62 = vadd.f32 %v3173_v19, %v2847_v27  ;;  %v3595_v43 = vpop.f32.mrb[166].mxu1 }
 0x447   : > { %v2900_v29 = vmax.f32 %v2856_v25, 0.0  ;;  %v2859_v54 = vadd.f32 %v3595_v43, %v3173_v19  ;;  %v2850_v2 = vpop.f32.mrb[167].mxu1 }
 0x448   : > { %v2898_v31 = vmax.f32 %v2848_v62, 0.0  ;;  %v2851_v33 = vadd.f32 %v3173_v19, %v2850_v2 }
 0x449   : > { %2916 = vst [vmem:[%s4627_s27 + $0x30] sm:$0xff] %v2900_v29  ;;  %v2901_v9 = vmax.f32 %v2859_v54, 0.0 }
 0x44a   : > { %2914 = vst [vmem:[%s4627_s27 + $0x20] sm:$0xff] %v2898_v31  ;;  %v2899_v38 = vmax.f32 %v2851_v33, 0.0 }
 0x44b   : > { %2917 = vst [vmem:[%s4627_s27 + $0x38] sm:$0xff] %v2901_v9 }
 0x44c   : > { %2915 = vst [vmem:[%s4627_s27 + $0x28] sm:$0xff] %v2899_v38 }
 0x454   : > { %v3598_v39 = vpop.f32.mrb[168].mxu1 }
 0x455   : > { %v2872_v42 = vadd.f32 %v3598_v39, %v3173_v19  ;;  %v2863_v61 = vpop.f32.mrb[169].mxu1 }
 0x456   : > { %v2864_v41 = vadd.f32 %v3173_v19, %v2863_v61  ;;  %v3599_v44 = vpop.f32.mrb[170].mxu1 }
 0x457   : > { %v2904_v45 = vmax.f32 %v2872_v42, 0.0  ;;  %v2875_v0 = vadd.f32 %v3599_v44, %v3173_v19  ;;  %v2866_v47 = vpop.f32.mrb[171].mxu1 }
 0x458   : > { %v2902_v24 = vmax.f32 %v2864_v41, 0.0  ;;  %v2867_v32 = vadd.f32 %v3173_v19, %v2866_v47 }
 0x459   : > { %2920 = vst [vmem:[%s4627_s27 + $0x50] sm:$0xff] %v2904_v45  ;;  %v2905_v48 = vmax.f32 %v2875_v0, 0.0 }
 0x45a   : > { %2918 = vst [vmem:[%s4627_s27 + $0x40] sm:$0xff] %v2902_v24  ;;  %v2903_v49 = vmax.f32 %v2867_v32, 0.0 }
 0x45b   : > { %2921 = vst [vmem:[%s4627_s27 + $0x58] sm:$0xff] %v2905_v48 }
 0x45c   : > { %2919 = vst [vmem:[%s4627_s27 + $0x48] sm:$0xff] %v2903_v49 }
 0x464   : > { %v3602_v50 = vpop.f32.mrb[172].mxu1 }
 0x465   : > { %v2888_v36 = vadd.f32 %v3602_v50, %v3173_v19  ;;  %v2879_v5 = vpop.f32.mrb[173].mxu1 }
 0x466   : > { %v2880_v53 = vadd.f32 %v3173_v19, %v2879_v5  ;;  %v3603_v55 = vpop.f32.mrb[174].mxu1 }
 0x467   : > { %v2908_v58 = vmax.f32 %v2888_v36, 0.0  ;;  %v2891_v63 = vadd.f32 %v3603_v55, %v3173_v19  ;;  %v2882_v8 = vpop.f32.mrb[175].mxu1 }
 0x468   : > { %v2906_v51 = vmax.f32 %v2880_v53, 0.0  ;;  %v2883_v34 = vadd.f32 %v3173_v19, %v2882_v8 }
 0x469   : > { %2924 = vst [vmem:[%s4627_s27 + $0x70] sm:$0xff] %v2908_v58  ;;  %v2909_v59 = vmax.f32 %v2891_v63, 0.0 }
 0x46a   : > { %2922 = vst [vmem:[%s4627_s27 + $0x60] sm:$0xff] %v2906_v51  ;;  %v2907_v60 = vmax.f32 %v2883_v34, 0.0 }
 0x46b   : > { %2925 = vst [vmem:[%s4627_s27 + $0x78] sm:$0xff] %v2909_v59 }
 0x46c   : > { %2923 = vst [vmem:[%s4627_s27 + $0x68] sm:$0xff] %v2907_v60 }
 0x46d   : > { %3826 = shalt.err (!%p3823_p7)
}
 0x46e   : > { %s3827_s21 = scalar_lea.hbm %s4647_s28, 2048  ;;  %s3831_s24 = scalar_lea.hbm %s4706_s9, 4096 }
 0x46f   : > { %p3828_p8 = scmp.ne.s32.totalorder %s4647_s28, %s3827_s21  ;;  %p3832_p1 = scmp.lt.u32.totalorder %s4647_s28, %s4706_s9 }
 0x470   : > { %p3833_p0 = scmp.lt.u32.totalorder %s3831_s24, %s3827_s21  ;;  %p3835_p6 = scmp.lt.u32.totalorder %s3827_s21, %s4647_s28 }
 0x471   : > { %p3829_p11 = pnand %p3828_p8, %p4717_p9 }
 0x472   : > { %p3834_p5 = por %p3833_p0, %p3832_p1 }
 0x473   : > { %p3830_p13 = pneg %p3829_p11 }
 0x474   : > { %p3836_p10 = por %p3835_p6, %p3834_p5 }
 0x476   : > { %p3837_p12 = pnand %p3836_p10, %p3830_p13 }
 0x478   : > { %3840 = shalt.err (!%p3837_p12)
}
 0x479   : > { %s3886_s23 = smov 128   ;;  %s3887_s29 = smov 8  }
 0x47a   : > { %3608 = dma.vmem_to_hbm [thread:$0]  (%p4717_p9), %s4649_s22, 2048, %s4647_s28, %s4656_s13, %s3886_s23, %s3886_s23, %s3887_s29  }
 0x47b PF: > { %p3620_p2 = scmp.ge.s32.totalorder %s3879_s12, 2  ;;  %s2955_s14 = sand.u32 1, %s3867_s30  }
 0x47c   : > { %p4718_p3 = scmp.ne.s32.totalorder %s4711_s20, 0  ;;  %s2956_s16 = scalar_lea.sflag [#allocation4], %s2955_s14 }
 0x47e   : > { %p3615_p4 = pnand %p3620_p2, %p4718_p3 }
 0x480   : > { %3862 = dma.done.wait (!%p3615_p4), %s2956_s16, 2048  }
 0x481   : > { %3864 = vsyncadd (!%p3615_p4), %s2956_s16, 4294965248  ;;  %p20_p7 = scmp.ge.s32.totalorder %s3963_s15, 4   ;;  %s4719_s30 = smov %s3871_s10 }
 0x482   : > { %s4720_s10 = smov %s3875_s11  ;;  %s4721_s11 = smov %s3974_s18 }
 0x483   : > { %s4722_s12 = smov %s3963_s15  ;;  %22 = sbr.rel (!%p20_p7) target bundleno = 4 (0x4), region = 96 }
 0x48a   :  { %2961 = vsyncpa [#allocation3], 1 }
 0x48b   :  { %2963 = vsyncpa [#allocation3 + $0x1], 1 }
 0x48c   :  { %2964 = vsyncpa [#allocation4], 1 }
 0x48d   :  { %2966 = vsyncpa [#allocation4 + $0x1], 1 }

</bundles_post_ra>
